<compile_context>
chip_gen: v5e
topology: v5e:2x2
jax: 0.10.0
libtpu: 0.0.40
codegen_flags: <defaults>
</compile_context>

<pallas_src>
import jax
import jax.numpy as jnp
from jax.experimental import pallas as pl
from jax.experimental.pallas import tpu as pltpu


# ----------------------------------------------------------------------------
# Fused Pallas kernel (one image per grid step)
# ----------------------------------------------------------------------------
def _lenet_vgg_kernel(p1_ref, w1_ref, b1_ref, w2_ref, b2_ref,
                      wf1_ref, bf1_ref, wf2_ref, bf2_ref, wf3_ref, bf3_ref,
                      o_ref):
    H2 = W2 = 16      # spatial size after the first 2x2 maxpool
    C1 = 64           # conv1 output channels

    # ---- conv1 + bias + ReLU + 2x2 maxpool, as 4 im2col matmuls ------------
    # p1_ref[0, t] holds the (256, 32) patch matrix of pool-window position t.
    w1 = w1_ref[...]                                          # (32, 64) bf16
    m = jnp.dot(p1_ref[0, 0], w1, preferred_element_type=jnp.float32)
    for t in range(1, 4):
        m = jnp.maximum(
            m, jnp.dot(p1_ref[0, t], w1, preferred_element_type=jnp.float32))
    pooled1 = jnp.maximum(m + b1_ref[...], 0.0)               # (256, 64) f32
    pooled1 = pooled1.astype(jnp.bfloat16).reshape(H2, W2, C1)

    # ---- conv2: zero-pad + 9-tap im2col + single matmul + bias + ReLU ------
    zr = jnp.zeros((1, W2, C1), jnp.bfloat16)
    zc = jnp.zeros((H2 + 2, 1, C1), jnp.bfloat16)
    xp = jnp.concatenate([zr, pooled1, zr], axis=0)           # (18, 16, 64)
    xp = jnp.concatenate([zc, xp, zc], axis=1)                # (18, 18, 64)
    taps = [xp[dy:dy + H2, dx:dx + W2, :].reshape(H2 * W2, C1)
            for dy in range(3) for dx in range(3)]
    p2 = jnp.concatenate(taps, axis=1)                        # (256, 576) bf16
    a2 = jnp.dot(p2, w2_ref[...], preferred_element_type=jnp.float32)
    a2 = jnp.maximum(a2 + b2_ref[...], 0.0)                   # (256, 16) f32

    # ---- 2x2 maxpool via shifted-slice maxima ------------------------------
    y = jnp.maximum(a2[:-1], a2[1:])                          # pool along w
    z = jnp.maximum(y[:-W2], y[W2:])                          # pool along h
    # pooled pixel (hp, wp) now lives at row 2*W2*hp + 2*wp of z.

    # ---- flatten in (h, w, c) order (fc1 weights are pre-permuted) ---------
    flat = jnp.concatenate(
        [z[2 * W2 * hp + 2 * wp:2 * W2 * hp + 2 * wp + 1, :]
         for hp in range(8) for wp in range(8)],
        axis=1).astype(jnp.bfloat16)                          # (1, 1024)

    # ---- fc1 -> fc2 -> fc3 (no nonlinearity, as in the PyTorch forward) ----
    h = jnp.dot(flat, wf1_ref[...],
                preferred_element_type=jnp.float32) + bf1_ref[...]
    h = jnp.dot(h.astype(jnp.bfloat16), wf2_ref[...],
                preferred_element_type=jnp.float32) + bf2_ref[...]
    out = jnp.dot(h.astype(jnp.bfloat16), wf3_ref[...],
                  preferred_element_type=jnp.float32) + bf3_ref[...]
    o_ref[0] = out.astype(o_ref.dtype)


# ----------------------------------------------------------------------------
# Wrapper-side preparation + pallas_call
# ----------------------------------------------------------------------------
def _build_conv1_patches(x_nhwc):
    """im2col of the padded input for conv1, split by 2x2 pool-window position.

    Returns (N, 4, 256, 32) bf16:
      [n, pool-window position (hl*2+wl), pooled pixel h'*16+w',
       feature (ky*3+kx)*Cin + cin  (27 real + 5 zero pad)].
    """
    N, H, W, Cin = x_nhwc.shape                              # H = W = 32, Cin = 3
    xp = jnp.pad(x_nhwc, ((0, 0), (1, 1), (1, 1), (0, 0)))
    cols = [xp[:, dy:dy + H, dx:dx + W, :]
            for dy in range(3) for dx in range(3)]
    pat = jnp.concatenate(cols, axis=-1)                     # (N, 32, 32, 27)
    pat = jnp.pad(pat, ((0, 0), (0, 0), (0, 0), (0, 32 - 9 * Cin)))
    pat = pat.reshape(N, H // 2, 2, W // 2, 2, 32)           # (n, h', hl, w', wl, f)
    pat = pat.transpose(0, 2, 4, 1, 3, 5)                    # (n, hl, wl, h', w', f)
    return pat.reshape(N, 4, (H // 2) * (W // 2), 32).astype(jnp.bfloat16)


@jax.jit
def lenet_vgg_forward(params, x_nchw):
    # weight masking (as in forward(): conv.weight = conv.weight * mask.weight)
    w1 = params["conv1_w"] * params["mask1"]                 # (64, 3, 3, 3) OIHW
    w2 = params["conv2_w"] * params["mask2"]                 # (16, 64, 3, 3)

    N = x_nchw.shape[0]
    x = jnp.transpose(x_nchw, (0, 2, 3, 1)).astype(jnp.float32)   # NCHW -> NHWC
    p1 = _build_conv1_patches(x)                                  # (N, 4, 256, 32)

    # conv weights -> im2col layout (ky*kx*Cin, Cout); conv1's K padded to 32.
    w1c = jnp.transpose(w1, (2, 3, 1, 0)).reshape(27, 64)
    w1c = jnp.pad(w1c, ((0, 5), (0, 0))).astype(jnp.bfloat16)     # (32, 64)
    w2c = jnp.transpose(w2, (2, 3, 1, 0)).reshape(576, 16).astype(jnp.bfloat16)

    # fc1 weight columns permuted from torch's (c, h, w) flatten order to the
    # kernel's (h, w, c) order, then transposed for x @ W.
    C2, Hf, Wf = 16, 8, 8
    hh, ww, cc = jnp.meshgrid(jnp.arange(Hf), jnp.arange(Wf), jnp.arange(C2),
                              indexing="ij")
    perm = (cc * (Hf * Wf) + hh * Wf + ww).reshape(-1)            # (1024,)
    wf1 = params["fc1_w"][:, perm].T.astype(jnp.bfloat16)         # (1024, 256)
    wf2 = params["fc2_w"].T.astype(jnp.bfloat16)                  # (256, 84)
    wf3 = params["fc3_w"].T.astype(jnp.bfloat16)                  # (84, 10)

    b1 = params["conv1_b"].reshape(1, -1).astype(jnp.float32)
    b2 = params["conv2_b"].reshape(1, -1).astype(jnp.float32)
    bf1 = params["fc1_b"].reshape(1, -1).astype(jnp.float32)
    bf2 = params["fc2_b"].reshape(1, -1).astype(jnp.float32)
    bf3 = params["fc3_b"].reshape(1, -1).astype(jnp.float32)

    def full_spec(a):
        return pl.BlockSpec(a.shape, lambda n: (0,) * a.ndim)

    out = pl.pallas_call(
        _lenet_vgg_kernel,
        out_shape=jax.ShapeDtypeStruct((N, 1, 10), jnp.float32),
        grid=(N,),
        in_specs=[
            pl.BlockSpec((1, 4, 256, 32), lambda n: (n, 0, 0, 0)),
            full_spec(w1c), full_spec(b1),
            full_spec(w2c), full_spec(b2),
            full_spec(wf1), full_spec(bf1),
            full_spec(wf2), full_spec(bf2),
            full_spec(wf3), full_spec(bf3),
        ],
        out_specs=pl.BlockSpec((1, 1, 10), lambda n: (n, 0, 0)),
        compiler_params=pltpu.CompilerParams(
            dimension_semantics=("parallel",)),
    )(p1, w1c, b1, w2c, b2, wf1, bf1, wf2, bf2, wf3, bf3)
    return out.reshape(N, 10)


# ----------------------------------------------------------------------------
# Parameters (deterministic, synthetic)
# ----------------------------------------------------------------------------
def init_params(key):
    ks = jax.random.split(key, 10)

    def u(k, shape, fan_in):
        bound = 1.0 / (fan_in ** 0.5)
        return jax.random.uniform(k, shape, jnp.float32, -bound, bound)

    return {
        "conv1_w": u(ks[0], (64, 3, 3, 3), 3 * 9),    # OIHW
        "conv1_b": u(ks[1], (64,), 3 * 9),
        "conv2_w": u(ks[2], (16, 64, 3, 3), 64 * 9),  # OIHW
        "conv2_b": u(ks[3], (16,), 64 * 9),
        "fc1_w": u(ks[4], (256, 1024), 1024),          # (out, in), torch layout
        "fc1_b": u(ks[5], (256,), 1024),
        "fc2_w": u(ks[6], (84, 256), 256),
        "fc2_b": u(ks[7], (84,), 256),
        "fc3_w": u(ks[8], (10, 84), 84),
        "fc3_b": u(ks[9], (10,), 84),
        # pruning masks (ones -> unpruned), multiplied into conv weights each
        # forward pass, exactly as in the PyTorch module.
        "mask1": jnp.ones((64, 3, 3, 3), jnp.float32),
        "mask2": jnp.ones((16, 64, 3, 3), jnp.float32),
    }


if __name__ == "__main__":
    key = jax.random.PRNGKey(0)
    pkey, xkey = jax.random.split(key)
    params = init_params(pkey)

    # fc1 expects 1024 = 16 * 8 * 8 features, which pins the spatial size to
    # 32x32 (CIFAR-like); keep the batch small.
    x = jax.random.normal(xkey, (2, 3, 32, 32), jnp.float32)

    out = lenet_vgg_forward(params, x)
    out = jax.block_until_ready(out)
    assert out.shape == (2, 10), out.shape
    print("KERNEL_OK")
</pallas_src>

<mosaic_0001>
module attributes {stable_mosaic.version = 11 : i64} {
  func.func @_lenet_vgg_kernel(%arg0: i32, %arg1: memref<1x4x256x32xbf16, #tpu.memory_space<vmem>>, %arg2: memref<32x64xbf16, #tpu.memory_space<vmem>>, %arg3: memref<1x64xf32, #tpu.memory_space<vmem>>, %arg4: memref<576x16xbf16, #tpu.memory_space<vmem>>, %arg5: memref<1x16xf32, #tpu.memory_space<vmem>>, %arg6: memref<1024x256xbf16, #tpu.memory_space<vmem>>, %arg7: memref<1x256xf32, #tpu.memory_space<vmem>>, %arg8: memref<256x84xbf16, #tpu.memory_space<vmem>>, %arg9: memref<1x84xf32, #tpu.memory_space<vmem>>, %arg10: memref<84x10xbf16, #tpu.memory_space<vmem>>, %arg11: memref<1x10xf32, #tpu.memory_space<vmem>>, %arg12: memref<1x1x10xf32, #tpu.memory_space<vmem>>) attributes {dimension_semantics = [#tpu.dimension_semantics<parallel>], iteration_bounds = array<i64: 2>, scalar_prefetch = 0 : i64, scratch_operands = 0 : i64, tpu.core_type = #tpu.core_type<tc>, window_params = [{transform_indices = @transform_0, window_bounds = array<i64: 1, 4, 256, 32>}, {pipeline_mode = #tpu.pipeline_mode<synchronous>, transform_indices = @transform_1, window_bounds = array<i64: 32, 64>}, {pipeline_mode = #tpu.pipeline_mode<synchronous>, transform_indices = @transform_2, window_bounds = array<i64: 1, 64>}, {pipeline_mode = #tpu.pipeline_mode<synchronous>, transform_indices = @transform_3, window_bounds = array<i64: 576, 16>}, {pipeline_mode = #tpu.pipeline_mode<synchronous>, transform_indices = @transform_4, window_bounds = array<i64: 1, 16>}, {pipeline_mode = #tpu.pipeline_mode<synchronous>, transform_indices = @transform_5, window_bounds = array<i64: 1024, 256>}, {pipeline_mode = #tpu.pipeline_mode<synchronous>, transform_indices = @transform_6, window_bounds = array<i64: 1, 256>}, {pipeline_mode = #tpu.pipeline_mode<synchronous>, transform_indices = @transform_7, window_bounds = array<i64: 256, 84>}, {pipeline_mode = #tpu.pipeline_mode<synchronous>, transform_indices = @transform_8, window_bounds = array<i64: 1, 84>}, {pipeline_mode = #tpu.pipeline_mode<synchronous>, transform_indices = @transform_9, window_bounds = array<i64: 84, 10>}, {pipeline_mode = #tpu.pipeline_mode<synchronous>, transform_indices = @transform_10, window_bounds = array<i64: 1, 10>}, {transform_indices = @transform_11, window_bounds = array<i64: 1, 1, 10>}]} {
    %c0 = arith.constant 0 : index
    %c0_0 = arith.constant 0 : index
    %0 = vector.load %arg2[%c0, %c0_0] : memref<32x64xbf16, #tpu.memory_space<vmem>>, vector<32x64xbf16>
    %c0_1 = arith.constant 0 : index
    %c0_2 = arith.constant 0 : index
    %c0_3 = arith.constant 0 : index
    %c0_4 = arith.constant 0 : index
    %1 = vector.load %arg1[%c0_1, %c0_2, %c0_3, %c0_4] : memref<1x4x256x32xbf16, #tpu.memory_space<vmem>>, vector<1x1x256x32xbf16>
    %2 = vector.shape_cast %1 : vector<1x1x256x32xbf16> to vector<256x32xbf16>
    %cst = arith.constant dense<0.000000e+00> : vector<256x64xf32>
    %3 = tpu.matmul %2, %0, %cst {dimension_numbers = #tpu.dot_dimension_numbers<[1], [0], [0], [1], [0, 0, 1, 1], [], []>} : vector<256x32xbf16>, vector<32x64xbf16>, vector<256x64xf32> -> vector<256x64xf32>
    %c0_5 = arith.constant 0 : index
    %c1 = arith.constant 1 : index
    %c0_6 = arith.constant 0 : index
    %c0_7 = arith.constant 0 : index
    %4 = vector.load %arg1[%c0_5, %c1, %c0_6, %c0_7] : memref<1x4x256x32xbf16, #tpu.memory_space<vmem>>, vector<1x1x256x32xbf16>
    %5 = vector.shape_cast %4 : vector<1x1x256x32xbf16> to vector<256x32xbf16>
    %cst_8 = arith.constant dense<0.000000e+00> : vector<256x64xf32>
    %6 = tpu.matmul %5, %0, %cst_8 {dimension_numbers = #tpu.dot_dimension_numbers<[1], [0], [0], [1], [0, 0, 1, 1], [], []>} : vector<256x32xbf16>, vector<32x64xbf16>, vector<256x64xf32> -> vector<256x64xf32>
    %7 = arith.maximumf %3, %6 : vector<256x64xf32>
    %c0_9 = arith.constant 0 : index
    %c2 = arith.constant 2 : index
    %c0_10 = arith.constant 0 : index
    %c0_11 = arith.constant 0 : index
    %8 = vector.load %arg1[%c0_9, %c2, %c0_10, %c0_11] : memref<1x4x256x32xbf16, #tpu.memory_space<vmem>>, vector<1x1x256x32xbf16>
    %9 = vector.shape_cast %8 : vector<1x1x256x32xbf16> to vector<256x32xbf16>
    %cst_12 = arith.constant dense<0.000000e+00> : vector<256x64xf32>
    %10 = tpu.matmul %9, %0, %cst_12 {dimension_numbers = #tpu.dot_dimension_numbers<[1], [0], [0], [1], [0, 0, 1, 1], [], []>} : vector<256x32xbf16>, vector<32x64xbf16>, vector<256x64xf32> -> vector<256x64xf32>
    %11 = arith.maximumf %7, %10 : vector<256x64xf32>
    %c0_13 = arith.constant 0 : index
    %c3 = arith.constant 3 : index
    %c0_14 = arith.constant 0 : index
    %c0_15 = arith.constant 0 : index
    %12 = vector.load %arg1[%c0_13, %c3, %c0_14, %c0_15] : memref<1x4x256x32xbf16, #tpu.memory_space<vmem>>, vector<1x1x256x32xbf16>
    %13 = vector.shape_cast %12 : vector<1x1x256x32xbf16> to vector<256x32xbf16>
    %cst_16 = arith.constant dense<0.000000e+00> : vector<256x64xf32>
    %14 = tpu.matmul %13, %0, %cst_16 {dimension_numbers = #tpu.dot_dimension_numbers<[1], [0], [0], [1], [0, 0, 1, 1], [], []>} : vector<256x32xbf16>, vector<32x64xbf16>, vector<256x64xf32> -> vector<256x64xf32>
    %15 = arith.maximumf %11, %14 : vector<256x64xf32>
    %c0_17 = arith.constant 0 : index
    %c0_18 = arith.constant 0 : index
    %16 = vector.load %arg3[%c0_17, %c0_18] : memref<1x64xf32, #tpu.memory_space<vmem>>, vector<1x64xf32>
    %17 = vector.broadcast %16 : vector<1x64xf32> to vector<256x64xf32>
    %18 = arith.addf %15, %17 : vector<256x64xf32>
    %cst_19 = arith.constant 0.000000e+00 : f32
    %19 = vector.broadcast %cst_19 : f32 to vector<256x64xf32>
    %20 = arith.maximumf %18, %19 : vector<256x64xf32>
    %21 = arith.truncf %20 : vector<256x64xf32> to vector<256x64xbf16>
    %22 = vector.shape_cast %21 : vector<256x64xbf16> to vector<16x16x64xbf16>
    %cst_20 = arith.constant 0.000000e+00 : bf16
    %23 = vector.broadcast %cst_20 : bf16 to vector<1x16x64xbf16>
    %cst_21 = arith.constant 0.000000e+00 : bf16
    %24 = vector.broadcast %cst_21 : bf16 to vector<18x1x64xbf16>
    %25 = tpu.concatenate %23, %22, %23 in 0 : vector<1x16x64xbf16>, vector<16x16x64xbf16>, vector<1x16x64xbf16> -> vector<18x16x64xbf16>
    %26 = tpu.concatenate %24, %25, %24 in 1 : vector<18x1x64xbf16>, vector<18x16x64xbf16>, vector<18x1x64xbf16> -> vector<18x18x64xbf16>
    %27 = vector.extract_strided_slice %26 {offsets = [0, 0, 0], sizes = [16, 16, 64], strides = [1, 1, 1]} : vector<18x18x64xbf16> to vector<16x16x64xbf16>
    %28 = vector.shape_cast %27 : vector<16x16x64xbf16> to vector<256x64xbf16>
    %29 = vector.extract_strided_slice %26 {offsets = [0, 1, 0], sizes = [16, 16, 64], strides = [1, 1, 1]} : vector<18x18x64xbf16> to vector<16x16x64xbf16>
    %30 = vector.shape_cast %29 : vector<16x16x64xbf16> to vector<256x64xbf16>
    %31 = vector.extract_strided_slice %26 {offsets = [0, 2, 0], sizes = [16, 16, 64], strides = [1, 1, 1]} : vector<18x18x64xbf16> to vector<16x16x64xbf16>
    %32 = vector.shape_cast %31 : vector<16x16x64xbf16> to vector<256x64xbf16>
    %33 = vector.extract_strided_slice %26 {offsets = [1, 0, 0], sizes = [16, 16, 64], strides = [1, 1, 1]} : vector<18x18x64xbf16> to vector<16x16x64xbf16>
    %34 = vector.shape_cast %33 : vector<16x16x64xbf16> to vector<256x64xbf16>
    %35 = vector.extract_strided_slice %26 {offsets = [1, 1, 0], sizes = [16, 16, 64], strides = [1, 1, 1]} : vector<18x18x64xbf16> to vector<16x16x64xbf16>
    %36 = vector.shape_cast %35 : vector<16x16x64xbf16> to vector<256x64xbf16>
    %37 = vector.extract_strided_slice %26 {offsets = [1, 2, 0], sizes = [16, 16, 64], strides = [1, 1, 1]} : vector<18x18x64xbf16> to vector<16x16x64xbf16>
    %38 = vector.shape_cast %37 : vector<16x16x64xbf16> to vector<256x64xbf16>
    %39 = vector.extract_strided_slice %26 {offsets = [2, 0, 0], sizes = [16, 16, 64], strides = [1, 1, 1]} : vector<18x18x64xbf16> to vector<16x16x64xbf16>
    %40 = vector.shape_cast %39 : vector<16x16x64xbf16> to vector<256x64xbf16>
    %41 = vector.extract_strided_slice %26 {offsets = [2, 1, 0], sizes = [16, 16, 64], strides = [1, 1, 1]} : vector<18x18x64xbf16> to vector<16x16x64xbf16>
    %42 = vector.shape_cast %41 : vector<16x16x64xbf16> to vector<256x64xbf16>
    %43 = vector.extract_strided_slice %26 {offsets = [2, 2, 0], sizes = [16, 16, 64], strides = [1, 1, 1]} : vector<18x18x64xbf16> to vector<16x16x64xbf16>
    %44 = vector.shape_cast %43 : vector<16x16x64xbf16> to vector<256x64xbf16>
    %45 = tpu.concatenate %28, %30, %32, %34, %36, %38, %40, %42, %44 in 1 : vector<256x64xbf16>, vector<256x64xbf16>, vector<256x64xbf16>, vector<256x64xbf16>, vector<256x64xbf16>, vector<256x64xbf16>, vector<256x64xbf16>, vector<256x64xbf16>, vector<256x64xbf16> -> vector<256x576xbf16>
    %c0_22 = arith.constant 0 : index
    %c0_23 = arith.constant 0 : index
    %46 = vector.load %arg4[%c0_22, %c0_23] : memref<576x16xbf16, #tpu.memory_space<vmem>>, vector<576x16xbf16>
    %cst_24 = arith.constant dense<0.000000e+00> : vector<256x16xf32>
    %47 = tpu.matmul %45, %46, %cst_24 {dimension_numbers = #tpu.dot_dimension_numbers<[1], [0], [0], [1], [0, 0, 1, 1], [], []>} : vector<256x576xbf16>, vector<576x16xbf16>, vector<256x16xf32> -> vector<256x16xf32>
    %c0_25 = arith.constant 0 : index
    %c0_26 = arith.constant 0 : index
    %48 = vector.load %arg5[%c0_25, %c0_26] : memref<1x16xf32, #tpu.memory_space<vmem>>, vector<1x16xf32>
    %49 = vector.broadcast %48 : vector<1x16xf32> to vector<256x16xf32>
    %50 = arith.addf %47, %49 : vector<256x16xf32>
    %cst_27 = arith.constant 0.000000e+00 : f32
    %51 = vector.broadcast %cst_27 : f32 to vector<256x16xf32>
    %52 = arith.maximumf %50, %51 : vector<256x16xf32>
    %53 = vector.extract_strided_slice %52 {offsets = [0, 0], sizes = [255, 16], strides = [1, 1]} : vector<256x16xf32> to vector<255x16xf32>
    %54 = vector.extract_strided_slice %52 {offsets = [1, 0], sizes = [255, 16], strides = [1, 1]} : vector<256x16xf32> to vector<255x16xf32>
    %55 = arith.maximumf %53, %54 : vector<255x16xf32>
    %56 = vector.extract_strided_slice %55 {offsets = [0, 0], sizes = [239, 16], strides = [1, 1]} : vector<255x16xf32> to vector<239x16xf32>
    %57 = vector.extract_strided_slice %55 {offsets = [16, 0], sizes = [239, 16], strides = [1, 1]} : vector<255x16xf32> to vector<239x16xf32>
    %58 = arith.maximumf %56, %57 : vector<239x16xf32>
    %59 = vector.extract_strided_slice %58 {offsets = [0, 0], sizes = [1, 16], strides = [1, 1]} : vector<239x16xf32> to vector<1x16xf32>
    %60 = vector.extract_strided_slice %58 {offsets = [2, 0], sizes = [1, 16], strides = [1, 1]} : vector<239x16xf32> to vector<1x16xf32>
    %61 = vector.extract_strided_slice %58 {offsets = [4, 0], sizes = [1, 16], strides = [1, 1]} : vector<239x16xf32> to vector<1x16xf32>
    %62 = vector.extract_strided_slice %58 {offsets = [6, 0], sizes = [1, 16], strides = [1, 1]} : vector<239x16xf32> to vector<1x16xf32>
    %63 = vector.extract_strided_slice %58 {offsets = [8, 0], sizes = [1, 16], strides = [1, 1]} : vector<239x16xf32> to vector<1x16xf32>
    %64 = vector.extract_strided_slice %58 {offsets = [10, 0], sizes = [1, 16], strides = [1, 1]} : vector<239x16xf32> to vector<1x16xf32>
    %65 = vector.extract_strided_slice %58 {offsets = [12, 0], sizes = [1, 16], strides = [1, 1]} : vector<239x16xf32> to vector<1x16xf32>
    %66 = vector.extract_strided_slice %58 {offsets = [14, 0], sizes = [1, 16], strides = [1, 1]} : vector<239x16xf32> to vector<1x16xf32>
    %67 = vector.extract_strided_slice %58 {offsets = [32, 0], sizes = [1, 16], strides = [1, 1]} : vector<239x16xf32> to vector<1x16xf32>
    %68 = vector.extract_strided_slice %58 {offsets = [34, 0], sizes = [1, 16], strides = [1, 1]} : vector<239x16xf32> to vector<1x16xf32>
    %69 = vector.extract_strided_slice %58 {offsets = [36, 0], sizes = [1, 16], strides = [1, 1]} : vector<239x16xf32> to vector<1x16xf32>
    %70 = vector.extract_strided_slice %58 {offsets = [38, 0], sizes = [1, 16], strides = [1, 1]} : vector<239x16xf32> to vector<1x16xf32>
    %71 = vector.extract_strided_slice %58 {offsets = [40, 0], sizes = [1, 16], strides = [1, 1]} : vector<239x16xf32> to vector<1x16xf32>
    %72 = vector.extract_strided_slice %58 {offsets = [42, 0], sizes = [1, 16], strides = [1, 1]} : vector<239x16xf32> to vector<1x16xf32>
    %73 = vector.extract_strided_slice %58 {offsets = [44, 0], sizes = [1, 16], strides = [1, 1]} : vector<239x16xf32> to vector<1x16xf32>
    %74 = vector.extract_strided_slice %58 {offsets = [46, 0], sizes = [1, 16], strides = [1, 1]} : vector<239x16xf32> to vector<1x16xf32>
    %75 = vector.extract_strided_slice %58 {offsets = [64, 0], sizes = [1, 16], strides = [1, 1]} : vector<239x16xf32> to vector<1x16xf32>
    %76 = vector.extract_strided_slice %58 {offsets = [66, 0], sizes = [1, 16], strides = [1, 1]} : vector<239x16xf32> to vector<1x16xf32>
    %77 = vector.extract_strided_slice %58 {offsets = [68, 0], sizes = [1, 16], strides = [1, 1]} : vector<239x16xf32> to vector<1x16xf32>
    %78 = vector.extract_strided_slice %58 {offsets = [70, 0], sizes = [1, 16], strides = [1, 1]} : vector<239x16xf32> to vector<1x16xf32>
    %79 = vector.extract_strided_slice %58 {offsets = [72, 0], sizes = [1, 16], strides = [1, 1]} : vector<239x16xf32> to vector<1x16xf32>
    %80 = vector.extract_strided_slice %58 {offsets = [74, 0], sizes = [1, 16], strides = [1, 1]} : vector<239x16xf32> to vector<1x16xf32>
    %81 = vector.extract_strided_slice %58 {offsets = [76, 0], sizes = [1, 16], strides = [1, 1]} : vector<239x16xf32> to vector<1x16xf32>
    %82 = vector.extract_strided_slice %58 {offsets = [78, 0], sizes = [1, 16], strides = [1, 1]} : vector<239x16xf32> to vector<1x16xf32>
    %83 = vector.extract_strided_slice %58 {offsets = [96, 0], sizes = [1, 16], strides = [1, 1]} : vector<239x16xf32> to vector<1x16xf32>
    %84 = vector.extract_strided_slice %58 {offsets = [98, 0], sizes = [1, 16], strides = [1, 1]} : vector<239x16xf32> to vector<1x16xf32>
    %85 = vector.extract_strided_slice %58 {offsets = [100, 0], sizes = [1, 16], strides = [1, 1]} : vector<239x16xf32> to vector<1x16xf32>
    %86 = vector.extract_strided_slice %58 {offsets = [102, 0], sizes = [1, 16], strides = [1, 1]} : vector<239x16xf32> to vector<1x16xf32>
    %87 = vector.extract_strided_slice %58 {offsets = [104, 0], sizes = [1, 16], strides = [1, 1]} : vector<239x16xf32> to vector<1x16xf32>
    %88 = vector.extract_strided_slice %58 {offsets = [106, 0], sizes = [1, 16], strides = [1, 1]} : vector<239x16xf32> to vector<1x16xf32>
    %89 = vector.extract_strided_slice %58 {offsets = [108, 0], sizes = [1, 16], strides = [1, 1]} : vector<239x16xf32> to vector<1x16xf32>
    %90 = vector.extract_strided_slice %58 {offsets = [110, 0], sizes = [1, 16], strides = [1, 1]} : vector<239x16xf32> to vector<1x16xf32>
    %91 = vector.extract_strided_slice %58 {offsets = [128, 0], sizes = [1, 16], strides = [1, 1]} : vector<239x16xf32> to vector<1x16xf32>
    %92 = vector.extract_strided_slice %58 {offsets = [130, 0], sizes = [1, 16], strides = [1, 1]} : vector<239x16xf32> to vector<1x16xf32>
    %93 = vector.extract_strided_slice %58 {offsets = [132, 0], sizes = [1, 16], strides = [1, 1]} : vector<239x16xf32> to vector<1x16xf32>
    %94 = vector.extract_strided_slice %58 {offsets = [134, 0], sizes = [1, 16], strides = [1, 1]} : vector<239x16xf32> to vector<1x16xf32>
    %95 = vector.extract_strided_slice %58 {offsets = [136, 0], sizes = [1, 16], strides = [1, 1]} : vector<239x16xf32> to vector<1x16xf32>
    %96 = vector.extract_strided_slice %58 {offsets = [138, 0], sizes = [1, 16], strides = [1, 1]} : vector<239x16xf32> to vector<1x16xf32>
    %97 = vector.extract_strided_slice %58 {offsets = [140, 0], sizes = [1, 16], strides = [1, 1]} : vector<239x16xf32> to vector<1x16xf32>
    %98 = vector.extract_strided_slice %58 {offsets = [142, 0], sizes = [1, 16], strides = [1, 1]} : vector<239x16xf32> to vector<1x16xf32>
    %99 = vector.extract_strided_slice %58 {offsets = [160, 0], sizes = [1, 16], strides = [1, 1]} : vector<239x16xf32> to vector<1x16xf32>
    %100 = vector.extract_strided_slice %58 {offsets = [162, 0], sizes = [1, 16], strides = [1, 1]} : vector<239x16xf32> to vector<1x16xf32>
    %101 = vector.extract_strided_slice %58 {offsets = [164, 0], sizes = [1, 16], strides = [1, 1]} : vector<239x16xf32> to vector<1x16xf32>
    %102 = vector.extract_strided_slice %58 {offsets = [166, 0], sizes = [1, 16], strides = [1, 1]} : vector<239x16xf32> to vector<1x16xf32>
    %103 = vector.extract_strided_slice %58 {offsets = [168, 0], sizes = [1, 16], strides = [1, 1]} : vector<239x16xf32> to vector<1x16xf32>
    %104 = vector.extract_strided_slice %58 {offsets = [170, 0], sizes = [1, 16], strides = [1, 1]} : vector<239x16xf32> to vector<1x16xf32>
    %105 = vector.extract_strided_slice %58 {offsets = [172, 0], sizes = [1, 16], strides = [1, 1]} : vector<239x16xf32> to vector<1x16xf32>
    %106 = vector.extract_strided_slice %58 {offsets = [174, 0], sizes = [1, 16], strides = [1, 1]} : vector<239x16xf32> to vector<1x16xf32>
    %107 = vector.extract_strided_slice %58 {offsets = [192, 0], sizes = [1, 16], strides = [1, 1]} : vector<239x16xf32> to vector<1x16xf32>
    %108 = vector.extract_strided_slice %58 {offsets = [194, 0], sizes = [1, 16], strides = [1, 1]} : vector<239x16xf32> to vector<1x16xf32>
    %109 = vector.extract_strided_slice %58 {offsets = [196, 0], sizes = [1, 16], strides = [1, 1]} : vector<239x16xf32> to vector<1x16xf32>
    %110 = vector.extract_strided_slice %58 {offsets = [198, 0], sizes = [1, 16], strides = [1, 1]} : vector<239x16xf32> to vector<1x16xf32>
    %111 = vector.extract_strided_slice %58 {offsets = [200, 0], sizes = [1, 16], strides = [1, 1]} : vector<239x16xf32> to vector<1x16xf32>
    %112 = vector.extract_strided_slice %58 {offsets = [202, 0], sizes = [1, 16], strides = [1, 1]} : vector<239x16xf32> to vector<1x16xf32>
    %113 = vector.extract_strided_slice %58 {offsets = [204, 0], sizes = [1, 16], strides = [1, 1]} : vector<239x16xf32> to vector<1x16xf32>
    %114 = vector.extract_strided_slice %58 {offsets = [206, 0], sizes = [1, 16], strides = [1, 1]} : vector<239x16xf32> to vector<1x16xf32>
    %115 = vector.extract_strided_slice %58 {offsets = [224, 0], sizes = [1, 16], strides = [1, 1]} : vector<239x16xf32> to vector<1x16xf32>
    %116 = vector.extract_strided_slice %58 {offsets = [226, 0], sizes = [1, 16], strides = [1, 1]} : vector<239x16xf32> to vector<1x16xf32>
    %117 = vector.extract_strided_slice %58 {offsets = [228, 0], sizes = [1, 16], strides = [1, 1]} : vector<239x16xf32> to vector<1x16xf32>
    %118 = vector.extract_strided_slice %58 {offsets = [230, 0], sizes = [1, 16], strides = [1, 1]} : vector<239x16xf32> to vector<1x16xf32>
    %119 = vector.extract_strided_slice %58 {offsets = [232, 0], sizes = [1, 16], strides = [1, 1]} : vector<239x16xf32> to vector<1x16xf32>
    %120 = vector.extract_strided_slice %58 {offsets = [234, 0], sizes = [1, 16], strides = [1, 1]} : vector<239x16xf32> to vector<1x16xf32>
    %121 = vector.extract_strided_slice %58 {offsets = [236, 0], sizes = [1, 16], strides = [1, 1]} : vector<239x16xf32> to vector<1x16xf32>
    %122 = vector.extract_strided_slice %58 {offsets = [238, 0], sizes = [1, 16], strides = [1, 1]} : vector<239x16xf32> to vector<1x16xf32>
    %123 = tpu.concatenate %59, %60, %61, %62, %63, %64, %65, %66, %67, %68, %69, %70, %71, %72, %73, %74 in 1 : vector<1x16xf32>, vector<1x16xf32>, vector<1x16xf32>, vector<1x16xf32>, vector<1x16xf32>, vector<1x16xf32>, vector<1x16xf32>, vector<1x16xf32>, vector<1x16xf32>, vector<1x16xf32>, vector<1x16xf32>, vector<1x16xf32>, vector<1x16xf32>, vector<1x16xf32>, vector<1x16xf32>, vector<1x16xf32> -> vector<1x256xf32>
    %124 = tpu.concatenate %75, %76, %77, %78, %79, %80, %81, %82, %83, %84, %85, %86, %87, %88, %89, %90 in 1 : vector<1x16xf32>, vector<1x16xf32>, vector<1x16xf32>, vector<1x16xf32>, vector<1x16xf32>, vector<1x16xf32>, vector<1x16xf32>, vector<1x16xf32>, vector<1x16xf32>, vector<1x16xf32>, vector<1x16xf32>, vector<1x16xf32>, vector<1x16xf32>, vector<1x16xf32>, vector<1x16xf32>, vector<1x16xf32> -> vector<1x256xf32>
    %125 = tpu.concatenate %91, %92, %93, %94, %95, %96, %97, %98, %99, %100, %101, %102, %103, %104, %105, %106 in 1 : vector<1x16xf32>, vector<1x16xf32>, vector<1x16xf32>, vector<1x16xf32>, vector<1x16xf32>, vector<1x16xf32>, vector<1x16xf32>, vector<1x16xf32>, vector<1x16xf32>, vector<1x16xf32>, vector<1x16xf32>, vector<1x16xf32>, vector<1x16xf32>, vector<1x16xf32>, vector<1x16xf32>, vector<1x16xf32> -> vector<1x256xf32>
    %126 = tpu.concatenate %107, %108, %109, %110, %111, %112, %113, %114, %115, %116, %117, %118, %119, %120, %121, %122 in 1 : vector<1x16xf32>, vector<1x16xf32>, vector<1x16xf32>, vector<1x16xf32>, vector<1x16xf32>, vector<1x16xf32>, vector<1x16xf32>, vector<1x16xf32>, vector<1x16xf32>, vector<1x16xf32>, vector<1x16xf32>, vector<1x16xf32>, vector<1x16xf32>, vector<1x16xf32>, vector<1x16xf32>, vector<1x16xf32> -> vector<1x256xf32>
    %127 = tpu.concatenate %123, %124, %125, %126 in 1 : vector<1x256xf32>, vector<1x256xf32>, vector<1x256xf32>, vector<1x256xf32> -> vector<1x1024xf32>
    %128 = arith.truncf %127 : vector<1x1024xf32> to vector<1x1024xbf16>
    %c0_28 = arith.constant 0 : index
    %c0_29 = arith.constant 0 : index
    %129 = vector.load %arg6[%c0_28, %c0_29] : memref<1024x256xbf16, #tpu.memory_space<vmem>>, vector<1024x256xbf16>
    %cst_30 = arith.constant dense<0.000000e+00> : vector<1x256xf32>
    %130 = tpu.matmul %128, %129, %cst_30 {dimension_numbers = #tpu.dot_dimension_numbers<[1], [0], [0], [1], [0, 0, 1, 1], [], []>} : vector<1x1024xbf16>, vector<1024x256xbf16>, vector<1x256xf32> -> vector<1x256xf32>
    %c0_31 = arith.constant 0 : index
    %c0_32 = arith.constant 0 : index
    %131 = vector.load %arg7[%c0_31, %c0_32] : memref<1x256xf32, #tpu.memory_space<vmem>>, vector<1x256xf32>
    %132 = arith.addf %130, %131 : vector<1x256xf32>
    %133 = arith.truncf %132 : vector<1x256xf32> to vector<1x256xbf16>
    %c0_33 = arith.constant 0 : index
    %c0_34 = arith.constant 0 : index
    %134 = vector.load %arg8[%c0_33, %c0_34] : memref<256x84xbf16, #tpu.memory_space<vmem>>, vector<256x84xbf16>
    %cst_35 = arith.constant dense<0.000000e+00> : vector<1x84xf32>
    %135 = tpu.matmul %133, %134, %cst_35 {dimension_numbers = #tpu.dot_dimension_numbers<[1], [0], [0], [1], [0, 0, 1, 1], [], []>} : vector<1x256xbf16>, vector<256x84xbf16>, vector<1x84xf32> -> vector<1x84xf32>
    %c0_36 = arith.constant 0 : index
    %c0_37 = arith.constant 0 : index
    %136 = vector.load %arg9[%c0_36, %c0_37] : memref<1x84xf32, #tpu.memory_space<vmem>>, vector<1x84xf32>
    %137 = arith.addf %135, %136 : vector<1x84xf32>
    %138 = arith.truncf %137 : vector<1x84xf32> to vector<1x84xbf16>
    %c0_38 = arith.constant 0 : index
    %c0_39 = arith.constant 0 : index
    %139 = vector.load %arg10[%c0_38, %c0_39] : memref<84x10xbf16, #tpu.memory_space<vmem>>, vector<84x10xbf16>
    %cst_40 = arith.constant dense<0.000000e+00> : vector<1x10xf32>
    %140 = tpu.matmul %138, %139, %cst_40 {dimension_numbers = #tpu.dot_dimension_numbers<[1], [0], [0], [1], [0, 0, 1, 1], [], []>} : vector<1x84xbf16>, vector<84x10xbf16>, vector<1x10xf32> -> vector<1x10xf32>
    %c0_41 = arith.constant 0 : index
    %c0_42 = arith.constant 0 : index
    %141 = vector.load %arg11[%c0_41, %c0_42] : memref<1x10xf32, #tpu.memory_space<vmem>>, vector<1x10xf32>
    %142 = arith.addf %140, %141 : vector<1x10xf32>
    %c0_43 = arith.constant 0 : index
    %c0_44 = arith.constant 0 : index
    %c0_45 = arith.constant 0 : index
    %143 = vector.load %arg12[%c0_43, %c0_44, %c0_45] : memref<1x1x10xf32, #tpu.memory_space<vmem>>, vector<1x1x10xf32>
    %144 = vector.shape_cast %143 : vector<1x1x10xf32> to vector<1x10xf32>
    %145 = vector.shape_cast %142 : vector<1x10xf32> to vector<1x1x10xf32>
    tpu.vector_store %arg12[%c0_43, %c0_44, %c0_45], %145 {strides = array<i32>} : memref<1x1x10xf32, #tpu.memory_space<vmem>>, vector<1x1x10xf32>,
    return
  }
  func.func @transform_0(%arg0: i32) -> (i32, i32, i32, i32) {
    %c0_i32 = arith.constant 0 : i32
    %c0_i32_0 = arith.constant 0 : i32
    %c0_i32_1 = arith.constant 0 : i32
    %c0_i32_2 = arith.constant 0 : i32
    return %arg0, %c0_i32, %c0_i32_0, %c0_i32_1 : i32, i32, i32, i32
  }
  func.func @transform_1(%arg0: i32) -> (i32, i32) {
    %c0_i32 = arith.constant 0 : i32
    %c0_i32_0 = arith.constant 0 : i32
    %c0_i32_1 = arith.constant 0 : i32
    return %c0_i32, %c0_i32_0 : i32, i32
  }
  func.func @transform_2(%arg0: i32) -> (i32, i32) {
    %c0_i32 = arith.constant 0 : i32
    %c0_i32_0 = arith.constant 0 : i32
    %c0_i32_1 = arith.constant 0 : i32
    return %c0_i32, %c0_i32_0 : i32, i32
  }
  func.func @transform_3(%arg0: i32) -> (i32, i32) {
    %c0_i32 = arith.constant 0 : i32
    %c0_i32_0 = arith.constant 0 : i32
    %c0_i32_1 = arith.constant 0 : i32
    return %c0_i32, %c0_i32_0 : i32, i32
  }
  func.func @transform_4(%arg0: i32) -> (i32, i32) {
    %c0_i32 = arith.constant 0 : i32
    %c0_i32_0 = arith.constant 0 : i32
    %c0_i32_1 = arith.constant 0 : i32
    return %c0_i32, %c0_i32_0 : i32, i32
  }
  func.func @transform_5(%arg0: i32) -> (i32, i32) {
    %c0_i32 = arith.constant 0 : i32
    %c0_i32_0 = arith.constant 0 : i32
    %c0_i32_1 = arith.constant 0 : i32
    return %c0_i32, %c0_i32_0 : i32, i32
  }
  func.func @transform_6(%arg0: i32) -> (i32, i32) {
    %c0_i32 = arith.constant 0 : i32
    %c0_i32_0 = arith.constant 0 : i32
    %c0_i32_1 = arith.constant 0 : i32
    return %c0_i32, %c0_i32_0 : i32, i32
  }
  func.func @transform_7(%arg0: i32) -> (i32, i32) {
    %c0_i32 = arith.constant 0 : i32
    %c0_i32_0 = arith.constant 0 : i32
    %c0_i32_1 = arith.constant 0 : i32
    return %c0_i32, %c0_i32_0 : i32, i32
  }
  func.func @transform_8(%arg0: i32) -> (i32, i32) {
    %c0_i32 = arith.constant 0 : i32
    %c0_i32_0 = arith.constant 0 : i32
    %c0_i32_1 = arith.constant 0 : i32
    return %c0_i32, %c0_i32_0 : i32, i32
  }
  func.func @transform_9(%arg0: i32) -> (i32, i32) {
    %c0_i32 = arith.constant 0 : i32
    %c0_i32_0 = arith.constant 0 : i32
    %c0_i32_1 = arith.constant 0 : i32
    return %c0_i32, %c0_i32_0 : i32, i32
  }
  func.func @transform_10(%arg0: i32) -> (i32, i32) {
    %c0_i32 = arith.constant 0 : i32
    %c0_i32_0 = arith.constant 0 : i32
    %c0_i32_1 = arith.constant 0 : i32
    return %c0_i32, %c0_i32_0 : i32, i32
  }
  func.func @transform_11(%arg0: i32) -> (i32, i32, i32) {
    %c0_i32 = arith.constant 0 : i32
    %c0_i32_0 = arith.constant 0 : i32
    %c0_i32_1 = arith.constant 0 : i32
    return %arg0, %c0_i32, %c0_i32_0 : i32, i32, i32
  }
}

</mosaic_0001>

<bundles_post_ra>
// kernel: lenet_vgg_forward.1
= control target key start
LH: loop header
LB: loop body
LE: loop exit
PB: predicated region body
PF: predicated region fallthrough
CT: control target
= control target key end

     0   :  { %s9133_s0 = inlined_call_operand.vmem [shape: bf16[2,4,256,32], index: 0, kind: input, shape index: {}]   ;;  %s9134_s1 = inlined_call_operand.vmem [shape: bf16[32,64], index: 1, kind: input, shape index: {}]   ;;  %s9135_s2 = inlined_call_operand.vmem [shape: f32[1,64], index: 2, kind: input, shape index: {}]   ;;  %s9136_s3 = inlined_call_operand.vmem [shape: bf16[576,16], index: 3, kind: input, shape index: {}]   ;;  %s9137_s4 = inlined_call_operand.vmem [shape: f32[1,16], index: 4, kind: input, shape index: {}]   ;;  %s9138_s5 = inlined_call_operand.vmem [shape: bf16[1024,256], index: 5, kind: input, shape index: {}]   ;;  %s9139_s6 = inlined_call_operand.vmem [shape: f32[1,256], index: 6, kind: input, shape index: {}]   ;;  %s9140_s7 = inlined_call_operand.vmem [shape: bf16[256,84], index: 7, kind: input, shape index: {}]   ;;  %s9141_s8 = inlined_call_operand.vmem [shape: f32[1,84], index: 8, kind: input, shape index: {}]   ;;  %s9142_s9 = inlined_call_operand.vmem [shape: bf16[84,10], index: 9, kind: input, shape index: {}]   ;;  %s9143_s10 = inlined_call_operand.vmem [shape: f32[1,10], index: 10, kind: input, shape index: {}]   ;;  %s9144_s11 = inlined_call_operand.hbm [shape: f32[2,1,10], index: 11, kind: output, shape index: {}]  }
   0x1   :  { %9166 = sst [smem:[#allocation26_spill]] %s9133_s0 }
   0x2   :  { %9167 = sst [smem:[#allocation27_spill]] %s9134_s1 }
   0x3   :  { %9168 = sst [smem:[#allocation28_spill]] %s9135_s2 }
   0x4   :  { %9169 = sst [smem:[#allocation29_spill]] %s9136_s3 }
   0x5   :  { %16 = vsyncpa [#allocation3], 0 }
   0x6   :  { %18 = vsyncpa [#allocation3 + $0x1], 0  ;;  %s6749_s17 = smov 0   ;;  %s6751_s18 = smov 0  }
   0x7   :  { %s6753_s19 = smov 0   ;;  %s6755_s20 = smov 0  }
   0x8 LB: > { %9170 = sst [smem:[#allocation5_spill]] %s6675_s19  ;;  %s6770_s21 = sadd.s32 4294967295, %s6679_s20   ;;  %s6679_s20 = sphi %s6755_s20, %s9235_s20   ;;  %s6675_s19 = sphi %s6753_s19, %s9232_s19   ;;  %s6671_s18 = sphi %s6751_s18, %s9234_s18   ;;  %s6667_s17 = sphi %s6749_s17, %s9233_s17  }
   0x9   : > { %s4991_s22 = sadd.s32 4294967294, %s6679_s20   ;;  %s6774_s23 = sadd.s32 1, %s6679_s20  }
   0xa   : > { %s267_s24 = sadd.s32 1, %s6675_s19  ;;  %s264_s25 = ssub.s32 %s6679_s20, %s6774_s23 }
   0xb   : > { %p277_p0 = scmp.ne.s32.totalorder %s6675_s19, %s6671_s18  ;;  %p265_p1 = scmp.eq.s32.totalorder %s264_s25, 0 }
   0xc   : > { %p278_p2 = scmp.eq.s32.totalorder %s6770_s21, 1  ;;  %p283_p3 = scmp.ne.s32.totalorder %s6671_s18, %s6667_s17 }
   0xd   : > { %p284_p4 = scmp.eq.s32.totalorder %s4991_s22, 1  ;;  %p4994_p7 = scmp.ge.s32.totalorder %s6679_s20, 1 }
   0xe   : > { %s6785_s26 = scalar_select %p265_p1, %s6675_s19, %s267_s24  }
   0xf   : > { %p6787_p5 = por %p278_p2, %p277_p0  ;;  %p6791_p6 = por %p284_p4, %p283_p3 }
  0x10   : > { %9171 = sst [smem:[#allocation6_spill]] %s6785_s26  ;;  %p340_p8 = scmp.lt.s32.totalorder %s6679_s20, 3 }
  0x12   : > { %p341_p9 = pnand %p4994_p7, %p340_p8 }
  0x14   : > { %344 = sbr.rel (%p341_p9) target bundleno = 1579 (0x62b), region = 64 }
  0x19   : > { %s9174_s1 = sld [smem:[#allocation27_spill]]  ;;  %p379_p10 = scmp.lt.s32.totalorder %s6770_s21, 1  ;;  %vm513_vm0 = vcmask 261120   ;;  %v6681_v45 = vmov 0   ;;  %vm1830_vm1 = vcmask 1040384   ;;  %vm2256_vm5 = vcmask 523264  }
  0x1a   : > { %s9175_s0 = sld [smem:[#allocation26_spill]]  ;;  %v1680_v46 = vrot.slane %v6681_v45, 7  ;;  %vm1831_vm2 = vsmask.f32 256  ;;  %vm1867_vm4 = vsmask.f32 7424 }
  0x1b   : > { %s380_s14 = scalar_select %p379_p10, %s6770_s21, 1  ;;  %vm6895_vm3 = vmand %vm1830_vm1, %vm1831_vm2  ;;  %vm2092_vm6 = vcmask 1046528   ;;  %vm3472_vm7 = vcmask 130048   ;;  %vm3475_vm8 = vcmask 392192   ;;  %vm3478_vm9 = vcmask 654336  }
  0x1c   : > { %s9176_s3 = sld [smem:[#allocation29_spill]]  ;;  %v6901_v50 = vsel %vm6895_vm3, 0, %v1680_v46  ;;  %v6906_v52 = vsel %vm6895_vm3, %v1680_v46, 0  ;;  %s9163_s22 = smov 48   ;;  %vm3480_vm10 = vcmask 785408   ;;  %vm3482_vm11 = vcmask 916480  }
  0x1d   : > { %s6180_s15 = sshll.u32 %s380_s14, 9  ;;  %v1871_v51 = vshll.u32 %v6901_v50, 16  ;;  %v1869_v53 = vshrl.u32 %v6901_v50, 16  ;;  %v1876_v55 = vshll.u32 %v6906_v52, 16  ;;  %s9179_s2 = sld [smem:[#allocation28_spill]]  ;;  %vm4904_vm12 = vcmask 1041408  }
  0x1e   : > { %s9161_s25 = smov 32   ;;  %s9159_s29 = smov 16   ;;  %vm4900_vm13 = vcmask 687104   ;;  %vm4921_vm14 = vcmask 73728  }
  0x1f   : > { %v6182_v0 = vld [vmem:[%s9174_s1 + $0x8] sm:$0xff]  ;;  %v6181_v1 = vld [vmem:[%s9174_s1] sm:$0xff]  ;;  %v1873_v54 = vrot.slane %v1871_v51, 1  ;;  %v1878_v61 = vrot.slane %v1876_v55, 1  ;;  %s9157_s30 = smov 96   ;;  %s9155_s12 = smov 80  }
  0x20   : > { %6432 = vmatpush.bf16.msra.mxu2 %v6182_v0  ;;  %6433 = vmatpush.bf16.msra.mxu3 %v6182_v0  ;;  %s6808_s24 = scalar_lea.vmem %s9175_s0, %s6180_s15  ;;  %s9151_s15 = smov 64  }
  0x21   : > { %818 = vmatpush.bf16.msra.mxu1 %v6182_v0  ;;  %568 = vmatpush.bf16.msra.mxu0 %v6182_v0  ;;  %v6196_v2 = vld [vmem:[%s6808_s24 + $0x68] sm:$0xff]  ;;  %v6197_v3 = vld [vmem:[%s6808_s24 + $0x70] sm:$0xff]  ;;  %v6199_v4 = vld [vmem:[%s6808_s24 + $0x80] sm:$0xff]  ;;  %v1874_v60 = vor.u32 %v1873_v54, %v1869_v53  ;;  %s9153_s13 = smov 112   ;;  %s9213_s14 = smov 96  }
  0x22   : > { %v6183_v5 = vld [vmem:[%s6808_s24] sm:$0xff]  ;;  %v6198_v6 = vld [vmem:[%s6808_s24 + $0x78] sm:$0xff]  ;;  %v6200_v8 = vld [vmem:[%s6808_s24 + $0x88] sm:$0xff]  ;;  %s9215_s16 = smov 64  }
  0x23   : > { %v6215_v7 = vld [vmem:[%s6808_s24 + $0x100] sm:$0xff]  ;;  %v6184_v9 = vld [vmem:[%s6808_s24 + $0x8] sm:$0xff]  ;;  %v6201_v12 = vld [vmem:[%s6808_s24 + $0x90] sm:$0xff] }
  0x24   : > { %6434 = vmatpush.bf16.msra.mxu2 %v6181_v1  ;;  %6435 = vmatpush.bf16.msra.mxu3 %v6181_v1  ;;  %v6216_v10 = vld [vmem:[%s6808_s24 + $0x108] sm:$0xff]  ;;  %v6231_v11 = vld [vmem:[%s6808_s24 + $0x180] sm:$0xff]  ;;  %v6185_v13 = vld [vmem:[%s6808_s24 + $0x10] sm:$0xff] }
  0x25   : > { %819 = vmatpush.bf16.msra.mxu1 %v6181_v1  ;;  %569 = vmatpush.bf16.msra.mxu0 %v6181_v1  ;;  %v6217_v14 = vld [vmem:[%s6808_s24 + $0x110] sm:$0xff]  ;;  %v6232_v15 = vld [vmem:[%s6808_s24 + $0x188] sm:$0xff]  ;;  %v6202_v16 = vld [vmem:[%s6808_s24 + $0x98] sm:$0xff] }
  0x26   : > { %v6186_v17 = vld [vmem:[%s6808_s24 + $0x18] sm:$0xff]  ;;  %v6233_v19 = vld [vmem:[%s6808_s24 + $0x190] sm:$0xff]  ;;  %v6203_v20 = vld [vmem:[%s6808_s24 + $0xa0] sm:$0xff] }
  0x27   : > { %5082 = vmatmul.msk.bf16.vlgmr.msra.gmra.mxu2 %vm513_vm0, %v6196_v2  ;;  %5083 = vmatmul.msk.bf16.vlgmr.msra.gmra.mxu3 %vm513_vm0, %v6197_v3  ;;  %v6218_v18 = vld [vmem:[%s6808_s24 + $0x118] sm:$0xff]  ;;  %v6187_v21 = vld [vmem:[%s6808_s24 + $0x20] sm:$0xff]  ;;  %v6204_v25 = vld [vmem:[%s6808_s24 + $0xa8] sm:$0xff] }
  0x28   : > { %1100 = vmatpush.bf16.msrb.mxu2 %v6182_v0  ;;  %1382 = vmatpush.bf16.msrb.mxu3 %v6182_v0  ;;  %v6254_v22 = vld [vmem:[%s9176_s3 + $0x38] sm:$0xff]  ;;  %v6219_v23 = vld [vmem:[%s6808_s24 + $0x120] sm:$0xff]  ;;  %v6188_v26 = vld [vmem:[%s6808_s24 + $0x28] sm:$0xff] }
  0x29   : > { %5181 = vmatmul.msk.bf16.vlgmr.msra.gmra.mxu1 %vm513_vm0, %v6199_v4  ;;  %5069 = vmatmul.msk.bf16.vlgmr.msra.gmra.mxu0 %vm513_vm0, %v6183_v5  ;;  %v6234_v24 = vld [vmem:[%s6808_s24 + $0x198] sm:$0xff]  ;;  %v6220_v27 = vld [vmem:[%s6808_s24 + $0x128] sm:$0xff]  ;;  %v6235_v28 = vld [vmem:[%s6808_s24 + $0x1a0] sm:$0xff] }
  0x2a   : > { %2761 = vmatpush.bf16.msrb.mxu0 %v6254_v22  ;;  %v6205_v29 = vld [vmem:[%s6808_s24 + $0xb0] sm:$0xff]  ;;  %v6236_v33 = vld [vmem:[%s6808_s24 + $0x1a8] sm:$0xff]  ;;  %v6206_v34 = vld [vmem:[%s6808_s24 + $0xb8] sm:$0xff] }
  0x2b   : > { %v6189_v30 = vld [vmem:[%s6808_s24 + $0x30] sm:$0xff]  ;;  %v6190_v35 = vld [vmem:[%s6808_s24 + $0x38] sm:$0xff]  ;;  %v6252_v36 = vld [vmem:[%s9176_s3 + $0x28] sm:$0xff] }
  0x2c   : > { %1101 = vmatpush.bf16.msrb.mxu2 %v6181_v1  ;;  %1383 = vmatpush.bf16.msrb.mxu3 %v6181_v1  ;;  %v6253_v31 = vld [vmem:[%s9176_s3 + $0x30] sm:$0xff]  ;;  %v6222_v37 = vld [vmem:[%s6808_s24 + $0x138] sm:$0xff]  ;;  %v6207_v39 = vld [vmem:[%s6808_s24 + $0xc0] sm:$0xff]  ;;  %v1879_v1 = vsel %vm1867_vm4, %v1874_v60, %v1878_v61 }
  0x2d   : > { %v6221_v32 = vld [vmem:[%s6808_s24 + $0x130] sm:$0xff]  ;;  %v6191_v41 = vld [vmem:[%s6808_s24 + $0x40] sm:$0xff]  ;;  %v6238_v59 = vld [vmem:[%s6808_s24 + $0x1b8] sm:$0xff]  ;;  %2158 = vrot.lane.b32.xlu0 %v1879_v1, %s9151_s15 }
  0x2e   : > { %2762 = vmatpush.bf16.msrb.mxu0 %v6253_v31  ;;  %v6237_v38 = vld [vmem:[%s6808_s24 + $0x1b0] sm:$0xff]  ;;  %v6223_v58 = vld [vmem:[%s6808_s24 + $0x140] sm:$0xff]  ;;  %v6208_v62 = vld [vmem:[%s6808_s24 + $0xc8] sm:$0xff] }
  0x2f   : > { %v6192_v0 = vld [vmem:[%s6808_s24 + $0x48] sm:$0xff]  ;;  %v6250_v61 = vld [vmem:[%s9176_s3 + $0x18] sm:$0xff] }
  0x32   : > { %2763 = vmatpush.bf16.msrb.mxu0 %v6252_v36 }
  0x37   : > { %5084 = vmatmul.msk.bf16.gmra.mxu3 %vm513_vm0, %v6198_v6  ;;  %5293 = vmatmul.msk.bf16.vlgmr.msrb.gmra.mxu2 %vm513_vm0, %v6215_v7 }
  0x39   : > { %5182 = vmatmul.msk.bf16.gmra.mxu1 %vm513_vm0, %v6200_v8  ;;  %5070 = vmatmul.msk.bf16.gmra.mxu0 %vm513_vm0, %v6184_v9 }
  0x47   : > { %5294 = vmatmul.msk.bf16.gmra.mxu2 %vm513_vm0, %v6216_v10  ;;  %5405 = vmatmul.msk.bf16.vlgmr.msrb.gmra.mxu3 %vm513_vm0, %v6231_v11  ;;  %v6224_v10 = vld [vmem:[%s6808_s24 + $0x148] sm:$0xff]  ;;  %v6239_v11 = vld [vmem:[%s6808_s24 + $0x1c0] sm:$0xff] }
  0x49   : > { %5183 = vmatmul.msk.bf16.gmra.mxu1 %vm513_vm0, %v6201_v12  ;;  %5071 = vmatmul.msk.bf16.gmra.mxu0 %vm513_vm0, %v6185_v13  ;;  %v6251_v12 = vld [vmem:[%s9176_s3 + $0x20] sm:$0xff]  ;;  %v6209_v13 = vld [vmem:[%s6808_s24 + $0xd0] sm:$0xff] }
  0x4a   : > { %2764 = vmatpush.bf16.msrb.mxu0 %v6251_v12  ;;  %v6211_v12 = vld [vmem:[%s6808_s24 + $0xe0] sm:$0xff] }
  0x4e   : > { %2765 = vmatpush.bf16.msrb.mxu0 %v6250_v61  ;;  %v6242_v61 = vld [vmem:[%s6808_s24 + $0x1d8] sm:$0xff] }
  0x57   : > { %5295 = vmatmul.msk.bf16.gmra.mxu2 %vm513_vm0, %v6217_v14  ;;  %5406 = vmatmul.msk.bf16.gmra.mxu3 %vm513_vm0, %v6232_v15  ;;  %v6193_v15 = vld [vmem:[%s6808_s24 + $0x50] sm:$0xff] }
  0x59   : > { %5184 = vmatmul.msk.bf16.gmra.mxu1 %vm513_vm0, %v6202_v16  ;;  %5072 = vmatmul.msk.bf16.gmra.mxu0 %vm513_vm0, %v6186_v17 }
  0x67   : > { %5296 = vmatmul.msk.bf16.gmra.mxu2 %vm513_vm0, %v6218_v18  ;;  %5407 = vmatmul.msk.bf16.gmra.mxu3 %vm513_vm0, %v6233_v19 }
  0x69   : > { %5185 = vmatmul.msk.bf16.gmra.mxu1 %vm513_vm0, %v6203_v20  ;;  %5073 = vmatmul.msk.bf16.gmra.mxu0 %vm513_vm0, %v6187_v21  ;;  %v6946_v21 = vld [vmem:[%s9179_s2] ss:$0 sm:$0xff] }
  0x77   : > { %5297 = vmatmul.msk.bf16.gmra.mxu2 %vm513_vm0, %v6219_v23  ;;  %5408 = vmatmul.msk.bf16.gmra.mxu3 %vm513_vm0, %v6234_v24 }
  0x79   : > { %5186 = vmatmul.msk.bf16.gmra.mxu1 %vm513_vm0, %v6204_v25  ;;  %5074 = vmatmul.msk.bf16.gmra.mxu0 %vm513_vm0, %v6188_v26 }
  0x87   : > { %5298 = vmatmul.msk.bf16.gmra.mxu2 %vm513_vm0, %v6220_v27  ;;  %5409 = vmatmul.msk.bf16.gmra.mxu3 %vm513_vm0, %v6235_v28 }
  0x89   : > { %5187 = vmatmul.msk.bf16.gmra.mxu1 %vm513_vm0, %v6205_v29  ;;  %5075 = vmatmul.msk.bf16.gmra.mxu0 %vm513_vm0, %v6189_v30 }
  0x97   : > { %5299 = vmatmul.msk.bf16.gmra.mxu2 %vm513_vm0, %v6221_v32  ;;  %5410 = vmatmul.msk.bf16.gmra.mxu3 %vm513_vm0, %v6236_v33  ;;  %v6225_v32 = vld [vmem:[%s6808_s24 + $0x150] sm:$0xff]  ;;  %v6240_v33 = vld [vmem:[%s6808_s24 + $0x1c8] sm:$0xff] }
  0x99   : > { %5188 = vmatmul.msk.bf16.gmra.mxu1 %vm513_vm0, %v6206_v34  ;;  %5076 = vmatmul.msk.bf16.gmra.mxu0 %vm513_vm0, %v6190_v35  ;;  %v6210_v34 = vld [vmem:[%s6808_s24 + $0xd8] sm:$0xff] }
  0xa6   : > { %v821_v40 = vpop.f32.mrf.mxu1  ;;  %v571_v42 = vpop.f32.mrf.mxu0 }
  0xa7   : > { %5300 = vmatmul.msk.bf16.gmra.mxu2 %vm513_vm0, %v6222_v37  ;;  %5411 = vmatmul.msk.bf16.gmra.mxu3 %vm513_vm0, %v6237_v38  ;;  %v901_v9 = vmax.f32 %v571_v42, %v821_v40  ;;  %v6194_v37 = vld [vmem:[%s6808_s24 + $0x58] sm:$0xff] }
  0xa9   : > { %5189 = vmatmul.msk.bf16.gmra.mxu1 %vm513_vm0, %v6207_v39  ;;  %5077 = vmatmul.msk.bf16.gmra.mxu0 %vm513_vm0, %v6191_v41 }
  0xaa   : > { %v6891_v43 = vpop.f32.mrf.mxu2  ;;  %v6893_v44 = vpop.f32.mrf.mxu3 }
  0xae   : > { %v823_v47 = vpop.f32.mrf.mxu1  ;;  %v573_v49 = vpop.f32.mrf.mxu0 }
  0xaf   : > { %v902_v22 = vmax.f32 %v573_v49, %v823_v47 }
  0xb2   : > { %v6910_v56 = vpop.f32.mrf.mxu2  ;;  %v6912_v57 = vpop.f32.mrf.mxu3 }
  0xb6   : > { %v826_v63 = vpop.f32.mrf.mxu1  ;;  %v576_v2 = vpop.f32.mrf.mxu0 }
  0xb7   : > { %5301 = vmatmul.msk.bf16.gmra.mxu2 %vm513_vm0, %v6223_v58  ;;  %5412 = vmatmul.msk.bf16.gmra.mxu3 %vm513_vm0, %v6238_v59  ;;  %v903_v30 = vmax.f32 %v576_v2, %v826_v63 }
  0xb9   : > { %5190 = vmatmul.msk.bf16.gmra.mxu1 %vm513_vm0, %v6208_v62  ;;  %5078 = vmatmul.msk.bf16.gmra.mxu0 %vm513_vm0, %v6192_v0 }
  0xba   : > { %v6924_v3 = vpop.f32.mrf.mxu3  ;;  %v1103_v4 = vpop.f32.mrf.mxu2 }
  0xbb   : > { %v1183_v17 = vmax.f32 %v901_v9, %v1103_v4  ;;  %v6241_v9 = vld [vmem:[%s6808_s24 + $0x1d0] sm:$0xff] }
  0xbe   : > { %v828_v5 = vpop.f32.mrf.mxu1  ;;  %v578_v6 = vpop.f32.mrf.mxu0 }
  0xbf   : > { %v904_v54 = vmax.f32 %v578_v6, %v828_v5 }
  0xc2   : > { %v6926_v7 = vpop.f32.mrf.mxu3  ;;  %v1105_v8 = vpop.f32.mrf.mxu2 }
  0xc3   : > { %v1184_v26 = vmax.f32 %v902_v22, %v1105_v8  ;;  %v6226_v8 = vld [vmem:[%s6808_s24 + $0x158] sm:$0xff] }
  0xc6   : > { %v6934_v14 = vpop.f32.mrf.mxu1  ;;  %v6937_v16 = vpop.f32.mrf.mxu0 }
  0xc7   : > { %5302 = vmatmul.msk.bf16.gmra.mxu2 %vm513_vm0, %v6224_v10  ;;  %5413 = vmatmul.msk.bf16.gmra.mxu3 %vm513_vm0, %v6239_v11  ;;  %v905_v1 = vmax.f32 %v6937_v16, %v6934_v14  ;;  %v6195_v14 = vld [vmem:[%s6808_s24 + $0x60] sm:$0xff] }
  0xc9   : > { %5191 = vmatmul.msk.bf16.gmra.mxu1 %vm513_vm0, %v6209_v13  ;;  %5079 = vmatmul.msk.bf16.gmra.mxu0 %vm513_vm0, %v6193_v15 }
  0xca   : > { %v1108_v18 = vpop.f32.mrf.mxu2  ;;  %v1385_v19 = vpop.f32.mrf.mxu3 }
  0xcb   : > { %v1465_v20 = vmax.f32 %v1183_v17, %v1385_v19  ;;  %v1185_v41 = vmax.f32 %v903_v30, %v1108_v18 }
  0xcd   : > { %v1501_v25 = vadd.f32 %v6946_v21, %v1465_v20 }
  0xce   : > { %v6948_v23 = vpop.f32.mrf.mxu1  ;;  %v6950_v24 = vpop.f32.mrf.mxu0 }
  0xcf   : > { %v1533_v29 = vmax.f32 %v1501_v25, 0.0 }
  0xd1   : > { %v1565_v39 = vpack.c.bf16 %v1533_v29, %v1533_v29 }
  0xd2   : > { %v1110_v27 = vpop.f32.mrf.mxu2  ;;  %v1387_v28 = vpop.f32.mrf.mxu3 }
  0xd3   : > { %v1466_v31 = vmax.f32 %v1184_v26, %v1387_v28  ;;  %v1629_v47 = vunpack.c.l.b16 %v1565_v39  ;;  %v1186_v63 = vmax.f32 %v904_v54, %v1110_v27 }
  0xd5   : > { %v1502_v35 = vadd.f32 %v6946_v21, %v1466_v31 }
  0xd6   : > { %v6957_v36 = vpop.f32.mrf.mxu1  ;;  %v6960_v38 = vpop.f32.mrf.mxu0 }
  0xd7   : > { %v1534_v40 = vmax.f32 %v1502_v35, 0.0  ;;  %5303 = vmatmul.msk.bf16.gmra.mxu2 %vm513_vm0, %v6225_v32  ;;  %5414 = vmatmul.msk.bf16.gmra.mxu3 %vm513_vm0, %v6240_v33 }
  0xd9   : > { %5192 = vmatmul.msk.bf16.gmra.mxu1 %vm513_vm0, %v6210_v34  ;;  %v1566_v42 = vpack.c.bf16 %v1534_v40, %v1534_v40  ;;  %5080 = vmatmul.msk.bf16.gmra.mxu0 %vm513_vm0, %v6194_v37  ;;  %v906_v40 = vmax.f32 %v6950_v24, %v6948_v23 }
  0xda   : > { %v1113_v45 = vpop.f32.mrf.mxu2  ;;  %v1390_v46 = vpop.f32.mrf.mxu3 }
  0xdb   : > { %v1630_v49 = vunpack.c.l.b16 %v1566_v42  ;;  %v1467_v51 = vmax.f32 %v1185_v41, %v1390_v46  ;;  %v1187_v25 = vmax.f32 %v905_v1, %v1113_v45  ;;  %v6212_v1 = vld [vmem:[%s6808_s24 + $0xe8] sm:$0xff] }
  0xdd   : > { %v1661_v53 = vpack.c.b16 %v1630_v49, %v1629_v47  ;;  %v1503_v60 = vadd.f32 %v6946_v21, %v1467_v51 }
  0xde   : > { %v6966_v55 = vpop.f32.mrf.mxu1  ;;  %v6968_v58 = vpop.f32.mrf.mxu0 }
  0xdf   : > { %v1685_v59 = vshrl.u32 %v1661_v53, 16  ;;  %v1688_v62 = vshll.u32 %v1661_v53, 16  ;;  %v1535_v5 = vmax.f32 %v1503_v60, 0.0  ;;  %v907_v53 = vmax.f32 %v6960_v38, %v6957_v36  ;;  %v6227_v60 = vld [vmem:[%s6808_s24 + $0x160] sm:$0xff] }
  0xe1   : > { %v1687_v0 = vrot.slane %v1685_v59, 7  ;;  %v1567_v20 = vpack.c.bf16 %v1535_v5, %v1535_v5 }
  0xe2   : > { %v1115_v2 = vpop.f32.mrf.mxu2  ;;  %v1392_v4 = vpop.f32.mrf.mxu3 }
  0xe3   : > { %v1468_v6 = vmax.f32 %v1186_v63, %v1392_v4  ;;  %v1690_v10 = vor.u32 %v1688_v62, %v1687_v0  ;;  %v6980_v11 = vsel %vm6895_vm3, %v1687_v0, 0  ;;  %v1631_v33 = vunpack.c.l.b16 %v1567_v20  ;;  %v6249_v0 = vld [vmem:[%s9176_s3 + $0x10] sm:$0xff] }
  0xe4   : > { %v1888_v18 = vshll.u32 %v6980_v11, 16  ;;  %v1188_v49 = vmax.f32 %v906_v40, %v1115_v2  ;;  %2766 = vmatpush.bf16.msrb.mxu0 %v6249_v0 }
  0xe5   : > { %v1504_v13 = vadd.f32 %v6946_v21, %v1468_v6  ;;  %v6988_v17 = vsel %vm6895_vm3, 0, %v1690_v10 }
  0xe6   : > { %v6984_v15 = vpop.f32.mrf.mxu1  ;;  %v1883_v16 = vshll.u32 %v6988_v17, 16  ;;  %v6993_v19 = vpop.f32.mrf.mxu0  ;;  %v1881_v26 = vshrl.u32 %v6988_v17, 16  ;;  %v1890_v32 = vrot.slane %v1888_v18, 1 }
  0xe7   : > { %v1536_v22 = vmax.f32 %v1504_v13, 0.0  ;;  %5304 = vmatmul.msk.bf16.gmra.mxu2 %vm513_vm0, %v6226_v8  ;;  %5415 = vmatmul.msk.bf16.gmra.mxu3 %vm513_vm0, %v6241_v9 }
  0xe8   : > { %v1885_v27 = vrot.slane %v1883_v16, 1 }
  0xe9   : > { %5193 = vmatmul.msk.bf16.gmra.mxu1 %vm513_vm0, %v6211_v12  ;;  %v1568_v28 = vpack.c.bf16 %v1536_v22, %v1536_v22  ;;  %5081 = vmatmul.msk.bf16.gmra.mxu0 %vm513_vm0, %v6195_v14 }
  0xea   : > { %v1118_v29 = vpop.f32.mrf.mxu2  ;;  %v1395_v30 = vpop.f32.mrf.mxu3  ;;  %v1886_v31 = vor.u32 %v1885_v27, %v1881_v26 }
  0xeb   : > { %v1632_v34 = vunpack.c.l.b16 %v1568_v28  ;;  %v1469_v35 = vmax.f32 %v1187_v25, %v1395_v30  ;;  %v1189_v10 = vmax.f32 %v907_v53, %v1118_v29  ;;  %v908_v29 = vmax.f32 %v6968_v58, %v6966_v55 }
  0xec   : > { %v7001_v37 = vsel %vm1867_vm4, %v1886_v31, %v1890_v32 }
  0xed   : > { %v1662_v39 = vpack.c.b16 %v1632_v34, %v1631_v33  ;;  %2160 = vrot.lane.b32.xlu0 %v7001_v37, %s9151_s15  ;;  %v1505_v45 = vadd.f32 %v6946_v21, %v1469_v35 }
  0xee   : > { %v7005_v41 = vpop.f32.mrf.mxu1  ;;  %v7009_v42 = vpop.f32.mrf.mxu0 }
  0xef   : > { %v1692_v46 = vshrl.u32 %v1662_v39, 16  ;;  %v1695_v47 = vshll.u32 %v1662_v39, 16  ;;  %v1537_v23 = vmax.f32 %v1505_v45, 0.0  ;;  %v909_v45 = vmax.f32 %v6993_v19, %v6984_v15 }
  0xf1   : > { %v1694_v51 = vrot.slane %v1692_v46, 7  ;;  %v1569_v8 = vpack.c.bf16 %v1537_v23, %v1537_v23  ;;  %v6213_v23 = vld [vmem:[%s6808_s24 + $0xf0] sm:$0xff] }
  0xf2   : > { %v1120_v54 = vpop.f32.mrf.mxu2  ;;  %v1397_v59 = vpop.f32.mrf.mxu3 }
  0xf3   : > { %v1470_v24 = vmax.f32 %v1188_v49, %v1397_v59  ;;  %v1697_v62 = vor.u32 %v1695_v47, %v1694_v51  ;;  %v7018_v63 = vsel %vm6895_vm3, %v1694_v51, 0  ;;  %v1633_v25 = vunpack.c.l.b16 %v1569_v8  ;;  %v6228_v49 = vld [vmem:[%s6808_s24 + $0x168] sm:$0xff]  ;;  %v6243_v51 = vld [vmem:[%s6808_s24 + $0x1e0] sm:$0xff] }
  0xf4   : > { %v1900_v5 = vshll.u32 %v7018_v63, 16  ;;  %v1190_v39 = vmax.f32 %v908_v29, %v1120_v54 }
  0xf5   : > { %v1506_v2 = vadd.f32 %v6946_v21, %v1470_v24  ;;  %v7029_v36 = vsel %vm6895_vm3, 0, %v1697_v62 }
  0xf6   : > { %v7025_v4 = vpop.f32.mrf.mxu1  ;;  %v1895_v38 = vshll.u32 %v7029_v36, 16  ;;  %v7033_v6 = vpop.f32.mrf.mxu0  ;;  %v1893_v12 = vshrl.u32 %v7029_v36, 16  ;;  %v1902_v22 = vrot.slane %v1900_v5, 1 }
  0xf7   : > { %v1538_v9 = vmax.f32 %v1506_v2, 0.0  ;;  %5305 = vmatmul.msk.bf16.gmra.mxu2 %vm513_vm0, %v6227_v60  ;;  %5416 = vmatmul.msk.bf16.gmra.mxu3 %vm513_vm0, %v6242_v61 }
  0xf8   : > { %v1897_v13 = vrot.slane %v1895_v38, 1 }
  0xf9   : > { %5194 = vmatmul.msk.bf16.gmra.mxu1 %vm513_vm0, %v6212_v1  ;;  %v1570_v14 = vpack.c.bf16 %v1538_v9, %v1538_v9 }
  0xfa   : > { %v1123_v16 = vpop.f32.mrf.mxu2  ;;  %v1400_v18 = vpop.f32.mrf.mxu3  ;;  %v1898_v20 = vor.u32 %v1897_v13, %v1893_v12 }
  0xfb   : > { %v1634_v26 = vunpack.c.l.b16 %v1570_v14  ;;  %v1471_v27 = vmax.f32 %v1189_v10, %v1400_v18  ;;  %v1191_v0 = vmax.f32 %v909_v45, %v1123_v16  ;;  %v910_v16 = vmax.f32 %v7009_v42, %v7005_v41 }
  0xfc   : > { %v7040_v28 = vsel %vm1867_vm4, %v1898_v20, %v1902_v22  ;;  %v911_v41 = vmax.f32 %v7033_v6, %v7025_v4 }
  0xfd   : > { %v1663_v30 = vpack.c.b16 %v1634_v26, %v1633_v25  ;;  %2162 = vrot.lane.b32.xlu1 %v7040_v28, %s9151_s15  ;;  %v1507_v34 = vadd.f32 %v6946_v21, %v1471_v27 }
  0xfe   : > { %v7044_v31 = vpop.f32.mrf.mxu1  ;;  %v7048_v32 = vpop.f32.mrf.mxu0 }
  0xff   : > { %v1699_v33 = vshrl.u32 %v1663_v30, 16  ;;  %v1702_v35 = vshll.u32 %v1663_v30, 16  ;;  %v1539_v55 = vmax.f32 %v1507_v34, 0.0  ;;  %v6248_v30 = vld [vmem:[%s9176_s3 + $0x8] sm:$0xff] }
 0x100   : > { %2767 = vmatpush.bf16.msrb.mxu0 %v6248_v30 }
 0x101   : > { %v1701_v40 = vrot.slane %v1699_v33, 7  ;;  %v1571_v61 = vpack.c.bf16 %v1539_v55, %v1539_v55  ;;  %v6244_v55 = vld [vmem:[%s6808_s24 + $0x1e8] sm:$0xff] }
 0x102   : > { %v1125_v46 = vpop.f32.mrf.mxu2  ;;  %v1402_v47 = vpop.f32.mrf.mxu3 }
 0x103   : > { %v1472_v58 = vmax.f32 %v1190_v39, %v1402_v47  ;;  %v1704_v53 = vor.u32 %v1702_v35, %v1701_v40  ;;  %v7057_v59 = vsel %vm6895_vm3, %v1701_v40, 0  ;;  %v1635_v13 = vunpack.c.l.b16 %v1571_v61  ;;  %v6229_v47 = vld [vmem:[%s6808_s24 + $0x170] sm:$0xff] }
 0x104   : > { %v1912_v19 = vshll.u32 %v7057_v59, 16  ;;  %v1192_v33 = vmax.f32 %v910_v16, %v1125_v46 }
 0x105   : > { %v1508_v24 = vadd.f32 %v6946_v21, %v1472_v58  ;;  %v7065_v54 = vsel %vm6895_vm3, 0, %v1704_v53 }
 0x106   : > { %v7061_v60 = vpop.f32.mrf.mxu1  ;;  %v1907_v15 = vshll.u32 %v7065_v54, 16  ;;  %v7071_v1 = vpop.f32.mrf.mxu0  ;;  %v1905_v2 = vshrl.u32 %v7065_v54, 16  ;;  %v1914_v12 = vrot.slane %v1912_v19, 1 }
 0x107   : > { %v1540_v62 = vmax.f32 %v1508_v24, 0.0  ;;  %5306 = vmatmul.msk.bf16.gmra.mxu2 %vm513_vm0, %v6228_v49  ;;  %5417 = vmatmul.msk.bf16.gmra.mxu3 %vm513_vm0, %v6243_v51  ;;  %v6214_v51 = vld [vmem:[%s6808_s24 + $0xf8] sm:$0xff] }
 0x108   : > { %v1909_v38 = vrot.slane %v1907_v15, 1 }
 0x109   : > { %5195 = vmatmul.msk.bf16.gmra.mxu1 %vm513_vm0, %v6213_v23  ;;  %v1572_v5 = vpack.c.bf16 %v1540_v62, %v1540_v62 }
 0x10a   : > { %v1128_v8 = vpop.f32.mrf.mxu2  ;;  %v1405_v9 = vpop.f32.mrf.mxu3  ;;  %v1910_v10 = vor.u32 %v1909_v38, %v1905_v2 }
 0x10b   : > { %v1636_v14 = vunpack.c.l.b16 %v1572_v5  ;;  %v1473_v18 = vmax.f32 %v1191_v0, %v1405_v9  ;;  %v1193_v19 = vmax.f32 %v911_v41, %v1128_v8 }
 0x10c   : > { %v7076_v20 = vsel %vm1867_vm4, %v1910_v10, %v1914_v12 }
 0x10d   : > { %v1664_v22 = vpack.c.b16 %v1636_v14, %v1635_v13  ;;  %2164 = vrot.lane.b32.xlu1 %v7076_v20, %s9151_s15  ;;  %v1509_v26 = vadd.f32 %v6946_v21, %v1473_v18 }
 0x10e   : > { %v7080_v25 = vpop.f32.mrf.mxu1  ;;  %v7088_v35 = vpop.f32.mrf.mxu0 }
 0x10f   : > { %v1706_v27 = vshrl.u32 %v1664_v22, 16  ;;  %v1709_v29 = vshll.u32 %v1664_v22, 16  ;;  %v1541_v40 = vmax.f32 %v1509_v26, 0.0  ;;  %v912_v22 = vmax.f32 %v7048_v32, %v7044_v31  ;;  %v6245_v31 = vld [vmem:[%s6808_s24 + $0x1f0] sm:$0xff] }
 0x111   : > { %v1708_v34 = vrot.slane %v1706_v27, 7  ;;  %v1573_v24 = vpack.c.bf16 %v1541_v40, %v1541_v40 }
 0x112   : > { %v1130_v42 = vpop.f32.mrf.mxu2  ;;  %v1407_v39 = vpop.f32.mrf.mxu3 }
 0x113   : > { %v1474_v45 = vmax.f32 %v1192_v33, %v1407_v39  ;;  %v1711_v58 = vor.u32 %v1709_v29, %v1708_v34  ;;  %v7096_v49 = vsel %vm6895_vm3, %v1708_v34, 0  ;;  %v1637_v10 = vunpack.c.l.b16 %v1573_v24 }
 0x114   : > { %v1924_v6 = vshll.u32 %v7096_v49, 16  ;;  %v1194_v29 = vmax.f32 %v912_v22, %v1130_v42  ;;  %v913_v34 = vmax.f32 %v7071_v1, %v7061_v60  ;;  %v6247_v60 = vld [vmem:[%s9176_s3] sm:$0xff] }
 0x115   : > { %v1510_v46 = vadd.f32 %v6946_v21, %v1474_v45  ;;  %v7104_v23 = vsel %vm6895_vm3, 0, %v1711_v58  ;;  %2768 = vmatpush.bf16.msrb.mxu0 %v6247_v60  ;;  %v6246_v60 = vld [vmem:[%s6808_s24 + $0x1f8] sm:$0xff] }
 0x116   : > { %v7100_v53 = vpop.f32.mrf.mxu1  ;;  %v1919_v4 = vshll.u32 %v7104_v23, 16  ;;  %v1917_v61 = vshrl.u32 %v7104_v23, 16  ;;  %v1926_v9 = vrot.slane %v1924_v6, 1  ;;  %v7112_v14 = vpop.f32.mrf.mxu0 }
 0x117   : > { %v1542_v15 = vmax.f32 %v1510_v46, 0.0  ;;  %5307 = vmatmul.msk.bf16.gmra.mxu2 %vm513_vm0, %v6229_v47  ;;  %5418 = vmatmul.msk.bf16.gmra.mxu3 %vm513_vm0, %v6244_v55  ;;  %v6230_v47 = vld [vmem:[%s6808_s24 + $0x178] sm:$0xff]  ;;  %s9214_s24 = smov 80  }
 0x118   : > { %v1921_v62 = vrot.slane %v1919_v4, 1 }
 0x119   : > { %5196 = vmatmul.msk.bf16.gmra.mxu1 %vm513_vm0, %v6214_v51  ;;  %v1574_v0 = vpack.c.bf16 %v1542_v15, %v1542_v15 }
 0x11a   : > { %v1133_v2 = vpop.f32.mrf.mxu2  ;;  %v1410_v38 = vpop.f32.mrf.mxu3  ;;  %v1922_v5 = vor.u32 %v1921_v62, %v1917_v61 }
 0x11b   : > { %v1638_v12 = vunpack.c.l.b16 %v1574_v0  ;;  %v1475_v13 = vmax.f32 %v1193_v19, %v1410_v38  ;;  %v1195_v24 = vmax.f32 %v913_v34, %v1133_v2  ;;  %v2159_v61 = vpop.permute.xlu0 %2158 }
 0x11c   : > { %v7115_v18 = vsel %vm1867_vm4, %v1922_v5, %v1926_v9  ;;  %v7151_v38 = vsel %vm2256_vm5, %v6901_v50, %v2159_v61 }
 0x11d   : > { %v1665_v8 = vpack.c.b16 %v1638_v12, %v1637_v10  ;;  %2166 = vrot.lane.b32.xlu2 %v7115_v18, %s9151_s15  ;;  %v1511_v26 = vadd.f32 %v6946_v21, %v1475_v13  ;;  %9180 = vst [vmem:[#allocation7_spill] sm:$0xff] %v7151_v38  ;;  %2769 = vmatmul.bf16.vlgmr.msrb.gmra.mxu0 %v7151_v38 }
 0x11e   : > { %v7122_v27 = vpop.f32.mrf.mxu1  ;;  %v7137_v51 = vpop.f32.mrf.mxu0 }
 0x11f   : > { %v1713_v16 = vshrl.u32 %v1665_v8, 16  ;;  %v1716_v30 = vshll.u32 %v1665_v8, 16  ;;  %v1543_v40 = vmax.f32 %v1511_v26, 0.0  ;;  %v914_v26 = vmax.f32 %v7088_v35, %v7080_v25 }
 0x121   : > { %v1715_v33 = vrot.slane %v1713_v16, 7  ;;  %v1575_v4 = vpack.c.bf16 %v1543_v40, %v1543_v40 }
 0x122   : > { %v1135_v41 = vpop.f32.mrf.mxu2  ;;  %v1412_v39 = vpop.f32.mrf.mxu3 }
 0x123   : > { %v1476_v45 = vmax.f32 %v1194_v29, %v1412_v39  ;;  %v1718_v32 = vor.u32 %v1716_v30, %v1715_v33  ;;  %v7130_v55 = vsel %vm6895_vm3, %v1715_v33, 0  ;;  %v1639_v13 = vunpack.c.l.b16 %v1575_v4 }
 0x124   : > { %v1936_v46 = vshll.u32 %v7130_v55, 16  ;;  %v1196_v39 = vmax.f32 %v914_v26, %v1135_v41 }
 0x125   : > { %v1512_v58 = vadd.f32 %v6946_v21, %v1476_v45  ;;  %v7135_v42 = vsel %vm6895_vm3, 0, %v1718_v32  ;;  %v6278_v45 = vld [vmem:[%s9176_s3 + $0xf8] sm:$0xff] }
 0x126   : > { %v1931_v1 = vshll.u32 %v7135_v42, 16  ;;  %v1929_v15 = vshrl.u32 %v7135_v42, 16  ;;  %v7147_v0 = vpop.f32.mrf.mxu1  ;;  %v1938_v12 = vrot.slane %v1936_v46, 1  ;;  %v7162_v33 = vpop.f32.mrf.mxu0  ;;  %3028 = vmatpush.bf16.msra.mxu3 %v6278_v45  ;;  %v6275_v45 = vld [vmem:[%s9176_s3 + $0xe0] sm:$0xff] }
 0x127   : > { %v1544_v6 = vmax.f32 %v1512_v58, 0.0  ;;  %5308 = vmatmul.msk.bf16.gmra.mxu2 %vm513_vm0, %v6230_v47  ;;  %5419 = vmatmul.msk.bf16.gmra.mxu3 %vm513_vm0, %v6245_v31  ;;  %v915_v47 = vmax.f32 %v7112_v14, %v7100_v53  ;;  %v6277_v53 = vld [vmem:[%s9176_s3 + $0xf0] sm:$0xff] }
 0x128   : > { %v1933_v19 = vrot.slane %v1931_v1, 1 }
 0x129   : > { %v1576_v62 = vpack.c.bf16 %v1544_v6, %v1544_v6 }
 0x12a   : > { %v1138_v5 = vpop.f32.mrf.mxu2  ;;  %v1415_v9 = vpop.f32.mrf.mxu3  ;;  %v1934_v10 = vor.u32 %v1933_v19, %v1929_v15  ;;  %3029 = vmatpush.bf16.msra.mxu3 %v6277_v53 }
 0x12b   : > { %v1640_v8 = vunpack.c.l.b16 %v1576_v62  ;;  %v1477_v2 = vmax.f32 %v1195_v24, %v1415_v9  ;;  %v1197_v19 = vmax.f32 %v915_v47, %v1138_v5 }
 0x12c   : > { %v7155_v22 = vsel %vm1867_vm4, %v1934_v10, %v1938_v12  ;;  %v6276_v12 = vld [vmem:[%s9176_s3 + $0xe8] sm:$0xff] }
 0x12d   : > { %v1666_v16 = vpack.c.b16 %v1640_v8, %v1639_v13  ;;  %2168 = vrot.lane.b32.xlu2 %v7155_v22, %s9151_s15  ;;  %v1513_v29 = vadd.f32 %v6946_v21, %v1477_v2 }
 0x12e   : > { %v7169_v32 = vpop.f32.mrf.mxu1  ;;  %v7188_v10 = vpop.f32.mrf.mxu0  ;;  %3030 = vmatpush.bf16.msra.mxu3 %v6276_v12 }
 0x12f   : > { %v1720_v30 = vshrl.u32 %v1666_v16, 16  ;;  %v1723_v34 = vshll.u32 %v1666_v16, 16  ;;  %v1545_v35 = vmax.f32 %v1513_v29, 0.0 }
 0x131   : > { %v1722_v40 = vrot.slane %v1720_v30, 7  ;;  %v1577_v24 = vpack.c.bf16 %v1545_v35, %v1545_v35  ;;  %v6270_v35 = vld [vmem:[%s9176_s3 + $0xb8] sm:$0xff] }
 0x132   : > { %v1140_v31 = vpop.f32.mrf.mxu2  ;;  %v1417_v25 = vpop.f32.mrf.mxu3  ;;  %3031 = vmatpush.bf16.msra.mxu3 %v6275_v45  ;;  %2939 = vmatpush.bf16.msra.mxu2 %v6270_v35 }
 0x133   : > { %v1478_v58 = vmax.f32 %v1196_v39, %v1417_v25  ;;  %v1725_v1 = vor.u32 %v1723_v34, %v1722_v40  ;;  %v7174_v46 = vsel %vm6895_vm3, %v1722_v40, 0  ;;  %v1641_v26 = vunpack.c.l.b16 %v1577_v24 }
 0x134   : > { %v1948_v6 = vshll.u32 %v7174_v46, 16  ;;  %v916_v40 = vmax.f32 %v7137_v51, %v7122_v27 }
 0x135   : > { %v1514_v41 = vadd.f32 %v6946_v21, %v1478_v58  ;;  %v7179_v4 = vsel %vm6895_vm3, 0, %v1725_v1  ;;  %v6262_v58 = vld [vmem:[%s9176_s3 + $0x78] sm:$0xff] }
 0x136   : > { %v1943_v14 = vshll.u32 %v7179_v4, 16  ;;  %v1941_v61 = vshrl.u32 %v7179_v4, 16  ;;  %v1950_v16 = vrot.slane %v1948_v6, 1  ;;  %v7196_v39 = vpop.f32.mrf.mxu1  ;;  %v1198_v51 = vmax.f32 %v916_v40, %v1140_v31  ;;  %2850 = vmatpush.bf16.msrb.mxu1 %v6262_v58  ;;  %v6274_v1 = vld [vmem:[%s9176_s3 + $0xd8] sm:$0xff]  ;;  %v616_v31 = vpop.f32.mrf.mxu0  ;;  %v6272_v40 = vld [vmem:[%s9176_s3 + $0xc8] sm:$0xff] }
 0x137   : > { %v1546_v15 = vmax.f32 %v1514_v41, 0.0  ;;  %5420 = vmatmul.msk.bf16.gmra.mxu3 %vm513_vm0, %v6246_v60  ;;  %v917_v41 = vmax.f32 %v7162_v33, %v7147_v0  ;;  %v6273_v33 = vld [vmem:[%s9176_s3 + $0xd0] sm:$0xff] }
 0x138   : > { %v1945_v62 = vrot.slane %v1943_v14, 1  ;;  %3032 = vmatpush.bf16.msra.mxu3 %v6274_v1  ;;  %v918_v1 = vmax.f32 %v7188_v10, %v7169_v32 }
 0x139   : > { %v1578_v9 = vpack.c.bf16 %v1546_v15, %v1546_v15 }
 0x13a   : > { %v1143_v13 = vpop.f32.mrf.mxu2  ;;  %v1420_v8 = vpop.f32.mrf.mxu3  ;;  %v1946_v2 = vor.u32 %v1945_v62, %v1941_v61  ;;  %v6282_v61 = vld [vmem:[%s9176_s3 + $0x118] sm:$0xff] }
 0x13b   : > { %v1642_v30 = vunpack.c.l.b16 %v1578_v9  ;;  %v1479_v29 = vmax.f32 %v1197_v19, %v1420_v8  ;;  %3121 = vmatpush.bf16.msra.mxu0 %v6282_v61 }
 0x13c   : > { %v7194_v5 = vsel %vm1867_vm4, %v1946_v2, %v1950_v16  ;;  %3033 = vmatpush.bf16.msra.mxu3 %v6273_v33 }
 0x13d   : > { %v1667_v34 = vpack.c.b16 %v1642_v30, %v1641_v26  ;;  %2170 = vrot.lane.b32.xlu0 %v7194_v5, %s9151_s15  ;;  %v1515_v25 = vadd.f32 %v6946_v21, %v1479_v29  ;;  %v1199_v26 = vmax.f32 %v917_v41, %v1143_v13 }
 0x13e   : > { %v7234_v2 = vpop.f32.mrf.mxu1  ;;  %v618_v41 = vpop.f32.mrf.mxu0 }
 0x13f   : > { %v1727_v47 = vshrl.u32 %v1667_v34, 16  ;;  %v1730_v27 = vshll.u32 %v1667_v34, 16  ;;  %v1547_v6 = vmax.f32 %v1515_v25, 0.0 }
 0x140   : > { %3034 = vmatpush.bf16.msra.mxu3 %v6272_v40 }
 0x141   : > { %v1729_v60 = vrot.slane %v1727_v47, 7  ;;  %v1579_v8 = vpack.c.bf16 %v1547_v6, %v1547_v6 }
 0x142   : > { %v1145_v53 = vpop.f32.mrf.mxu2  ;;  %v1422_v14 = vpop.f32.mrf.mxu3 }
 0x143   : > { %v1480_v24 = vmax.f32 %v1198_v51, %v1422_v14  ;;  %v1732_v15 = vor.u32 %v1730_v27, %v1729_v60  ;;  %v7219_v19 = vsel %vm6895_vm3, %v1729_v60, 0  ;;  %v1643_v58 = vunpack.c.l.b16 %v1579_v8  ;;  %v6271_v14 = vld [vmem:[%s9176_s3 + $0xc0] sm:$0xff] }
 0x144   : > { %v1960_v12 = vshll.u32 %v7219_v19, 16  ;;  %3035 = vmatpush.bf16.msra.mxu3 %v6271_v14 }
 0x145   : > { %v1516_v62 = vadd.f32 %v6946_v21, %v1480_v24  ;;  %v7227_v0 = vsel %vm6895_vm3, 0, %v1732_v15 }
 0x146   : > { %v1955_v9 = vshll.u32 %v7227_v0, 16  ;;  %v1953_v30 = vshrl.u32 %v7227_v0, 16  ;;  %v1962_v35 = vrot.slane %v1960_v12, 1  ;;  %v871_v61 = vpop.f32.mrf.mxu1 }
 0x147   : > { %v1548_v16 = vmax.f32 %v1516_v62, 0.0  ;;  %v1200_v62 = vmax.f32 %v918_v1, %v1145_v53 }
 0x148   : > { %v1957_v29 = vrot.slane %v1955_v9, 1  ;;  %v919_v9 = vmax.f32 %v616_v31, %v7196_v39 }
 0x149   : > { %v1580_v34 = vpack.c.bf16 %v1548_v16, %v1548_v16 }
 0x14a   : > { %v1148_v45 = vpop.f32.mrf.mxu2  ;;  %v1425_v47 = vpop.f32.mrf.mxu3  ;;  %v1958_v25 = vor.u32 %v1957_v29, %v1953_v30 }
 0x14b   : > { %v1644_v27 = vunpack.c.l.b16 %v1580_v34  ;;  %v1481_v51 = vmax.f32 %v1199_v26, %v1425_v47  ;;  %v1201_v40 = vmax.f32 %v919_v9, %v1148_v45  ;;  %v621_v47 = vpop.f32.mrf.mxu0 }
 0x14c   : > { %v7241_v60 = vsel %vm1867_vm4, %v1958_v25, %v1962_v35 }
 0x14d   : > { %v1668_v13 = vpack.c.b16 %v1644_v27, %v1643_v58  ;;  %2172 = vrot.lane.b32.xlu1 %v7241_v60, %s9151_s15  ;;  %v1517_v24 = vadd.f32 %v6946_v21, %v1481_v51 }
 0x14f   : > { %v1734_v6 = vshrl.u32 %v1668_v13, 16  ;;  %v1737_v15 = vshll.u32 %v1668_v13, 16  ;;  %v1549_v10 = vmax.f32 %v1517_v24, 0.0 }
 0x151   : > { %v1736_v33 = vrot.slane %v1734_v6, 7  ;;  %v1581_v39 = vpack.c.bf16 %v1549_v10, %v1549_v10 }
 0x152   : > { %v1150_v12 = vpop.f32.mrf.mxu2  ;;  %v1427_v32 = vpop.f32.mrf.mxu3 }
 0x153   : > { %v1482_v8 = vmax.f32 %v1200_v62, %v1427_v32  ;;  %v1739_v16 = vor.u32 %v1737_v15, %v1736_v33  ;;  %v7254_v26 = vsel %vm6895_vm3, %v1736_v33, 0  ;;  %v1645_v14 = vunpack.c.l.b16 %v1581_v39  ;;  %v873_v15 = vpop.f32.mrf.mxu1 }
 0x154   : > { %v1972_v34 = vshll.u32 %v7254_v26, 16  ;;  %v920_v32 = vmax.f32 %v618_v41, %v7234_v2  ;;  %v623_v41 = vpop.f32.mrf.mxu0  ;;  %v921_v39 = vmax.f32 %v621_v47, %v871_v61 }
 0x155   : > { %v1518_v30 = vadd.f32 %v6946_v21, %v1482_v8  ;;  %v7259_v29 = vsel %vm6895_vm3, 0, %v1739_v16  ;;  %v6269_v8 = vld [vmem:[%s9176_s3 + $0xb0] sm:$0xff] }
 0x156   : > { %v1967_v53 = vshll.u32 %v7259_v29, 16  ;;  %v1965_v25 = vshrl.u32 %v7259_v29, 16  ;;  %v1974_v1 = vrot.slane %v1972_v34, 1  ;;  %v6261_v16 = vld [vmem:[%s9176_s3 + $0x70] sm:$0xff]  ;;  %v1202_v2 = vmax.f32 %v920_v32, %v1150_v12  ;;  %2940 = vmatpush.bf16.msra.mxu2 %v6269_v8 }
 0x157   : > { %v1550_v31 = vmax.f32 %v1518_v30, 0.0  ;;  %2851 = vmatpush.bf16.msrb.mxu1 %v6261_v16 }
 0x158   : > { %v1969_v35 = vrot.slane %v1967_v53, 1 }
 0x159   : > { %v1582_v58 = vpack.c.bf16 %v1550_v31, %v1550_v31 }
 0x15a   : > { %v1153_v27 = vpop.f32.mrf.mxu2  ;;  %v1430_v51 = vpop.f32.mrf.mxu3  ;;  %v1970_v13 = vor.u32 %v1969_v35, %v1965_v25 }
 0x15b   : > { %v1646_v6 = vunpack.c.l.b16 %v1582_v58  ;;  %v1483_v24 = vmax.f32 %v1201_v40, %v1430_v51  ;;  %v876_v12 = vpop.f32.mrf.mxu1 }
 0x15c   : > { %v7265_v62 = vsel %vm1867_vm4, %v1970_v13, %v1974_v1 }
 0x15d   : > { %9181 = vst [vmem:[#allocation8_spill] sm:$0xff] %v7265_v62  ;;  %v1669_v33 = vpack.c.b16 %v1646_v6, %v1645_v14  ;;  %2174 = vrot.lane.b32.xlu2 %v7265_v62, %s9151_s15  ;;  %v1519_v9 = vadd.f32 %v6946_v21, %v1483_v24  ;;  %v1203_v24 = vmax.f32 %v921_v39, %v1153_v27 }
 0x15f   : > { %v1741_v45 = vshrl.u32 %v1669_v33, 16  ;;  %v2161_v10 = vpop.permute.xlu0 %2160  ;;  %v1744_v53 = vshll.u32 %v1669_v33, 16  ;;  %v1551_v25 = vmax.f32 %v1519_v9, 0.0 }
 0x160   : > { %v2261_v30 = vsel %vm2256_vm5, %v6988_v17, %v2161_v10 }
 0x161   : > { %2774 = vmatmul.bf16.gmra.mxu0 %v2261_v30  ;;  %v1743_v34 = vrot.slane %v1741_v45, 7  ;;  %v1583_v47 = vpack.c.bf16 %v1551_v25, %v1551_v25 }
 0x162   : > { %v1155_v31 = vpop.f32.mrf.mxu2  ;;  %v1432_v40 = vpop.f32.mrf.mxu3 }
 0x163   : > { %v1484_v35 = vmax.f32 %v1202_v2, %v1432_v40  ;;  %v1746_v58 = vor.u32 %v1744_v53, %v1743_v34  ;;  %v7281_v51 = vsel %vm6895_vm3, %v1743_v34, 0  ;;  %v1647_v30 = vunpack.c.l.b16 %v1583_v47  ;;  %v626_v40 = vpop.f32.mrf.mxu0 }
 0x164   : > { %v1984_v61 = vshll.u32 %v7281_v51, 16 }
 0x165   : > { %v1520_v13 = vadd.f32 %v6946_v21, %v1484_v35  ;;  %v7286_v1 = vsel %vm6895_vm3, 0, %v1746_v58  ;;  %v922_v58 = vmax.f32 %v623_v41, %v873_v15 }
 0x166   : > { %v1979_v14 = vshll.u32 %v7286_v1, 16  ;;  %v1977_v33 = vshrl.u32 %v7286_v1, 16  ;;  %v1986_v16 = vrot.slane %v1984_v61, 1 }
 0x167   : > { %v1552_v6 = vmax.f32 %v1520_v13, 0.0  ;;  %v878_v13 = vpop.f32.mrf.mxu1  ;;  %v1204_v47 = vmax.f32 %v922_v58, %v1155_v31 }
 0x168   : > { %v1981_v32 = vrot.slane %v1979_v14, 1 }
 0x169   : > { %v1584_v45 = vpack.c.bf16 %v1552_v6, %v1552_v6 }
 0x16a   : > { %v1158_v9 = vpop.f32.mrf.mxu2  ;;  %v1435_v10 = vpop.f32.mrf.mxu3  ;;  %v1982_v8 = vor.u32 %v1981_v32, %v1977_v33 }
 0x16b   : > { %v1648_v53 = vunpack.c.l.b16 %v1584_v45  ;;  %v1485_v2 = vmax.f32 %v1203_v24, %v1435_v10  ;;  %v923_v24 = vmax.f32 %v626_v40, %v876_v12 }
 0x16c   : > { %v7292_v34 = vsel %vm1867_vm4, %v1982_v8, %v1986_v16 }
 0x16d   : > { %9182 = vst [vmem:[#allocation9_spill] sm:$0xff] %v7292_v34  ;;  %v1670_v35 = vpack.c.b16 %v1648_v53, %v1647_v30  ;;  %2176 = vrot.lane.b32.xlu0 %v7292_v34, %s9151_s15  ;;  %v1521_v39 = vadd.f32 %v6946_v21, %v1485_v2  ;;  %v628_v30 = vpop.f32.mrf.mxu0  ;;  %v1205_v40 = vmax.f32 %v923_v24, %v1158_v9 }
 0x16e   : > { %v924_v62 = vmax.f32 %v628_v30, %v878_v13 }
 0x16f   : > { %v1748_v27 = vshrl.u32 %v1670_v35, 16  ;;  %v2163_v25 = vpop.permute.xlu1 %2162  ;;  %v1751_v61 = vshll.u32 %v1670_v35, 16  ;;  %v1553_v15 = vmax.f32 %v1521_v39, 0.0  ;;  %v881_v39 = vpop.f32.mrf.mxu1 }
 0x170   : > { %v2264_v14 = vsel %vm2256_vm5, %v7029_v36, %v2163_v25 }
 0x171   : > { %2779 = vmatmul.bf16.gmra.mxu0 %v2264_v14  ;;  %3036 = vmatmul.bf16.vlgmr.msra.gmra.mxu3 %v2264_v14  ;;  %v1750_v6 = vrot.slane %v1748_v27, 7  ;;  %v1585_v53 = vpack.c.bf16 %v1553_v15, %v1553_v15 }
 0x172   : > { %v1160_v33 = vpop.f32.mrf.mxu2  ;;  %v1437_v32 = vpop.f32.mrf.mxu3 }
 0x173   : > { %v1486_v41 = vmax.f32 %v1204_v47, %v1437_v32  ;;  %v1753_v45 = vor.u32 %v1751_v61, %v1750_v6  ;;  %v7301_v10 = vsel %vm6895_vm3, %v1750_v6, 0  ;;  %v1649_v47 = vunpack.c.l.b16 %v1585_v53 }
 0x174   : > { %v1996_v12 = vshll.u32 %v7301_v10, 16  ;;  %v1206_v30 = vmax.f32 %v924_v62, %v1160_v33 }
 0x175   : > { %v1522_v8 = vadd.f32 %v6946_v21, %v1486_v41  ;;  %v7306_v16 = vsel %vm6895_vm3, 0, %v1753_v45 }
 0x176   : > { %v1991_v31 = vshll.u32 %v7306_v16, 16  ;;  %v1989_v35 = vshrl.u32 %v7306_v16, 16  ;;  %v1998_v61 = vrot.slane %v1996_v12, 1  ;;  %v631_v12 = vpop.f32.mrf.mxu0 }
 0x177   : > { %v1554_v2 = vmax.f32 %v1522_v8, 0.0  ;;  %v6268_v8 = vld [vmem:[%s9176_s3 + $0xa8] sm:$0xff] }
 0x178   : > { %v1993_v58 = vrot.slane %v1991_v31, 1  ;;  %v6260_v31 = vld [vmem:[%s9176_s3 + $0x68] sm:$0xff]  ;;  %2941 = vmatpush.bf16.msra.mxu2 %v6268_v8 }
 0x179   : > { %v1586_v27 = vpack.c.bf16 %v1554_v2, %v1554_v2  ;;  %2852 = vmatpush.bf16.msrb.mxu1 %v6260_v31 }
 0x17a   : > { %v1440_v25 = vpop.f32.mrf.mxu3  ;;  %v1994_v14 = vor.u32 %v1993_v58, %v1989_v35  ;;  %v1163_v41 = vpop.f32.mrf.mxu2 }
 0x17b   : > { %v1650_v6 = vunpack.c.l.b16 %v1586_v27  ;;  %v1487_v32 = vmax.f32 %v1205_v40, %v1440_v25  ;;  %v925_v40 = vmax.f32 %v631_v12, %v881_v39 }
 0x17c   : > { %v7312_v45 = vsel %vm1867_vm4, %v1994_v14, %v1998_v61  ;;  %v6281_v61 = vld [vmem:[%s9176_s3 + $0x110] sm:$0xff] }
 0x17d   : > { %9183 = vst [vmem:[#allocation10_spill] sm:$0xff] %v7312_v45  ;;  %v1671_v34 = vpack.c.b16 %v1650_v6, %v1649_v47  ;;  %2178 = vrot.lane.b32.xlu1 %v7312_v45, %s9151_s15  ;;  %v1523_v24 = vadd.f32 %v6946_v21, %v1487_v32  ;;  %3122 = vmatpush.bf16.msra.mxu0 %v6281_v61 }
 0x17e   : > { %v633_v12 = vpop.f32.mrf.mxu0 }
 0x17f   : > { %v1755_v9 = vshrl.u32 %v1671_v34, 16  ;;  %v2165_v15 = vpop.permute.xlu1 %2164  ;;  %v1758_v13 = vshll.u32 %v1671_v34, 16  ;;  %v1555_v58 = vmax.f32 %v1523_v24, 0.0  ;;  %v883_v34 = vpop.f32.mrf.mxu1  ;;  %v1207_v24 = vmax.f32 %v925_v40, %v1163_v41 }
 0x180   : > { %v2267_v53 = vsel %vm2256_vm5, %v7065_v54, %v2165_v15  ;;  %v926_v45 = vmax.f32 %v633_v12, %v883_v34 }
 0x181   : > { %2784 = vmatmul.bf16.gmra.mxu0 %v2267_v53  ;;  %3041 = vmatmul.bf16.gmra.mxu3 %v2267_v53  ;;  %v1757_v2 = vrot.slane %v1755_v9, 7  ;;  %v1587_v32 = vpack.c.bf16 %v1555_v58, %v1555_v58  ;;  %v7348_v58 = vld [vmem:[%s9179_s2] ss:$0 sm:$0xff] }
 0x182   : > { %v1442_v35 = vpop.f32.mrf.mxu3  ;;  %v1165_v33 = vpop.f32.mrf.mxu2 }
 0x183   : > { %v1488_v27 = vmax.f32 %v1206_v30, %v1442_v35  ;;  %v1760_v25 = vor.u32 %v1758_v13, %v1757_v2  ;;  %v7327_v14 = vsel %vm6895_vm3, %v1757_v2, 0  ;;  %v1651_v30 = vunpack.c.l.b16 %v1587_v32 }
 0x184   : > { %v2008_v6 = vshll.u32 %v7327_v14, 16  ;;  %v1208_v34 = vmax.f32 %v926_v45, %v1165_v33 }
 0x185   : > { %v1524_v47 = vadd.f32 %v6946_v21, %v1488_v27  ;;  %v7335_v62 = vsel %vm6895_vm3, 0, %v1760_v25  ;;  %v2167_v25 = vpop.permute.xlu2 %2166 }
 0x186   : > { %v2003_v39 = vshll.u32 %v7335_v62, 16  ;;  %v2001_v15 = vshrl.u32 %v7335_v62, 16  ;;  %v2010_v13 = vrot.slane %v2008_v6, 1  ;;  %v2270_v6 = vsel %vm2256_vm5, %v7104_v23, %v2167_v25 }
 0x187   : > { %v1556_v9 = vmax.f32 %v1524_v47, 0.0  ;;  %v886_v41 = vpop.f32.mrf.mxu1 }
 0x188   : > { %v2005_v8 = vrot.slane %v2003_v39, 1  ;;  %v927_v45 = vmax.f32 %v6891_v43, %v886_v41 }
 0x189   : > { %v1588_v31 = vpack.c.bf16 %v1556_v9, %v1556_v9 }
 0x18a   : > { %v1445_v53 = vpop.f32.mrf.mxu3  ;;  %v2006_v21 = vor.u32 %v2005_v8, %v2001_v15  ;;  %v1168_v39 = vpop.f32.mrf.mxu2 }
 0x18b   : > { %v1652_v2 = vunpack.c.l.b16 %v1588_v31  ;;  %v1489_v35 = vmax.f32 %v1207_v24, %v1445_v53 }
 0x18c   : > { %v7341_v27 = vsel %vm1867_vm4, %v2006_v21, %v2010_v13 }
 0x18d   : > { %9184 = vst [vmem:[#allocation11_spill] sm:$0xff] %v7341_v27  ;;  %v1672_v61 = vpack.c.b16 %v1652_v2, %v1651_v30  ;;  %2180 = vrot.lane.b32.xlu2 %v7341_v27, %s9151_s15  ;;  %v1525_v47 = vadd.f32 %v7348_v58, %v1489_v35  ;;  %v2169_v38 = vpop.permute.xlu2 %2168 }
 0x18f   : > { %v1762_v40 = vshrl.u32 %v1672_v61, 16  ;;  %v1765_v32 = vshll.u32 %v1672_v61, 16  ;;  %v1557_v15 = vmax.f32 %v1525_v47, 0.0  ;;  %v888_v35 = vpop.f32.mrf.mxu1 }
 0x190   : > { %v928_v41 = vmax.f32 %v6910_v56, %v888_v35 }
 0x191   : > { %2789 = vmatmul.bf16.gmra.mxu0 %v2270_v6  ;;  %3046 = vmatmul.bf16.gmra.mxu3 %v2270_v6  ;;  %v1764_v9 = vrot.slane %v1762_v40, 7  ;;  %v1589_v33 = vpack.c.bf16 %v1557_v15, %v1557_v15  ;;  %v1209_v40 = vmax.f32 %v927_v45, %v1168_v39 }
 0x192   : > { %v1447_v24 = vpop.f32.mrf.mxu3  ;;  %v1170_v6 = vpop.f32.mrf.mxu2 }
 0x193   : > { %v1490_v8 = vmax.f32 %v1208_v34, %v1447_v24  ;;  %v1767_v31 = vor.u32 %v1765_v32, %v1764_v9  ;;  %v7355_v12 = vsel %vm6895_vm3, %v1764_v9, 0  ;;  %v1653_v24 = vunpack.c.l.b16 %v1589_v33 }
 0x194   : > { %v2020_v30 = vshll.u32 %v7355_v12, 16  ;;  %v1210_v45 = vmax.f32 %v928_v41, %v1170_v6 }
 0x195   : > { %v1526_v53 = vadd.f32 %v7348_v58, %v1490_v8  ;;  %v7360_v21 = vsel %vm6895_vm3, 0, %v1767_v31 }
 0x196   : > { %v2015_v13 = vshll.u32 %v7360_v21, 16  ;;  %v2013_v25 = vshrl.u32 %v7360_v21, 16  ;;  %v2022_v9 = vrot.slane %v2020_v30, 1  ;;  %v2273_v30 = vsel %vm2256_vm5, %v7135_v42, %v2169_v38 }
 0x197   : > { %v1558_v2 = vmax.f32 %v1526_v53, 0.0  ;;  %v6267_v53 = vld [vmem:[%s9176_s3 + $0xa0] sm:$0xff]  ;;  %v891_v56 = vpop.f32.mrf.mxu1 }
 0x198   : > { %v2017_v61 = vrot.slane %v2015_v13, 1  ;;  %v6259_v13 = vld [vmem:[%s9176_s3 + $0x60] sm:$0xff]  ;;  %2942 = vmatpush.bf16.msra.mxu2 %v6267_v53 }
 0x199   : > { %v1590_v47 = vpack.c.bf16 %v1558_v2, %v1558_v2  ;;  %2853 = vmatpush.bf16.msrb.mxu1 %v6259_v13 }
 0x19a   : > { %v1450_v32 = vpop.f32.mrf.mxu3  ;;  %v2018_v34 = vor.u32 %v2017_v61, %v2013_v25 }
 0x19b   : > { %v1654_v8 = vunpack.c.l.b16 %v1590_v47  ;;  %v1491_v31 = vmax.f32 %v1209_v40, %v1450_v32  ;;  %v1173_v47 = vpop.f32.mrf.mxu2 }
 0x19c   : > { %v7367_v27 = vsel %vm1867_vm4, %v2018_v34, %v2022_v9 }
 0x19d   : > { %v1673_v43 = vpack.c.b16 %v1654_v8, %v1653_v24  ;;  %2182 = vrot.lane.b32.xlu0 %v7367_v27, %s9151_s15  ;;  %v1527_v39 = vadd.f32 %v7348_v58, %v1491_v31  ;;  %v929_v24 = vmax.f32 %v6893_v44, %v891_v56 }
 0x19f   : > { %v1769_v15 = vshrl.u32 %v1673_v43, 16  ;;  %v1772_v33 = vshll.u32 %v1673_v43, 16  ;;  %v1559_v25 = vmax.f32 %v1527_v39, 0.0 }
 0x1a1   : > { %2794 = vmatmul.bf16.gmra.mxu0 %v2273_v30  ;;  %3051 = vmatmul.bf16.gmra.mxu3 %v2273_v30  ;;  %v1771_v2 = vrot.slane %v1769_v15, 7  ;;  %v1591_v8 = vpack.c.bf16 %v1559_v25, %v1559_v25  ;;  %v1211_v15 = vmax.f32 %v929_v24, %v1173_v47 }
 0x1a2   : > { %v1452_v35 = vpop.f32.mrf.mxu3 }
 0x1a3   : > { %v1492_v61 = vmax.f32 %v1210_v45, %v1452_v35  ;;  %v1774_v40 = vor.u32 %v1772_v33, %v1771_v2  ;;  %v7383_v32 = vsel %vm6895_vm3, %v1771_v2, 0  ;;  %v1655_v45 = vunpack.c.l.b16 %v1591_v8  ;;  %v893_v35 = vpop.f32.mrf.mxu1  ;;  %v1175_v44 = vpop.f32.mrf.mxu2 }
 0x1a4   : > { %v2032_v9 = vshll.u32 %v7383_v32, 16  ;;  %v930_v56 = vmax.f32 %v6912_v57, %v893_v35  ;;  %v6258_v35 = vld [vmem:[%s9176_s3 + $0x58] sm:$0xff] }
 0x1a5   : > { %v1528_v34 = vadd.f32 %v7348_v58, %v1492_v61  ;;  %v7388_v38 = vsel %vm6895_vm3, 0, %v1774_v40  ;;  %2854 = vmatpush.bf16.msrb.mxu1 %v6258_v35 }
 0x1a6   : > { %v2027_v6 = vshll.u32 %v7388_v38, 16  ;;  %v2025_v43 = vshrl.u32 %v7388_v38, 16  ;;  %v2034_v30 = vrot.slane %v2032_v9, 1  ;;  %v2096_v9 = vrot.slane %v6988_v17, 1 }
 0x1a7   : > { %v1560_v31 = vmax.f32 %v1528_v34, 0.0  ;;  %v1212_v24 = vmax.f32 %v930_v56, %v1175_v44 }
 0x1a8   : > { %v2029_v41 = vrot.slane %v2027_v6, 1 }
 0x1a9   : > { %v1592_v39 = vpack.c.bf16 %v1560_v31, %v1560_v31 }
 0x1aa   : > { %v1455_v53 = vpop.f32.mrf.mxu3  ;;  %v2030_v13 = vor.u32 %v2029_v41, %v2025_v43  ;;  %v6266_v43 = vld [vmem:[%s9176_s3 + $0x98] sm:$0xff]  ;;  %v2097_v41 = vrot.slane %v6980_v11, 1 }
 0x1ab   : > { %v1656_v33 = vunpack.c.l.b16 %v1592_v39  ;;  %v1493_v2 = vmax.f32 %v1211_v15, %v1455_v53  ;;  %2943 = vmatpush.bf16.msra.mxu2 %v6266_v43 }
 0x1ac   : > { %v7395_v61 = vsel %vm1867_vm4, %v2030_v13, %v2034_v30  ;;  %v7409_v13 = vsel %vm2092_vm6, %v2096_v9, %v2097_v41 }
 0x1ad   : > { %v1674_v40 = vpack.c.b16 %v1656_v33, %v1655_v45  ;;  %2184 = vrot.lane.b32.xlu1 %v7395_v61, %s9151_s15  ;;  %v1529_v47 = vadd.f32 %v7348_v58, %v1493_v2 }
 0x1af   : > { %v1776_v25 = vshrl.u32 %v1674_v40, 16  ;;  %v2171_v34 = vpop.permute.xlu0 %2170  ;;  %v1779_v8 = vshll.u32 %v1674_v40, 16  ;;  %v1561_v15 = vmax.f32 %v1529_v47, 0.0  ;;  %v6280_v40 = vld [vmem:[%s9176_s3 + $0x108] sm:$0xff] }
 0x1b0   : > { %v2276_v6 = vsel %vm2256_vm5, %v7179_v4, %v2171_v34  ;;  %3123 = vmatpush.bf16.msra.mxu0 %v6280_v40 }
 0x1b1   : > { %2799 = vmatmul.bf16.gmra.mxu0 %v2276_v6  ;;  %3056 = vmatmul.bf16.gmra.mxu3 %v2276_v6  ;;  %v1778_v31 = vrot.slane %v1776_v25, 7  ;;  %v1593_v44 = vpack.c.bf16 %v1561_v15, %v1561_v15 }
 0x1b2   : > { %v1457_v57 = vpop.f32.mrf.mxu3 }
 0x1b3   : > { %v1494_v39 = vmax.f32 %v1212_v24, %v1457_v57  ;;  %v1781_v53 = vor.u32 %v1779_v8, %v1778_v31  ;;  %v7413_v30 = vsel %vm6895_vm3, %v1778_v31, 0  ;;  %v1657_v24 = vunpack.c.l.b16 %v1593_v44 }
 0x1b4   : > { %v2044_v2 = vshll.u32 %v7413_v30, 16 }
 0x1b5   : > { %v1530_v45 = vadd.f32 %v7348_v58, %v1494_v39  ;;  %2222 = vrot.lane.b32.xlu1 %v7409_v13, %s9151_s15  ;;  %v7420_v33 = vsel %vm6895_vm3, 0, %v1781_v53  ;;  %v2105_v39 = vrot.slane %v7104_v23, 1 }
 0x1b6   : > { %v2039_v11 = vshll.u32 %v7420_v33, 16  ;;  %v2037_v25 = vshrl.u32 %v7420_v33, 16  ;;  %v2046_v9 = vrot.slane %v2044_v2, 1 }
 0x1b7   : > { %v1562_v56 = vmax.f32 %v1530_v45, 0.0 }
 0x1b8   : > { %v2041_v47 = vrot.slane %v2039_v11, 1  ;;  %v2106_v11 = vrot.slane %v7096_v49, 1 }
 0x1b9   : > { %v1594_v34 = vpack.c.bf16 %v1562_v56, %v1562_v56 }
 0x1ba   : > { %v2042_v6 = vor.u32 %v2041_v47, %v2037_v25  ;;  %v7447_v40 = vsel %vm2092_vm6, %v2105_v39, %v2106_v11  ;;  %v2102_v25 = vrot.slane %v7065_v54, 1  ;;  %v6265_v39 = vld [vmem:[%s9176_s3 + $0x90] sm:$0xff] }
 0x1bb   : > { %v1658_v8 = vunpack.c.l.b16 %v1594_v34  ;;  %2944 = vmatpush.bf16.msra.mxu2 %v6265_v39 }
 0x1bc   : > { %v7432_v31 = vsel %vm1867_vm4, %v2042_v6, %v2046_v9  ;;  %v2103_v6 = vrot.slane %v7057_v59, 1 }
 0x1bd   : > { %v1675_v43 = vpack.c.b16 %v1658_v8, %v1657_v24  ;;  %2186 = vrot.lane.b32.xlu2 %v7432_v31, %s9151_s15  ;;  %2192 = vrot.lane.b32.xlu1 %v7029_v36, %s9151_s15  ;;  %v7462_v24 = vpop.f32.mrf.mxu0 }
 0x1be   : > { %v7465_v8 = vsel %vm2092_vm6, %v2102_v25, %v2103_v6  ;;  %v1460_v25 = vpop.f32.mrf.mxu3 }
 0x1bf   : > { %v1783_v57 = vshrl.u32 %v1675_v43, 16  ;;  %v2173_v41 = vpop.permute.xlu1 %2172  ;;  %v1786_v53 = vshll.u32 %v1675_v43, 16 }
 0x1c0   : > { %v2279_v15 = vsel %vm2256_vm5, %v7227_v0, %v2173_v41  ;;  %v2099_v41 = vrot.slane %v7029_v36, 1 }
 0x1c1   : > { %2804 = vmatmul.bf16.gmra.mxu0 %v2279_v15  ;;  %3061 = vmatmul.bf16.gmra.mxu3 %v2279_v15  ;;  %v1785_v45 = vrot.slane %v1783_v57, 7  ;;  %v2175_v57 = vpop.permute.xlu2 %2174  ;;  %v2114_v15 = vrot.slane %v7227_v0, 1 }
 0x1c2   : > { %v2282_v59 = vsel %vm2256_vm5, %v7259_v29, %v2175_v57 }
 0x1c3   : > { %v1788_v2 = vor.u32 %v1786_v53, %v1785_v45  ;;  %v7444_v35 = vsel %vm6895_vm3, %v1785_v45, 0  ;;  %v2100_v53 = vrot.slane %v7018_v63, 1  ;;  %v2115_v45 = vrot.slane %v7219_v19, 1  ;;  %v6257_v63 = vld [vmem:[%s9176_s3 + $0x50] sm:$0xff]  ;;  %v896_v19 = vpop.f32.mrf.mxu1 }
 0x1c4   : > { %v2056_v56 = vshll.u32 %v7444_v35, 16  ;;  %2855 = vmatpush.bf16.msrb.mxu1 %v6257_v63 }
 0x1c5   : > { %2190 = vrot.lane.b32.xlu2 %v6988_v17, %s9151_s15  ;;  %2228 = vrot.lane.b32.xlu1 %v7447_v40, %s9151_s15  ;;  %v7455_v44 = vsel %vm6895_vm3, 0, %v1788_v2  ;;  %v7486_v11 = vsel %vm2092_vm6, %v2099_v41, %v2100_v53  ;;  %v7493_v36 = vsel %vm2092_vm6, %v2114_v15, %v2115_v45  ;;  %v7495_v2 = vpop.f32.mrf.mxu0 }
 0x1c6   : > { %v2051_v49 = vshll.u32 %v7455_v44, 16  ;;  %v2049_v47 = vshrl.u32 %v7455_v44, 16  ;;  %v2058_v17 = vrot.slane %v2056_v56, 1  ;;  %v2112_v56 = vrot.slane %v7174_v46, 1  ;;  %v1462_v53 = vpop.f32.mrf.mxu3 }
 0x1c7   : > { %v2108_v46 = vrot.slane %v7135_v42, 1 }
 0x1c8   : > { %v2053_v34 = vrot.slane %v2051_v49, 1  ;;  %v2111_v49 = vrot.slane %v7179_v4, 1 }
 0x1ca   : > { %v2054_v9 = vor.u32 %v2053_v34, %v2049_v47  ;;  %v7505_v47 = vsel %vm2092_vm6, %v2111_v49, %v2112_v56 }
 0x1cb   : > { %v898_v57 = vpop.f32.mrf.mxu1 }
 0x1cc   : > { %v7468_v43 = vsel %vm1867_vm4, %v2054_v9, %v2058_v17  ;;  %v2123_v17 = vrot.slane %v7306_v16, 1  ;;  %v932_v39 = vmax.f32 %v6926_v7, %v898_v57  ;;  %v2120_v7 = vrot.slane %v7286_v1, 1 }
 0x1cd   : > { %2226 = vrot.lane.b32.xlu2 %v7465_v8, %s9151_s15  ;;  %2188 = vrot.lane.b32.xlu0 %v7468_v43, %s9151_s15  ;;  %v2118_v57 = vrot.slane %v7254_v26, 1 }
 0x1ce   : > { %2198 = vrot.lane.b32.xlu1 %v7135_v42, %s9151_s15 }
 0x1d1   : > { %2809 = vmatmul.bf16.gmra.mxu0 %v2282_v59  ;;  %3066 = vmatmul.bf16.gmra.mxu3 %v2282_v59  ;;  %v2109_v59 = vrot.slane %v7130_v55, 1 }
 0x1d3   : > { %v7522_v15 = vsel %vm2092_vm6, %v2108_v46, %v2109_v59 }
 0x1d5   : > { %2196 = vrot.lane.b32.xlu2 %v7104_v23, %s9151_s15  ;;  %2224 = vrot.lane.b32.xlu0 %v7486_v11, %s9151_s15  ;;  %v1178_v23 = vpop.f32.mrf.mxu2 }
 0x1d6   : > { %2234 = vrot.lane.b32.xlu1 %v7493_v36, %s9151_s15 }
 0x1dd   : > { %2232 = vrot.lane.b32.xlu2 %v7505_v47, %s9151_s15  ;;  %2194 = vrot.lane.b32.xlu0 %v7065_v54, %s9151_s15  ;;  %v2124_v54 = vrot.slane %v7301_v10, 1  ;;  %v1180_v41 = vpop.f32.mrf.mxu2  ;;  %v931_v10 = vmax.f32 %v6924_v3, %v896_v19 }
 0x1de   : > { %2204 = vrot.lane.b32.xlu1 %v7259_v29, %s9151_s15  ;;  %v7513_v34 = vpop.f32.mrf.mxu0  ;;  %v1214_v45 = vmax.f32 %v932_v39, %v1180_v41  ;;  %v6256_v39 = vld [vmem:[%s9176_s3 + $0x48] sm:$0xff] }
 0x1df   : > { %v2177_v6 = vpop.permute.xlu0 %2176  ;;  %v7530_v42 = vsel %vm2092_vm6, %v2123_v17, %v2124_v54  ;;  %v1213_v63 = vmax.f32 %v931_v10, %v1178_v23  ;;  %v2132_v17 = vrot.slane %v7388_v38, 1  ;;  %2856 = vmatpush.bf16.msrb.mxu1 %v6256_v39 }
 0x1e0   : > { %v2285_v9 = vsel %vm2256_vm5, %v7286_v1, %v2177_v6  ;;  %v1496_v49 = vmax.f32 %v1214_v45, %v1462_v53  ;;  %v2129_v53 = vrot.slane %v7360_v21, 1 }
 0x1e1   : > { %2814 = vmatmul.bf16.gmra.mxu0 %v2285_v9  ;;  %3071 = vmatmul.bf16.gmra.mxu3 %v2285_v9  ;;  %v1495_v56 = vmax.f32 %v1213_v63, %v1460_v25  ;;  %v2117_v25 = vrot.slane %v7259_v29, 1  ;;  %v6279_v63 = vld [vmem:[%s9176_s3 + $0x100] sm:$0xff] }
 0x1e2   : > { %v1532_v9 = vadd.f32 %v7348_v58, %v1496_v49  ;;  %3124 = vmatpush.bf16.msra.mxu0 %v6279_v63 }
 0x1e3   : > { %v1531_v19 = vadd.f32 %v7348_v58, %v1495_v56  ;;  %v2133_v58 = vrot.slane %v7383_v32, 1  ;;  %v7562_v54 = vsel %vm2092_vm6, %v2117_v25, %v2118_v57  ;;  %v2139_v57 = vrot.slane %v7444_v35, 1 }
 0x1e4   : > { %v1564_v46 = vmax.f32 %v1532_v9, 0.0 }
 0x1e5   : > { %2202 = vrot.lane.b32.xlu2 %v7227_v0, %s9151_s15  ;;  %2230 = vrot.lane.b32.xlu0 %v7522_v15, %s9151_s15  ;;  %v2121_v0 = vrot.slane %v7281_v51, 1  ;;  %v1563_v59 = vmax.f32 %v1531_v19, 0.0  ;;  %v7569_v29 = vsel %vm2092_vm6, %v2132_v17, %v2133_v58  ;;  %v2126_v19 = vrot.slane %v7335_v62, 1 }
 0x1e6   : > { %2240 = vrot.lane.b32.xlu1 %v7530_v42, %s9151_s15  ;;  %v7534_v55 = vpop.f32.mrf.mxu0  ;;  %v1596_v41 = vpack.c.bf16 %v1564_v46, %v1564_v46  ;;  %v6263_v46 = vld [vmem:[%s9176_s3 + $0x80] sm:$0xff]  ;;  %v2138_v17 = vrot.slane %v7455_v44, 1 }
 0x1e7   : > { %v7540_v6 = vsel %vm2092_vm6, %v2120_v7, %v2121_v0  ;;  %v1595_v32 = vpack.c.bf16 %v1563_v59, %v1563_v59  ;;  %v2181_v0 = vpop.permute.xlu2 %2180 }
 0x1e8   : > { %v1660_v10 = vunpack.c.l.b16 %v1596_v41  ;;  %v2291_v9 = vsel %vm2256_vm5, %v7335_v62, %v2181_v0  ;;  %v7618_v59 = vsel %vm2092_vm6, %v2138_v17, %v2139_v57 }
 0x1e9   : > { %v1659_v45 = vunpack.c.l.b16 %v1595_v32 }
 0x1eb   : > { %v1676_v49 = vpack.c.b16 %v1660_v10, %v1659_v45  ;;  %v2136_v45 = vrot.slane %v7413_v30, 1 }
 0x1ed   : > { %2238 = vrot.lane.b32.xlu2 %v7540_v6, %s9151_s15  ;;  %2200 = vrot.lane.b32.xlu0 %v7179_v4, %s9151_s15  ;;  %v6264_v4 = vld [vmem:[%s9176_s3 + $0x88] sm:$0xff] }
 0x1ee   : > { %2210 = vrot.lane.b32.xlu1 %v7335_v62, %s9151_s15  ;;  %v7549_v3 = vpop.f32.mrf.mxu0  ;;  %2945 = vmatpush.bf16.msra.mxu2 %v6264_v4 }
 0x1ef   : > { %v2179_v51 = vpop.permute.xlu1 %2178 }
 0x1f0   : > { %v2288_v23 = vsel %vm2256_vm5, %v7306_v16, %v2179_v51  ;;  %v1790_v51 = vshrl.u32 %v1676_v49, 16 }
 0x1f1   : > { %2819 = vmatmul.bf16.gmra.mxu0 %v2288_v23  ;;  %3076 = vmatmul.bf16.gmra.mxu3 %v2288_v23 }
 0x1f2   : > { %v1792_v25 = vrot.slane %v1790_v51, 7  ;;  %2946 = vmatpush.bf16.msra.mxu2 %v6263_v46  ;;  %v2094_v51 = vrot.slane %v6906_v52, 1 }
 0x1f4   : > { %v1866_v39 = vsel %vm6895_vm3, %v1792_v25, 0  ;;  %v7667_v52 = vpop.f32.mrf.mxu3 }
 0x1f5   : > { %2208 = vrot.lane.b32.xlu2 %v7306_v16, %s9151_s15  ;;  %2236 = vrot.lane.b32.xlu0 %v7562_v54, %s9151_s15  ;;  %v2130_v16 = vrot.slane %v7355_v12, 1  ;;  %v6255_v12 = vld [vmem:[%s9176_s3 + $0x40] sm:$0xff]  ;;  %v2156_v63 = vrot.slane %v1866_v39, 1 }
 0x1f6   : > { %2246 = vrot.lane.b32.xlu1 %v7569_v29, %s9151_s15  ;;  %v7573_v26 = vpop.f32.mrf.mxu0  ;;  %2857 = vmatpush.bf16.msrb.mxu1 %v6255_v12 }
 0x1f7   : > { %v7581_v7 = vsel %vm2092_vm6, %v2129_v53, %v2130_v16  ;;  %v2135_v53 = vrot.slane %v7420_v33, 1 }
 0x1fd   : > { %2244 = vrot.lane.b32.xlu2 %v7581_v7, %s9151_s15  ;;  %2206 = vrot.lane.b32.xlu0 %v7286_v1, %s9151_s15  ;;  %v2127_v1 = vrot.slane %v7327_v14, 1  ;;  %v1793_v14 = vshll.u32 %v1676_v49, 16  ;;  %v7639_v49 = vsel %vm2092_vm6, %v2135_v53, %v2136_v45 }
 0x1fe   : > { %2216 = vrot.lane.b32.xlu1 %v7420_v33, %s9151_s15  ;;  %v7595_v56 = vpop.f32.mrf.mxu0 }
 0x1ff   : > { %v7602_v23 = vsel %vm2092_vm6, %v2126_v19, %v2127_v1  ;;  %v1795_v4 = vor.u32 %v1793_v14, %v1792_v25  ;;  %v2093_v1 = vrot.slane %v6901_v50, 1 }
 0x201   : > { %2824 = vmatmul.bf16.gmra.mxu0 %v2291_v9  ;;  %3081 = vmatmul.bf16.gmra.mxu3 %v2291_v9  ;;  %v7626_v58 = vsel %vm6895_vm3, 0, %v1795_v4  ;;  %v2149_v9 = vshll.u32 %v1866_v39, 16  ;;  %v7659_v14 = vsel %vm2092_vm6, %v2093_v1, %v2094_v51 }
 0x202   : > { %v2155_v10 = vrot.slane %v7626_v58, 1  ;;  %v2144_v16 = vshll.u32 %v7626_v58, 16  ;;  %v2142_v12 = vshrl.u32 %v7626_v58, 16  ;;  %9185 = vst [vmem:[#allocation12_spill] sm:$0xff] %v7659_v14 }
 0x203   : > { %v2151_v25 = vrot.slane %v2149_v9, 1 }
 0x204   : > { %v7642_v48 = vsel %vm2092_vm6, %v2155_v10, %v2156_v63  ;;  %v2146_v0 = vrot.slane %v2144_v16, 1  ;;  %v7675_v10 = vpop.f32.mrf.mxu3 }
 0x205   : > { %2242 = vrot.lane.b32.xlu0 %v7602_v23, %s9151_s15  ;;  %2214 = vrot.lane.b32.xlu2 %v7388_v38, %s9151_s15 }
 0x206   : > { %2218 = vrot.lane.b32.xlu1 %v7455_v44, %s9151_s15  ;;  %v7613_v62 = vpop.f32.mrf.mxu0  ;;  %v2147_v19 = vor.u32 %v2146_v0, %v2142_v12 }
 0x208   : > { %v7654_v46 = vsel %vm1867_vm4, %v2147_v19, %v2151_v25 }
 0x20c   : > { %v7685_v12 = vpop.f32.mrf.mxu3 }
 0x20d   : > { %2212 = vrot.lane.b32.xlu0 %v7360_v21, %s9151_s15  ;;  %2250 = vrot.lane.b32.xlu2 %v7618_v59, %s9151_s15 }
 0x20e   : > { %v7628_v41 = vpop.f32.mrf.mxu0 }
 0x20f   : > { %v2183_v32 = vpop.permute.xlu0 %2182 }
 0x210   : > { %v2294_v35 = vsel %vm2256_vm5, %v7360_v21, %v2183_v32 }
 0x211   : > { %2829 = vmatmul.bf16.gmra.mxu0 %v2294_v35  ;;  %3086 = vmatmul.bf16.gmra.mxu3 %v2294_v35 }
 0x214   : > { %v7691_v51 = vpop.f32.mrf.mxu3 }
 0x215   : > { %2248 = vrot.lane.b32.xlu0 %v7639_v49, %s9151_s15  ;;  %2252 = vrot.lane.b32.xlu2 %v7642_v48, %s9151_s15 }
 0x216   : > { %v7648_v21 = vpop.f32.mrf.mxu0 }
 0x217   : > { %v2187_v30 = vpop.permute.xlu2 %2186 }
 0x218   : > { %v2300_v45 = vsel %vm2256_vm5, %v7420_v33, %v2187_v30 }
 0x21d   : > { %2254 = vrot.lane.b32.xlu0 %v7654_v46, %s9151_s15 }
 0x21e   : > { %v7661_v17 = vpop.f32.mrf.mxu0 }
 0x21f   : > { %v2191_v4 = vpop.permute.xlu2 %2190  ;;  %v2185_v57 = vpop.permute.xlu1 %2184 }
 0x220   : > { %v2307_v32 = vsel %vm2256_vm5, %v7659_v14, %v2191_v4  ;;  %v2297_v50 = vsel %vm2256_vm5, %v7388_v38, %v2185_v57 }
 0x221   : > { %2834 = vmatmul.bf16.gmra.mxu0 %v2297_v50  ;;  %2858 = vmatmul.bf16.vlgmr.msrb.gmra.mxu1 %v2307_v32 }
 0x222   : > { %3091 = vmatmul.bf16.gmra.mxu3 %v2297_v50 }
 0x225   : > { %2220 = vrot.lane.b32.xlu0 %v7626_v58, %s9151_s15 }
 0x226   : > { %v7671_v39 = vpop.f32.mrf.mxu0 }
 0x227   : > { %v2223_v35 = vpop.permute.xlu1 %2222 }
 0x228   : > { %v2371_v53 = vsel %vm2256_vm5, %v7001_v37, %v2223_v35 }
 0x229   : > { %2947 = vmatmul.bf16.vlgmr.msra.gmra.mxu2 %v2371_v53 }
 0x22e   : > { %v7677_v16 = vpop.f32.mrf.mxu0 }
 0x22f   : > { %v2193_v38 = vpop.permute.xlu1 %2192 }
 0x230   : > { %v2311_v63 = vsel %vm2256_vm5, %v7409_v13, %v2193_v38 }
 0x231   : > { %2839 = vmatmul.bf16.gmra.mxu0 %v2300_v45  ;;  %2863 = vmatmul.bf16.gmra.mxu1 %v2311_v63 }
 0x232   : > { %3096 = vmatmul.bf16.gmra.mxu3 %v2300_v45 }
 0x236   : > { %v7683_v0 = vpop.f32.mrf.mxu0 }
 0x23e   : > { %v7687_v37 = vpop.f32.mrf.mxu0 }
 0x23f   : > { %v2189_v9 = vpop.permute.xlu0 %2188 }
 0x240   : > { %v2303_v19 = vsel %vm2256_vm5, %v7455_v44, %v2189_v9  ;;  %v2227_v44 = vpop.permute.xlu2 %2226 }
 0x241   : > { %2844 = vmatmul.bf16.gmra.mxu0 %v2303_v19  ;;  %v2379_v50 = vsel %vm2256_vm5, %v7076_v20, %v2227_v44 }
 0x242   : > { %3101 = vmatmul.bf16.gmra.mxu3 %v2303_v19 }
 0x246   : > { %v7693_v33 = vpop.f32.mrf.mxu0 }
 0x247   : > { %v2225_v13 = vpop.permute.xlu0 %2224 }
 0x248   : > { %v2375_v30 = vsel %vm2256_vm5, %v7040_v28, %v2225_v13  ;;  %v2197_v28 = vpop.permute.xlu2 %2196 }
 0x249   : > { %2952 = vmatmul.bf16.gmra.mxu2 %v2375_v30  ;;  %v2319_v38 = vsel %vm2256_vm5, %v7465_v8, %v2197_v28 }
 0x24e   : > { %v7697_v1 = vpop.f32.mrf.mxu0 }
 0x24f   : > { %9186 = vst [vmem:[#allocation13_spill] sm:$0xff] %v7697_v1  ;;  %v2195_v25 = vpop.permute.xlu0 %2194 }
 0x250   : > { %v2315_v4 = vsel %vm2256_vm5, %v7486_v11, %v2195_v25  ;;  %v2233_v28 = vpop.permute.xlu2 %2232 }
 0x251   : > { %2868 = vmatmul.bf16.gmra.mxu1 %v2315_v4  ;;  %5565 = vmatmul.msk.bf16.vlgmr.msra.gmra.mxu0 %vm2256_vm5, %v7486_v11  ;;  %v2229_v11 = vpop.permute.xlu1 %2228 }
 0x252   : > { %v2383_v9 = vsel %vm2256_vm5, %v7115_v18, %v2229_v11 }
 0x256   : > { %v7703_v57 = vpop.f32.mrf.mxu0 }
 0x257   : > { %9187 = vst [vmem:[#allocation14_spill] sm:$0xff] %v7703_v57  ;;  %v2231_v32 = vpop.permute.xlu0 %2230 }
 0x258   : > { %v2387_v4 = vsel %vm2256_vm5, %v7155_v22, %v2231_v32  ;;  %v2391_v22 = vsel %vm2256_vm5, %v7194_v5, %v2233_v28 }
 0x259   : > { %2957 = vmatmul.bf16.gmra.mxu2 %v2379_v50  ;;  %v2199_v20 = vpop.permute.xlu1 %2198 }
 0x25a   : > { %v2323_v30 = vsel %vm2256_vm5, %v7447_v40, %v2199_v20 }
 0x25e   : > { %v7707_v35 = vpop.f32.mrf.mxu0 }
 0x25f   : > { %9188 = vst [vmem:[#allocation15_spill] sm:$0xff] %v7707_v35  ;;  %v2201_v53 = vpop.permute.xlu0 %2200 }
 0x260   : > { %v2327_v50 = vsel %vm2256_vm5, %v7522_v15, %v2201_v53 }
 0x261   : > { %2873 = vmatmul.bf16.gmra.mxu1 %v2319_v38  ;;  %5566 = vmatmul.msk.bf16.gmra.mxu0 %vm2256_vm5, %v7465_v8 }
 0x266   : > { %v7713_v45 = vpop.f32.mrf.mxu0 }
 0x267   : > { %9189 = vst [vmem:[#allocation16_spill] sm:$0xff] %v7713_v45  ;;  %v2237_v63 = vpop.permute.xlu0 %2236 }
 0x269   : > { %2962 = vmatmul.bf16.gmra.mxu2 %v2383_v9  ;;  %v2203_v9 = vpop.permute.xlu2 %2202 }
 0x26e   : > { %v7717_v19 = vpop.f32.mrf.mxu0 }
 0x26f   : > { %9190 = vst [vmem:[#allocation17_spill] sm:$0xff] %v7717_v19  ;;  %v2207_v13 = vpop.permute.xlu0 %2206 }
 0x271   : > { %2878 = vmatmul.bf16.gmra.mxu1 %v2323_v30  ;;  %5567 = vmatmul.msk.bf16.gmra.mxu0 %vm2256_vm5, %v7447_v40  ;;  %v7737_v40 = vpop.f32.mrf.mxu3 }
 0x276   : > { %v7723_v8 = vpop.f32.mrf.mxu0 }
 0x277   : > { %9191 = vst [vmem:[#allocation18_spill] sm:$0xff] %v7723_v8  ;;  %v7725_v25 = vpop.permute.xlu0 %2242 }
 0x279   : > { %2967 = vmatmul.bf16.gmra.mxu2 %v2387_v4  ;;  %v7745_v32 = vpop.f32.mrf.mxu3  ;;  %v2235_v4 = vpop.permute.xlu1 %2234 }
 0x27a   : > { %v2395_v28 = vsel %vm2256_vm5, %v7241_v60, %v2235_v4 }
 0x27e   : > { %v7729_v18 = vpop.f32.mrf.mxu0 }
 0x27f   : > { %9192 = vst [vmem:[#allocation19_spill] sm:$0xff] %v7729_v18  ;;  %v7731_v44 = vpop.permute.xlu0 %2212 }
 0x281   : > { %2883 = vmatmul.bf16.gmra.mxu1 %v2327_v50  ;;  %5568 = vmatmul.msk.bf16.gmra.mxu0 %vm2256_vm5, %v7522_v15  ;;  %v2331_v15 = vsel %vm2256_vm5, %v7505_v47, %v2203_v9  ;;  %v7757_v50 = vpop.f32.mrf.mxu3 }
 0x286   : > { %v7739_v38 = vpop.f32.mrf.mxu0 }
 0x287   : > { %9193 = vst [vmem:[#allocation20_spill] sm:$0xff] %v7739_v38  ;;  %v7741_v11 = vpop.permute.xlu0 %2248 }
 0x289   : > { %2972 = vmatmul.bf16.gmra.mxu2 %v2391_v22  ;;  %v2205_v22 = vpop.permute.xlu1 %2204  ;;  %v7765_v9 = vpop.f32.mrf.mxu3 }
 0x28e   : > { %v7747_v20 = vpop.f32.mrf.mxu0 }
 0x28f   : > { %9194 = vst [vmem:[#allocation21_spill] sm:$0xff] %v7747_v20  ;;  %v2255_v53 = vpop.permute.xlu0 %2254 }
 0x290   : > { %v2434_v30 = vsel %vm2256_vm5, %v7626_v58, %v2255_v53  ;;  %v2335_v58 = vsel %vm2256_vm5, %v7493_v36, %v2205_v22  ;;  %v9197_v53 = vld [vmem:[#allocation7_spill] sm:$0xff] }
 0x291   : > { %2888 = vmatmul.bf16.gmra.mxu1 %v2331_v15  ;;  %3106 = vmatmul.bf16.gmra.mxu3 %v2434_v30  ;;  %v9199_v30 = vld [vmem:[#allocation8_spill] sm:$0xff]  ;;  %v7817_v14 = vpop.f32.mrf.mxu3 }
 0x292   : > { %5569 = vmatmul.msk.bf16.gmra.mxu0 %vm2256_vm5, %v7505_v47  ;;  %v2399_v60 = vsel %vm2256_vm5, %v9199_v30, %v2237_v63 }
 0x296   : > { %v7755_v5 = vpop.f32.mrf.mxu0 }
 0x297   : > { %9195 = vst [vmem:[#allocation22_spill] sm:$0xff] %v7755_v5  ;;  %v9205_v5 = vld [vmem:[#allocation10_spill] sm:$0xff] }
 0x299   : > { %2977 = vmatmul.bf16.gmra.mxu2 %v2395_v28  ;;  %v2339_v28 = vsel %vm2256_vm5, %v7562_v54, %v2207_v13 }
 0x29e   : > { %v7761_v20 = vpop.f32.mrf.mxu0  ;;  %v2859_v15 = vpop.f32.mrf.mxu1 }
 0x29f   : > { %9196 = vst [vmem:[#allocation23_spill] sm:$0xff] %v7761_v20 }
 0x2a1   : > { %2893 = vmatmul.bf16.gmra.mxu1 %v2335_v58  ;;  %3111 = vmatmul.bf16.gmra.mxu3 %v9197_v53  ;;  %v2239_v58 = vpop.permute.xlu2 %2238 }
 0x2a2   : > { %5570 = vmatmul.msk.bf16.gmra.mxu0 %vm2256_vm5, %v7493_v36  ;;  %v9202_v36 = vld [vmem:[#allocation9_spill] sm:$0xff] }
 0x2a6   : > { %v7770_v47 = vpop.f32.mrf.mxu0  ;;  %v2861_v22 = vpop.f32.mrf.mxu1 }
 0x2a7   : > { %9198 = vst [vmem:[#allocation7_spill] sm:$0xff] %v7770_v47  ;;  %v2403_v47 = vsel %vm2256_vm5, %v9202_v36, %v2239_v58 }
 0x2a9   : > { %2982 = vmatmul.bf16.gmra.mxu2 %v2399_v60  ;;  %v2209_v30 = vpop.permute.xlu2 %2208 }
 0x2aa   : > { %v2343_v13 = vsel %vm2256_vm5, %v7540_v6, %v2209_v30 }
 0x2ac   : > { %v2948_v20 = vpop.f32.mrf.mxu2 }
 0x2ae   : > { %v7774_v4 = vpop.f32.mrf.mxu0  ;;  %v2864_v63 = vpop.f32.mrf.mxu1 }
 0x2af   : > { %9200 = vst [vmem:[#allocation8_spill] sm:$0xff] %v7774_v4 }
 0x2b1   : > { %2898 = vmatmul.bf16.gmra.mxu1 %v2339_v28 }
 0x2b2   : > { %5571 = vmatmul.msk.bf16.gmra.mxu0 %vm2256_vm5, %v7562_v54  ;;  %v2241_v54 = vpop.permute.xlu1 %2240 }
 0x2b4   : > { %v2950_v28 = vpop.f32.mrf.mxu2 }
 0x2b6   : > { %v7780_v53 = vpop.f32.mrf.mxu0  ;;  %v2866_v4 = vpop.f32.mrf.mxu1 }
 0x2b7   : > { %9201 = vst [vmem:[#allocation24_spill] sm:$0xff] %v7780_v53 }
 0x2b9   : > { %2987 = vmatmul.bf16.gmra.mxu2 %v2403_v47  ;;  %v2407_v47 = vsel %vm2256_vm5, %v9205_v5, %v2241_v54 }
 0x2ba   : > { %v2211_v36 = vpop.permute.xlu1 %2210 }
 0x2bb   : > { %v2347_v30 = vsel %vm2256_vm5, %v7530_v42, %v2211_v36  ;;  %v9206_v36 = vld [vmem:[#allocation11_spill] sm:$0xff] }
 0x2bc   : > { %v2411_v8 = vsel %vm2256_vm5, %v9206_v36, %v7725_v25 }
 0x2be   : > { %v7784_v60 = vpop.f32.mrf.mxu0 }
 0x2bf   : > { %9203 = vst [vmem:[#allocation9_spill] sm:$0xff] %v7784_v60 }
 0x2c1   : > { %2903 = vmatmul.bf16.gmra.mxu1 %v2343_v13 }
 0x2c2   : > { %5572 = vmatmul.msk.bf16.gmra.mxu0 %vm2256_vm5, %v7540_v6  ;;  %v7799_v6 = vld [vmem:[%s9137_s4] ss:$0 sm:$0xff] }
 0x2c3   : > { %v2773_v5 = vadd.f32 %v7799_v6, %v7495_v2  ;;  %v2778_v2 = vadd.f32 %v7799_v6, %v7534_v55 }
 0x2c5   : > { %v2862_v18 = vadd.f32 %v2861_v22, %v2773_v5  ;;  %v2867_v25 = vadd.f32 %v2866_v4, %v2778_v2 }
 0x2c6   : > { %v7790_v53 = vpop.f32.mrf.mxu0 }
 0x2c7   : > { %9204 = vst [vmem:[#allocation25_spill] sm:$0xff] %v7790_v53  ;;  %v2771_v53 = vadd.f32 %v7799_v6, %v7462_v24  ;;  %v2951_v45 = vadd.f32 %v2950_v28, %v2862_v18 }
 0x2c9   : > { %2992 = vmatmul.bf16.gmra.mxu2 %v2407_v47  ;;  %v2860_v19 = vadd.f32 %v2859_v15, %v2771_v53  ;;  %v3040_v24 = vadd.f32 %v7675_v10, %v2951_v45  ;;  %v2245_v10 = vpop.permute.xlu2 %2244 }
 0x2cc   : > { %v2953_v58 = vpop.f32.mrf.mxu2 }
 0x2ce   : > { %v2869_v38 = vpop.f32.mrf.mxu1  ;;  %v3126_v60 = vpop.f32.mrf.mxu0 }
 0x2d1   : > { %2908 = vmatmul.bf16.gmra.mxu1 %v2347_v30  ;;  %v2776_v30 = vadd.f32 %v7799_v6, %v7513_v34  ;;  %v2215_v2 = vpop.permute.xlu2 %2214 }
 0x2d2   : > { %5573 = vmatmul.msk.bf16.gmra.mxu0 %vm2256_vm5, %v7530_v42  ;;  %v2949_v42 = vadd.f32 %v2948_v20, %v2860_v19  ;;  %v2351_v19 = vsel %vm2256_vm5, %v7602_v23, %v7731_v44 }
 0x2d3   : > { %v2865_v35 = vadd.f32 %v2864_v63, %v2776_v30 }
 0x2d4   : > { %v2955_v13 = vpop.f32.mrf.mxu2  ;;  %v3038_v34 = vadd.f32 %v7667_v52, %v2949_v42  ;;  %v2781_v52 = vadd.f32 %v7799_v6, %v7549_v3 }
 0x2d5   : > { %v2954_v1 = vadd.f32 %v2953_v58, %v2865_v35  ;;  %v2956_v18 = vadd.f32 %v2955_v13, %v2867_v25 }
 0x2d6   : > { %v2871_v54 = vpop.f32.mrf.mxu1  ;;  %v3128_v47 = vpop.f32.mrf.mxu0 }
 0x2d7   : > { %v3129_v15 = vadd.f32 %v3128_v47, %v3040_v24  ;;  %v3043_v55 = vadd.f32 %v7685_v12, %v2954_v1  ;;  %v3045_v53 = vadd.f32 %v7691_v51, %v2956_v18  ;;  %v2415_v1 = vsel %vm2256_vm5, %v7367_v27, %v2245_v10 }
 0x2d8   : > { %v2355_v18 = vsel %vm2256_vm5, %v7581_v7, %v2215_v2 }
 0x2d9   : > { %2997 = vmatmul.bf16.gmra.mxu2 %v2411_v8  ;;  %v3127_v8 = vadd.f32 %v3126_v60, %v3038_v34  ;;  %v3207_v35 = vmax.f32 %v3129_v15, 0.0  ;;  %v2870_v60 = vadd.f32 %v2869_v38, %v2781_v52  ;;  %v2783_v38 = vadd.f32 %v7799_v6, %v7573_v26 }
 0x2db   : > { %v3206_v4 = vmax.f32 %v3127_v8, 0.0  ;;  %v3272_v28 = vrot.slane %v3207_v35, 1 }
 0x2dc   : > { %v2958_v57 = vpop.f32.mrf.mxu2 }
 0x2dd   : > { %v3271_v13 = vrot.slane %v3206_v4, 1  ;;  %v2959_v47 = vadd.f32 %v2958_v57, %v2870_v60  ;;  %v2872_v57 = vadd.f32 %v2871_v54, %v2783_v38  ;;  %v2786_v54 = vadd.f32 %v7799_v6, %v7595_v56 }
 0x2de   : > { %v7815_v22 = vpop.f32.mrf.mxu1  ;;  %v3131_v5 = vpop.f32.mrf.mxu0 }
 0x2df   : > { %v3132_v45 = vadd.f32 %v3131_v5, %v3043_v55  ;;  %v3273_v3 = vsel %vm2092_vm6, %v3271_v13, %v3272_v28  ;;  %v3048_v5 = vadd.f32 %v7737_v40, %v2959_v47  ;;  %v2247_v40 = vpop.permute.xlu1 %2246 }
 0x2e0   : > { %v3366_v27 = vmax.f32 %v3206_v4, %v3273_v3 }
 0x2e1   : > { %2913 = vmatmul.bf16.gmra.mxu1 %v2351_v19  ;;  %v3208_v58 = vmax.f32 %v3132_v45, 0.0 }
 0x2e2   : > { %5574 = vmatmul.msk.bf16.gmra.mxu0 %vm2256_vm5, %v7602_v23  ;;  %v7831_v23 = vpop.f32.mrf.mxu3 }
 0x2e3   : > { %v3274_v30 = vrot.slane %v3208_v58, 1 }
 0x2e4   : > { %v2960_v20 = vpop.f32.mrf.mxu2 }
 0x2e5   : > { %v2961_v55 = vadd.f32 %v2960_v20, %v2872_v57  ;;  %v3275_v45 = vsel %vm2092_vm6, %v3272_v28, %v3274_v30  ;;  %v2419_v28 = vsel %vm2256_vm5, %v7395_v61, %v2247_v40 }
 0x2e6   : > { %v2876_v63 = vpop.f32.mrf.mxu1  ;;  %v3133_v44 = vpop.f32.mrf.mxu0  ;;  %v3367_v20 = vmax.f32 %v3207_v35, %v3275_v45 }
 0x2e7   : > { %v3134_v12 = vadd.f32 %v3133_v44, %v3045_v53  ;;  %v3050_v44 = vadd.f32 %v7745_v32, %v2961_v55  ;;  %v2788_v32 = vadd.f32 %v7799_v6, %v7613_v62 }
 0x2e9   : > { %v3209_v36 = vmax.f32 %v3134_v12, 0.0  ;;  %3002 = vmatmul.bf16.gmra.mxu2 %v2415_v1  ;;  %v2877_v61 = vadd.f32 %v2876_v63, %v2788_v32 }
 0x2ea   : > { %v7844_v26 = vpop.f32.mrf.mxu3 }
 0x2eb   : > { %v3276_v42 = vrot.slane %v3209_v36, 1 }
 0x2ec   : > { %v2963_v51 = vpop.f32.mrf.mxu2 }
 0x2ed   : > { %v3277_v24 = vsel %vm2092_vm6, %v3274_v30, %v3276_v42 }
 0x2ee   : > { %v3368_v25 = vmax.f32 %v3208_v58, %v3277_v24  ;;  %v2879_v34 = vpop.f32.mrf.mxu1  ;;  %v3136_v15 = vpop.f32.mrf.mxu0 }
 0x2ef   : > { %v3137_v19 = vadd.f32 %v3136_v15, %v3048_v5 }
 0x2f0   : > { %v7838_v8 = vmax.f32 %v3366_v27, %v3368_v25 }
 0x2f1   : > { %v3210_v10 = vmax.f32 %v3137_v19, 0.0  ;;  %2918 = vmatmul.bf16.gmra.mxu1 %v2355_v18  ;;  %v2791_v19 = vadd.f32 %v7799_v6, %v7628_v41  ;;  %v2793_v41 = vadd.f32 %v7799_v6, %v7648_v21 }
 0x2f2   : > { %5575 = vmatmul.msk.bf16.gmra.mxu0 %vm2256_vm5, %v7581_v7  ;;  %v2875_v7 = vadd.f32 %v7815_v22, %v2786_v54  ;;  %v7858_v35 = vpop.f32.mrf.mxu3  ;;  %v3423_v21 = vrot.slane %v7838_v8, 6 }
 0x2f3   : > { %v3278_v52 = vrot.slane %v3210_v10, 1  ;;  %v2880_v45 = vadd.f32 %v2879_v34, %v2791_v19 }
 0x2f4   : > { %v2965_v4 = vpop.f32.mrf.mxu2  ;;  %v2964_v47 = vadd.f32 %v2963_v51, %v2875_v7 }
 0x2f5   : > { %v3279_v53 = vsel %vm2092_vm6, %v3276_v42, %v3278_v52  ;;  %v2966_v27 = vadd.f32 %v2965_v4, %v2877_v61  ;;  %v2251_v61 = vpop.permute.xlu2 %2250 }
 0x2f6   : > { %v3369_v60 = vmax.f32 %v3209_v36, %v3279_v53  ;;  %v2881_v58 = vpop.f32.mrf.mxu1  ;;  %v3138_v12 = vpop.f32.mrf.mxu0  ;;  %v3053_v22 = vadd.f32 %v7757_v50, %v2964_v47  ;;  %v3419_v47 = vrot.slane %v7838_v8, 4 }
 0x2f7   : > { %v3139_v1 = vadd.f32 %v3138_v12, %v3050_v44  ;;  %v2217_v36 = vpop.permute.xlu1 %2216  ;;  %v3055_v50 = vadd.f32 %v7765_v9, %v2966_v27  ;;  %v2882_v12 = vadd.f32 %v2881_v58, %v2793_v41 }
 0x2f8   : > { %v7852_v13 = vmax.f32 %v3367_v20, %v3369_v60  ;;  %v2359_v5 = vsel %vm2256_vm5, %v7569_v29, %v2217_v36 }
 0x2f9   : > { %v3211_v3 = vmax.f32 %v3139_v1, 0.0  ;;  %3007 = vmatmul.bf16.gmra.mxu2 %v2419_v28 }
 0x2fa   : > { %v7874_v40 = vpop.f32.mrf.mxu3 }
 0x2fb   : > { %v3280_v56 = vrot.slane %v3211_v3, 1 }
 0x2fc   : > { %v2968_v30 = vpop.f32.mrf.mxu2 }
 0x2fd   : > { %v3281_v42 = vsel %vm2092_vm6, %v3278_v52, %v3280_v56  ;;  %v2969_v4 = vadd.f32 %v2968_v30, %v2880_v45  ;;  %v3439_v45 = vrot.slane %v7852_v13, 6 }
 0x2fe   : > { %v3370_v38 = vmax.f32 %v3210_v10, %v3281_v42  ;;  %v7862_v2 = vpop.f32.mrf.mxu1  ;;  %v3141_v24 = vpop.f32.mrf.mxu0 }
 0x2ff   : > { %v3142_v51 = vadd.f32 %v3141_v24, %v3053_v22  ;;  %v2219_v53 = vpop.permute.xlu1 %2218  ;;  %v3058_v34 = vadd.f32 %v7817_v14, %v2969_v4 }
 0x301   : > { %v3212_v25 = vmax.f32 %v3142_v51, 0.0  ;;  %2923 = vmatmul.bf16.gmra.mxu1 %v2359_v5  ;;  %v2796_v51 = vadd.f32 %v7799_v6, %v7661_v17 }
 0x302   : > { %5576 = vmatmul.msk.bf16.gmra.mxu0 %vm2256_vm5, %v7569_v29  ;;  %v2423_v29 = vsel %vm2256_vm5, %v7432_v31, %v7741_v11  ;;  %v2363_v11 = vsel %vm2256_vm5, %v7639_v49, %v2219_v53 }
 0x303   : > { %v3282_v62 = vrot.slane %v3212_v25, 1 }
 0x304   : > { %v2970_v15 = vpop.f32.mrf.mxu2 }
 0x305   : > { %v3283_v57 = vsel %vm2092_vm6, %v3280_v56, %v3282_v62  ;;  %v2971_v28 = vadd.f32 %v2970_v15, %v2882_v12  ;;  %v7892_v56 = vpop.f32.mrf.mxu3  ;;  %v2885_v15 = vadd.f32 %v7862_v2, %v2796_v51 }
 0x306   : > { %v3371_v63 = vmax.f32 %v3211_v3, %v3283_v57  ;;  %v7872_v18 = vpop.f32.mrf.mxu1  ;;  %v3143_v55 = vpop.f32.mrf.mxu0  ;;  %v3415_v3 = vrot.slane %v7838_v8, 2  ;;  %v2427_v57 = vsel %vm2256_vm5, %v7468_v43, %v2251_v61 }
 0x307   : > { %v3144_v10 = vadd.f32 %v3143_v55, %v3055_v50  ;;  %v3060_v27 = vadd.f32 %v7831_v23, %v2971_v28  ;;  %v3435_v50 = vrot.slane %v7852_v13, 4  ;;  %v2221_v43 = vpop.permute.xlu0 %2220 }
 0x309   : > { %v3213_v52 = vmax.f32 %v3144_v10, 0.0  ;;  %3012 = vmatmul.bf16.gmra.mxu2 %v2423_v29  ;;  %v3431_v10 = vrot.slane %v7852_v13, 2 }
 0x30b   : > { %v3284_v54 = vrot.slane %v3213_v52, 1 }
 0x30c   : > { %v2973_v9 = vpop.f32.mrf.mxu2 }
 0x30d   : > { %v3285_v44 = vsel %vm2092_vm6, %v3282_v62, %v3284_v54  ;;  %v2974_v19 = vadd.f32 %v2973_v9, %v2885_v15  ;;  %v7915_v2 = vpop.f32.mrf.mxu3  ;;  %v2798_v9 = vadd.f32 %v7799_v6, %v7671_v39  ;;  %v2367_v39 = vsel %vm2256_vm5, %v7618_v59, %v2221_v43 }
 0x30e   : > { %v3372_v20 = vmax.f32 %v3212_v25, %v3285_v44  ;;  %v7882_v60 = vpop.f32.mrf.mxu1 }
 0x30f   : > { %v3146_v7 = vpop.f32.mrf.mxu0  ;;  %v3063_v12 = vadd.f32 %v7844_v26, %v2974_v19 }
 0x310   : > { %v7885_v1 = vmax.f32 %v3370_v38, %v3372_v20  ;;  %v3147_v31 = vadd.f32 %v3146_v7, %v3058_v34 }
 0x311   : > { %2928 = vmatmul.bf16.gmra.mxu1 %v2363_v11  ;;  %v2887_v11 = vadd.f32 %v7872_v18, %v2798_v9 }
 0x312   : > { %v3214_v30 = vmax.f32 %v3147_v31, 0.0  ;;  %5577 = vmatmul.msk.bf16.gmra.mxu0 %vm2256_vm5, %v7639_v49  ;;  %v3452_v14 = vrot.slane %v7885_v1, 6  ;;  %v3448_v58 = vrot.slane %v7885_v1, 4  ;;  %v3444_v32 = vrot.slane %v7885_v1, 2 }
 0x314   : > { %v3286_v36 = vrot.slane %v3214_v30, 1  ;;  %v2975_v42 = vpop.f32.mrf.mxu2  ;;  %v6493_v22 = vpack.i.bf16 %v3452_v14, %v3423_v21  ;;  %v6488_v38 = vpack.i.bf16 %v3448_v58, %v3419_v47  ;;  %v6483_v24 = vpack.i.bf16 %v3444_v32, %v3415_v3 }
 0x315   : > { %v2976_v26 = vadd.f32 %v2975_v42, %v2887_v11  ;;  %v2801_v14 = vadd.f32 %v7799_v6, %v7677_v16  ;;  %v7933_v18 = vpop.f32.mrf.mxu3  ;;  %v6298_v16 = vld [vmem:[%s9138_s5 + $0x74] sm:$0xf0] }
 0x316   : > { %v3287_v5 = vsel %vm2092_vm6, %v3284_v54, %v3286_v36  ;;  %6494 = vrot.lane.b32.xlu0 %v6493_v22, %s9163_s22  ;;  %6489 = vrot.lane.b32.xlu2 %v6488_v38, %s9161_s25  ;;  %v7905_v49 = vpop.f32.mrf.mxu1 }
 0x317   : > { %v3373_v25 = vmax.f32 %v3213_v52, %v3287_v5  ;;  %v3148_v62 = vpop.f32.mrf.mxu0  ;;  %6484 = vrot.lane.b32.xlu1 %v6483_v24, %s9159_s29  ;;  %v3065_v32 = vadd.f32 %v7858_v35, %v2976_v26  ;;  %v2890_v42 = vadd.f32 %v7882_v60, %v2801_v14  ;;  %s9217_s29 = smov 112  }
 0x318   : > { %v3149_v17 = vadd.f32 %v3148_v62, %v3060_v27  ;;  %v2803_v62 = vadd.f32 %v7799_v6, %v7683_v0  ;;  %v6314_v0 = vld [vmem:[%s9138_s5 + $0xf4] sm:$0xf0] }
 0x319   : > { %v3401_v23 = vmax.f32 %v3371_v63, %v3373_v25  ;;  %3017 = vmatmul.bf16.gmra.mxu2 %v2427_v57 }
 0x31a   : > { %v3215_v55 = vmax.f32 %v3149_v17, 0.0 }
 0x31b   : > { %v6498_v29 = vpack.i.bf16 %v3401_v23, %v7852_v13  ;;  %v3464_v52 = vrot.slane %v3401_v23, 4  ;;  %v3460_v4 = vrot.slane %v3401_v23, 2  ;;  %v3468_v54 = vrot.slane %v3401_v23, 6 }
 0x31c   : > { %v3288_v41 = vrot.slane %v3215_v55, 1  ;;  %v2978_v53 = vpop.f32.mrf.mxu2 }
 0x31d   : > { %v6508_v63 = vpack.i.bf16 %v3464_v52, %v3435_v50  ;;  %v6503_v44 = vpack.i.bf16 %v3460_v4, %v3431_v10  ;;  %v6513_v20 = vpack.i.bf16 %v3468_v54, %v3439_v45  ;;  %v2979_v51 = vadd.f32 %v2978_v53, %v2890_v42  ;;  %v7951_v50 = vpop.f32.mrf.mxu3  ;;  %v5703_v10 = vld [vmem:[%s9138_s5 + $0xf0] sm:$0xf]  ;;  %v6330_v52 = vld [vmem:[%s9138_s5 + $0x174] sm:$0xf0] }
 0x31e   : > { %v3289_v34 = vsel %vm2092_vm6, %v3286_v36, %v3288_v41  ;;  %v7921_v7 = vpop.f32.mrf.mxu1  ;;  %v2806_v53 = vadd.f32 %v7799_v6, %v7687_v37  ;;  %v2808_v37 = vadd.f32 %v7799_v6, %v7693_v33  ;;  %v9208_v33 = vld [vmem:[#allocation13_spill] sm:$0xff] }
 0x31f   : > { %v3374_v13 = vmax.f32 %v3214_v30, %v3289_v34  ;;  %v3151_v31 = vpop.f32.mrf.mxu0  ;;  %6499 = vrot.lane.b32.xlu1 %v6498_v29, %s9151_s15  ;;  %6509 = vrot.lane.b32.xlu0 %v6508_v63, %s9157_s30  ;;  %v2253_v30 = vpop.permute.xlu2 %2252  ;;  %v3068_v57 = vadd.f32 %v7874_v40, %v2979_v51  ;;  %v5767_v40 = vld [vmem:[%s9138_s5 + $0x170] sm:$0xf]  ;;  %v6296_v51 = vld [vmem:[%s9138_s5 + $0x64] sm:$0xf0]  ;;  %s9211_s15 = smov 16   ;;  %s6637_s30 = scalar_lea.hbm %s9144_s11, 2 }
 0x320   : > { %v3152_v28 = vadd.f32 %v3151_v31, %v3063_v12  ;;  %6504 = vrot.lane.b32.xlu2 %v6503_v44, %s9155_s12  ;;  %v2431_v35 = vsel %vm2256_vm5, %v7654_v46, %v2253_v30  ;;  %v2892_v46 = vadd.f32 %v7905_v49, %v2803_v62  ;;  %v5704_v49 = vor.u32 %v6314_v0, %v5703_v10 }
 0x321   : > { %2933 = vmatmul.bf16.gmra.mxu1 %v2367_v39  ;;  %v5768_v4 = vor.u32 %v6330_v52, %v5767_v40  ;;  %v2895_v9 = vadd.f32 %v7921_v7, %v2806_v53 }
 0x322   : > { %v3216_v21 = vmax.f32 %v3152_v28, 0.0  ;;  %5578 = vmatmul.msk.bf16.gmra.mxu0 %vm2256_vm5, %v7618_v59  ;;  %v5639_v59 = vld [vmem:[%s9138_s5 + $0x70] sm:$0xf]  ;;  %4502 = vmatpush.bf16.msrb.mxu2 %v5704_v49 }
 0x323   : > { %v5640_v61 = vor.u32 %v6298_v16, %v5639_v59  ;;  %4515 = vmatpush.bf16.msrb.mxu3 %v5768_v4  ;;  %v2811_v16 = vadd.f32 %v7799_v6, %v9208_v33 }
 0x324   : > { %v3290_v47 = vrot.slane %v3216_v21, 1  ;;  %v2980_v3 = vpop.f32.mrf.mxu2 }
 0x325   : > { %4489 = vmatpush.bf16.msra.mxu1 %v5640_v61  ;;  %v2981_v45 = vadd.f32 %v2980_v3, %v2892_v46  ;;  %v5631_v61 = vld [vmem:[%s9138_s5 + $0x60] sm:$0xf] }
 0x326   : > { %v3291_v58 = vsel %vm2092_vm6, %v3288_v41, %v3290_v47  ;;  %v2896_v36 = vpop.f32.mrf.mxu1 }
 0x327   : > { %v3375_v22 = vmax.f32 %v3215_v55, %v3291_v58  ;;  %v3153_v38 = vpop.f32.mrf.mxu0  ;;  %6514 = vrot.lane.b32.xlu1 %v6513_v20, %s9153_s13  ;;  %v3070_v44 = vadd.f32 %v7892_v56, %v2981_v45  ;;  %v2897_v3 = vadd.f32 %v2896_v36, %v2808_v37 }
 0x328   : > { %v3154_v24 = vadd.f32 %v3153_v38, %v3065_v32  ;;  %v9207_v32 = vld [vmem:[#allocation12_spill] sm:$0xff] }
 0x329   : > { %3022 = vmatmul.bf16.gmra.mxu2 %v2431_v35 }
 0x32a   : > { %v3217_v5 = vmax.f32 %v3154_v24, 0.0 }
 0x32c   : > { %v3292_v27 = vrot.slane %v3217_v5, 1  ;;  %v2983_v25 = vpop.f32.mrf.mxu2 }
 0x32d   : > { %v2984_v31 = vadd.f32 %v2983_v25, %v2895_v9  ;;  %v5632_v25 = vor.u32 %v6296_v51, %v5631_v61 }
 0x32e   : > { %v3293_v15 = vsel %vm2092_vm6, %v3290_v47, %v3292_v27  ;;  %v2899_v17 = vpop.f32.mrf.mxu1 }
 0x32f   : > { %v3376_v60 = vmax.f32 %v3216_v21, %v3293_v15  ;;  %v3156_v23 = vpop.f32.mrf.mxu0  ;;  %v3073_v56 = vadd.f32 %v7915_v2, %v2984_v31  ;;  %4490 = vmatpush.bf16.msra.mxu1 %v5632_v25 }
 0x330   : > { %v3157_v19 = vadd.f32 %v3156_v23, %v3068_v57  ;;  %v9209_v23 = vld [vmem:[#allocation14_spill] sm:$0xff] }
 0x331   : > { %v7954_v55 = vmax.f32 %v3374_v13, %v3376_v60  ;;  %v7977_v13 = vpop.f32.mrf.mxu3 }
 0x332   : > { %v3218_v29 = vmax.f32 %v3157_v19, 0.0  ;;  %5579 = vmatmul.msk.bf16.gmra.mxu0 %vm2256_vm5, %v7642_v48 }
 0x333   : > { %v3500_v49 = vrot.slane %v7954_v55, 6  ;;  %v3496_v52 = vrot.slane %v7954_v55, 4 }
 0x334   : > { %v3294_v54 = vrot.slane %v3218_v29, 1  ;;  %v2985_v41 = vpop.f32.mrf.mxu2 }
 0x335   : > { %v2986_v14 = vadd.f32 %v2985_v41, %v2897_v3  ;;  %v5759_v41 = vld [vmem:[%s9138_s5 + $0x160] sm:$0xf] }
 0x336   : > { %v3295_v43 = vsel %vm2092_vm6, %v3292_v27, %v3294_v54  ;;  %v2901_v63 = vpop.f32.mrf.mxu1 }
 0x337   : > { %v3377_v20 = vmax.f32 %v3217_v5, %v3295_v43  ;;  %v3158_v48 = vpop.f32.mrf.mxu0  ;;  %v3075_v2 = vadd.f32 %v7933_v18, %v2986_v14  ;;  %v2900_v5 = vadd.f32 %v2899_v17, %v2811_v16  ;;  %v2813_v18 = vadd.f32 %v7799_v6, %v9209_v23 }
 0x338   : > { %v3159_v34 = vadd.f32 %v3158_v48, %v3070_v44 }
 0x339   : > { %v7975_v12 = vmax.f32 %v3375_v22, %v3377_v20  ;;  %v7987_v22 = vpop.f32.mrf.mxu3  ;;  %v2902_v45 = vadd.f32 %v2901_v63, %v2813_v18  ;;  %v3492_v63 = vrot.slane %v7954_v55, 2  ;;  %v6328_v20 = vld [vmem:[%s9138_s5 + $0x164] sm:$0xf0] }
 0x33a   : > { %v3219_v11 = vmax.f32 %v3159_v34, 0.0  ;;  %v5760_v31 = vor.u32 %v6328_v20, %v5759_v41 }
 0x33b   : > { %v3512_v16 = vrot.slane %v7975_v12, 4 }
 0x33c   : > { %v3296_v28 = vrot.slane %v3219_v11, 1  ;;  %v2988_v39 = vpop.f32.mrf.mxu2  ;;  %4516 = vmatpush.bf16.msrb.mxu3 %v5760_v31 }
 0x33d   : > { %v2989_v62 = vadd.f32 %v2988_v39, %v2900_v5 }
 0x33e   : > { %v3297_v26 = vsel %vm2092_vm6, %v3294_v54, %v3296_v28  ;;  %v7982_v21 = vpop.f32.mrf.mxu1  ;;  %v5695_v54 = vld [vmem:[%s9138_s5 + $0xe0] sm:$0xf] }
 0x33f   : > { %v3378_v47 = vmax.f32 %v3218_v29, %v3297_v26  ;;  %v3161_v7 = vpop.f32.mrf.mxu0  ;;  %v3078_v10 = vadd.f32 %v7951_v50, %v2989_v62  ;;  %v6312_v50 = vld [vmem:[%s9138_s5 + $0xe4] sm:$0xf0] }
 0x340   : > { %v3162_v30 = vadd.f32 %v3161_v7, %v3073_v56  ;;  %v5696_v44 = vor.u32 %v6312_v50, %v5695_v54  ;;  %v9210_v56 = vld [vmem:[#allocation15_spill] sm:$0xff] }
 0x341   : > { %v8003_v46 = vpop.f32.mrf.mxu3 }
 0x342   : > { %v3220_v58 = vmax.f32 %v3162_v30, 0.0  ;;  %5580 = vmatmul.msk.bf16.gmra.mxu0 %vm2256_vm5, %v9207_v32  ;;  %4503 = vmatpush.bf16.msrb.mxu2 %v5696_v44 }
 0x344   : > { %v3298_v38 = vrot.slane %v3220_v58, 1  ;;  %v2990_v59 = vpop.f32.mrf.mxu2 }
 0x345   : > { %v2991_v53 = vadd.f32 %v2990_v59, %v2902_v45 }
 0x346   : > { %v3299_v42 = vsel %vm2092_vm6, %v3296_v28, %v3298_v38  ;;  %v7992_v24 = vpop.f32.mrf.mxu1 }
 0x347   : > { %v3379_v36 = vmax.f32 %v3219_v11, %v3299_v42  ;;  %v3163_v35 = vpop.f32.mrf.mxu0  ;;  %v3080_v3 = vadd.f32 %v7977_v13, %v2991_v53 }
 0x348   : > { %v3164_v27 = vadd.f32 %v3163_v35, %v3075_v2  ;;  %v3508_v2 = vrot.slane %v7975_v12, 2  ;;  %v3516_v35 = vrot.slane %v7975_v12, 6 }
 0x34a   : > { %v3221_v15 = vmax.f32 %v3164_v27, 0.0 }
 0x34c   : > { %v3300_v57 = vrot.slane %v3221_v15, 1  ;;  %v2993_v60 = vpop.f32.mrf.mxu2 }
 0x34e   : > { %v3301_v19 = vsel %vm2092_vm6, %v3298_v38, %v3300_v57  ;;  %v8007_v40 = vpop.f32.mrf.mxu1 }
 0x34f   : > { %v3380_v0 = vmax.f32 %v3220_v58, %v3301_v19  ;;  %v3166_v17 = vpop.f32.mrf.mxu0  ;;  %v8035_v58 = vpop.f32.mrf.mxu3 }
 0x350   : > { %v3167_v29 = vadd.f32 %v3166_v17, %v3078_v10 }
 0x351   : > { %v8011_v4 = vmax.f32 %v3378_v47, %v3380_v0  ;;  %v2816_v47 = vadd.f32 %v7799_v6, %v9210_v56  ;;  %v6308_v56 = vld [vmem:[%s9138_s5 + $0xc4] sm:$0xf0] }
 0x352   : > { %v3222_v43 = vmax.f32 %v3167_v29, 0.0 }
 0x353   : > { %v3529_v48 = vrot.slane %v8011_v4, 6  ;;  %v3525_v9 = vrot.slane %v8011_v4, 4  ;;  %v3521_v34 = vrot.slane %v8011_v4, 2  ;;  %v2905_v32 = vadd.f32 %v7982_v21, %v2816_v47 }
 0x354   : > { %v3302_v11 = vrot.slane %v3222_v43, 1  ;;  %v2995_v28 = vpop.f32.mrf.mxu2 }
 0x355   : > { %v6528_v39 = vpack.i.bf16 %v3529_v48, %v3500_v49  ;;  %v6523_v37 = vpack.i.bf16 %v3525_v9, %v3496_v52  ;;  %v6518_v26 = vpack.i.bf16 %v3521_v34, %v3492_v63  ;;  %v2994_v42 = vadd.f32 %v2993_v60, %v2905_v32  ;;  %v5687_v63 = vld [vmem:[%s9138_s5 + $0xd0] sm:$0xf]  ;;  %v9218_v32 = vld [vmem:[#allocation18_spill] sm:$0xff] }
 0x356   : > { %v3303_v7 = vsel %vm2092_vm6, %v3300_v57, %v3302_v11  ;;  %v8039_v33 = vpop.f32.mrf.mxu1  ;;  %v9212_v57 = vld [vmem:[#allocation16_spill] sm:$0xff] }
 0x357   : > { %v3381_v30 = vmax.f32 %v3221_v15, %v3303_v7  ;;  %v3168_v14 = vpop.f32.mrf.mxu0  ;;  %6529 = vrot.lane.b32.xlu1 %v6528_v39, %s9163_s22  ;;  %6524 = vrot.lane.b32.xlu0 %v6523_v37, %s9161_s25  ;;  %v2818_v23 = vadd.f32 %v7799_v6, %v9212_v57  ;;  %v3083_v18 = vadd.f32 %v7987_v22, %v2994_v42  ;;  %v8053_v17 = vpop.f32.mrf.mxu3  ;;  %v9216_v22 = vld [vmem:[#allocation17_spill] sm:$0xff]  ;;  %v5615_v39 = vld [vmem:[%s9138_s5 + $0x40] sm:$0xf]  ;;  %v6292_v37 = vld [vmem:[%s9138_s5 + $0x44] sm:$0xf0]  ;;  %s9225_s22 = smov 48  }
 0x358   : > { %v3169_v38 = vadd.f32 %v3168_v14, %v3080_v3  ;;  %6519 = vrot.lane.b32.xlu2 %v6518_v26, %s9211_s15  ;;  %v2821_v50 = vadd.f32 %v7799_v6, %v9216_v22  ;;  %v5616_v26 = vor.u32 %v6292_v37, %v5615_v39  ;;  %v5607_v42 = vld [vmem:[%s9138_s5 + $0x30] sm:$0xf]  ;;  %v6284_v37 = vld [vmem:[%s9138_s5 + $0x4] sm:$0xf0]  ;;  %s9226_s25 = smov 32  }
 0x359   : > { %v3405_v59 = vmax.f32 %v3379_v36, %v3381_v30 }
 0x35a   : > { %v3223_v13 = vmax.f32 %v3169_v38, 0.0  ;;  %v2910_v9 = vadd.f32 %v8007_v40, %v2821_v50  ;;  %v5679_v40 = vld [vmem:[%s9138_s5 + $0xc0] sm:$0xf]  ;;  %v2823_v38 = vadd.f32 %v7799_v6, %v9218_v32 }
 0x35b   : > { %v6533_v61 = vpack.i.bf16 %v3405_v59, %v7975_v12  ;;  %v3541_v51 = vrot.slane %v3405_v59, 4  ;;  %v3537_v5 = vrot.slane %v3405_v59, 2  ;;  %v3545_v27 = vrot.slane %v3405_v59, 6 }
 0x35c   : > { %v3304_v21 = vrot.slane %v3223_v13, 1  ;;  %v2998_v25 = vpop.f32.mrf.mxu2  ;;  %v2907_v12 = vadd.f32 %v7992_v24, %v2818_v23  ;;  %v5623_v24 = vld [vmem:[%s9138_s5 + $0x50] sm:$0xf]  ;;  %v5680_v30 = vor.u32 %v6308_v56, %v5679_v40 }
 0x35d   : > { %v6543_v62 = vpack.i.bf16 %v3541_v51, %v3512_v16  ;;  %v6538_v15 = vpack.i.bf16 %v3537_v5, %v3508_v2  ;;  %v6548_v36 = vpack.i.bf16 %v3545_v27, %v3516_v35  ;;  %v5671_v2 = vld [vmem:[%s9138_s5 + $0xb0] sm:$0xf]  ;;  %v2912_v5 = vadd.f32 %v8039_v33, %v2823_v38  ;;  %v5599_v33 = vld [vmem:[%s9138_s5 + $0x20] sm:$0xf] }
 0x35e   : > { %v3305_v60 = vsel %vm2092_vm6, %v3302_v11, %v3304_v21  ;;  %v2996_v45 = vadd.f32 %v2995_v28, %v2907_v12  ;;  %v8055_v49 = vpop.f32.mrf.mxu1  ;;  %v2999_v11 = vadd.f32 %v2998_v25, %v2910_v9 }
 0x35f   : > { %v3382_v19 = vmax.f32 %v3222_v43, %v3305_v60  ;;  %v3171_v10 = vpop.f32.mrf.mxu0  ;;  %6544 = vrot.lane.b32.xlu1 %v6543_v62, %s9213_s14  ;;  %6539 = vrot.lane.b32.xlu0 %v6538_v15, %s9214_s24  ;;  %v6294_v43 = vld [vmem:[%s9138_s5 + $0x54] sm:$0xf0]  ;;  %v8089_v47 = vpop.f32.mrf.mxu3  ;;  %v5751_v62 = vld [vmem:[%s9138_s5 + $0x150] sm:$0xf] }
 0x360   : > { %v3172_v0 = vadd.f32 %v3171_v10, %v3083_v18  ;;  %6534 = vrot.lane.b32.xlu2 %v6533_v61, %s9215_s16  ;;  %v3085_v53 = vadd.f32 %v8003_v46, %v2996_v45  ;;  %v5624_v48 = vor.u32 %v6294_v43, %v5623_v24  ;;  %v6310_v46 = vld [vmem:[%s9138_s5 + $0xd4] sm:$0xf0]  ;;  %v3088_v16 = vadd.f32 %v8035_v58, %v2999_v11  ;;  %v6288_v60 = vld [vmem:[%s9138_s5 + $0x24] sm:$0xf0]  ;;  %v5655_v24 = vld [vmem:[%s9138_s5 + $0x90] sm:$0xf] }
 0x361   : > { %v5688_v31 = vor.u32 %v6310_v46, %v5687_v63  ;;  %v6306_v58 = vld [vmem:[%s9138_s5 + $0xb4] sm:$0xf0]  ;;  %v5600_v18 = vor.u32 %v6288_v60, %v5599_v33  ;;  %v6304_v10 = vld [vmem:[%s9138_s5 + $0xa4] sm:$0xf0] }
 0x362   : > { %v3224_v29 = vmax.f32 %v3172_v0, 0.0  ;;  %4491 = vmatpush.bf16.msra.mxu1 %v5624_v48  ;;  %v6326_v15 = vld [vmem:[%s9138_s5 + $0x154] sm:$0xf0] }
 0x363   : > { %4504 = vmatpush.bf16.msrb.mxu2 %v5688_v31  ;;  %v5752_v23 = vor.u32 %v6326_v15, %v5751_v62 }
 0x364   : > { %v3306_v52 = vrot.slane %v3224_v29, 1  ;;  %v3000_v54 = vpop.f32.mrf.mxu2 }
 0x365   : > { %4517 = vmatpush.bf16.msrb.mxu3 %v5752_v23 }
 0x366   : > { %v3307_v41 = vsel %vm2092_vm6, %v3304_v21, %v3306_v52  ;;  %v8091_v14 = vpop.f32.mrf.mxu1  ;;  %4492 = vmatpush.bf16.msra.mxu1 %v5616_v26  ;;  %v5672_v21 = vor.u32 %v6306_v58, %v5671_v2 }
 0x367   : > { %v8070_v44 = vmax.f32 %v3223_v13, %v3307_v41  ;;  %v3173_v20 = vpop.f32.mrf.mxu0  ;;  %4505 = vmatpush.bf16.msrb.mxu2 %v5680_v30  ;;  %v6290_v13 = vld [vmem:[%s9138_s5 + $0x34] sm:$0xf0]  ;;  %v5591_v41 = vld [vmem:[%s9138_s5 + $0x10] sm:$0xf] }
 0x368   : > { %v3174_v34 = vadd.f32 %v3173_v20, %v3085_v53  ;;  %6549 = vrot.lane.b32.xlu2 %v6548_v36, %s9217_s29  ;;  %v5608_v51 = vor.u32 %v6290_v13, %v5607_v42  ;;  %v3001_v36 = vadd.f32 %v3000_v54, %v2912_v5  ;;  %v3094_v54 = vpop.f32.mrf.mxu3  ;;  %v6286_v53 = vld [vmem:[%s9138_s5 + $0x14] sm:$0xf0] }
 0x369   : > { %v5592_v48 = vor.u32 %v6286_v53, %v5591_v41 }
 0x36a   : > { %v3225_v28 = vmax.f32 %v3174_v34, 0.0  ;;  %4493 = vmatpush.bf16.msra.mxu1 %v5608_v51  ;;  %v3090_v50 = vadd.f32 %v8053_v17, %v3001_v36  ;;  %v6302_v17 = vld [vmem:[%s9138_s5 + $0x94] sm:$0xf0] }
 0x36b   : > { %4506 = vmatpush.bf16.msrb.mxu2 %v5672_v21  ;;  %v5656_v34 = vor.u32 %v6302_v17, %v5655_v24  ;;  %v9221_v21 = vld [vmem:[#allocation21_spill] sm:$0xff] }
 0x36c   : > { %v3308_v7 = vrot.slane %v3225_v28, 1  ;;  %v3003_v3 = vpop.f32.mrf.mxu2  ;;  %v2831_v62 = vadd.f32 %v7799_v6, %v9221_v21 }
 0x36e   : > { %v3309_v59 = vsel %vm2092_vm6, %v3306_v52, %v3308_v7  ;;  %4494 = vmatpush.bf16.msra.mxu1 %v5600_v18  ;;  %v2919_v43 = vpop.f32.mrf.mxu1 }
 0x36f   : > { %v3384_v35 = vmax.f32 %v3224_v29, %v3309_v59  ;;  %v3176_v61 = vpop.f32.mrf.mxu0  ;;  %v9219_v29 = vld [vmem:[#allocation19_spill] sm:$0xff]  ;;  %v2920_v23 = vadd.f32 %v2919_v43, %v2831_v62 }
 0x370   : > { %v3177_v27 = vadd.f32 %v3176_v61, %v3088_v16  ;;  %v2826_v52 = vadd.f32 %v7799_v6, %v9219_v29  ;;  %v3097_v42 = vpop.f32.mrf.mxu3  ;;  %v6490_v58 = vpop.permute.xlu2 %6489 }
 0x371   : > { %v8110_v25 = vmax.f32 %v3382_v19, %v3384_v35  ;;  %v5663_v19 = vld [vmem:[%s9138_s5 + $0xa0] sm:$0xf]  ;;  %v6492_v43 = vunpack.i.h.bf16 %v6490_v58 }
 0x372   : > { %v3226_v57 = vmax.f32 %v3177_v27, 0.0  ;;  %v5664_v45 = vor.u32 %v6304_v10, %v5663_v19  ;;  %v2915_v46 = vadd.f32 %v8055_v49, %v2826_v52  ;;  %4495 = vmatpush.bf16.msra.mxu1 %v5592_v48  ;;  %v5647_v49 = vld [vmem:[%s9138_s5 + $0x80] sm:$0xf] }
 0x373   : > { %v9223_v52 = vld [vmem:[#allocation23_spill] sm:$0xff]  ;;  %v3572_v17 = vrot.slane %v8110_v25, 6 }
 0x374   : > { %v3310_v12 = vrot.slane %v3226_v57, 1  ;;  %v3005_v0 = vpop.f32.mrf.mxu2  ;;  %4507 = vmatpush.bf16.msrb.mxu2 %v5664_v45  ;;  %v3004_v11 = vadd.f32 %v3003_v3, %v2915_v46  ;;  %v9220_v3 = vld [vmem:[#allocation20_spill] sm:$0xff]  ;;  %v9222_v45 = vld [vmem:[#allocation22_spill] sm:$0xff]  ;;  %v3568_v46 = vrot.slane %v8110_v25, 4 }
 0x375   : > { %v2828_v30 = vadd.f32 %v7799_v6, %v9220_v3  ;;  %v2833_v29 = vadd.f32 %v7799_v6, %v9222_v45 }
 0x376   : > { %v3311_v22 = vsel %vm2092_vm6, %v3308_v7, %v3310_v12  ;;  %v3093_v38 = vadd.f32 %v8089_v47, %v3004_v11  ;;  %v2921_v35 = vpop.f32.mrf.mxu1  ;;  %v3564_v11 = vrot.slane %v8110_v25, 2 }
 0x377   : > { %v3385_v63 = vmax.f32 %v3225_v28, %v3311_v22  ;;  %v3178_v20 = vpop.f32.mrf.mxu0  ;;  %v5583_v28 = vld [vmem:[%s9138_s5] sm:$0xf]  ;;  %v2917_v13 = vadd.f32 %v8091_v14, %v2828_v30 }
 0x378   : > { %v3179_v9 = vadd.f32 %v3178_v20, %v3090_v50  ;;  %4508 = vmatpush.bf16.msrb.mxu2 %v5656_v34  ;;  %v5584_v26 = vor.u32 %v6284_v37, %v5583_v28  ;;  %v3099_v60 = vpop.f32.mrf.mxu3  ;;  %v9224_v50 = vld [vmem:[#allocation7_spill] sm:$0xff] }
 0x379   : > { %v8148_v31 = vmax.f32 %v8070_v44, %v3385_v63  ;;  %v6300_v44 = vld [vmem:[%s9138_s5 + $0x84] sm:$0xf0]  ;;  %v3006_v61 = vadd.f32 %v3005_v0, %v2917_v13  ;;  %v8181_v41 = vadd.f32 %v7799_v6, %v9224_v50  ;;  %v6491_v63 = vunpack.i.l.bf16 %v6490_v58  ;;  %v5743_v30 = vld [vmem:[%s9138_s5 + $0x140] sm:$0xf] }
 0x37a   : > { %v3227_v39 = vmax.f32 %v3179_v9, 0.0  ;;  %v5648_v7 = vor.u32 %v6300_v44, %v5647_v49  ;;  %4496 = vmatpush.bf16.msra.mxu1 %v5584_v26  ;;  %v6505_v20 = vpop.permute.xlu2 %6504 }
 0x37b   : > { %v3095_v36 = vadd.f32 %v3094_v54, %v3006_v61  ;;  %v2836_v54 = vadd.f32 %v7799_v6, %v9223_v52  ;;  %v6507_v26 = vunpack.i.h.bf16 %v6505_v20 }
 0x37c   : > { %v3312_v40 = vrot.slane %v3227_v39, 1  ;;  %v3008_v56 = vpop.f32.mrf.mxu2  ;;  %4509 = vmatpush.bf16.msrb.mxu2 %v5648_v7 }
 0x37d   : > { %v3009_v18 = vadd.f32 %v3008_v56, %v2920_v23 }
 0x37e   : > { %v3313_v32 = vsel %vm2092_vm6, %v3310_v12, %v3312_v40  ;;  %v2924_v22 = vpop.f32.mrf.mxu1 }
 0x37f   : > { %v3386_v59 = vmax.f32 %v3226_v57, %v3313_v32  ;;  %v3181_v16 = vpop.f32.mrf.mxu0  ;;  %v3098_v6 = vadd.f32 %v3097_v42, %v3009_v18  ;;  %v6324_v32 = vld [vmem:[%s9138_s5 + $0x144] sm:$0xf0] }
 0x380   : > { %v3182_v2 = vadd.f32 %v3181_v16, %v3093_v38  ;;  %v5744_v62 = vor.u32 %v6324_v32, %v5743_v30  ;;  %v5823_v30 = vld [vmem:[%s9138_s5 + $0x1e0] sm:$0xf]  ;;  %v6344_v32 = vld [vmem:[%s9138_s5 + $0x1e4] sm:$0xf0] }
 0x382   : > { %v3228_v51 = vmax.f32 %v3182_v2, 0.0  ;;  %4518 = vmatpush.bf16.msrb.mxu3 %v5744_v62 }
 0x384   : > { %v3314_v5 = vrot.slane %v3228_v51, 1  ;;  %v3010_v27 = vpop.f32.mrf.mxu2 }
 0x386   : > { %v3315_v15 = vsel %vm2092_vm6, %v3312_v40, %v3314_v5  ;;  %v6506_v40 = vunpack.i.l.bf16 %v6505_v20 }
 0x387   : > { %v8170_v47 = vmax.f32 %v3227_v39, %v3315_v15  ;;  %v3183_v57 = vpop.f32.mrf.mxu0  ;;  %v2922_v39 = vadd.f32 %v2921_v35, %v2833_v29  ;;  %v2926_v15 = vpop.f32.mrf.mxu1 }
 0x388   : > { %v8172_v33 = vadd.f32 %v3183_v57, %v3095_v36  ;;  %v6495_v10 = vpop.permute.xlu0 %6494 }
 0x389   : > { %v6485_v14 = vpop.permute.xlu1 %6484  ;;  %v6497_v49 = vunpack.i.h.bf16 %v6495_v10  ;;  %v3011_v56 = vadd.f32 %v3010_v27, %v2922_v39  ;;  %v6496_v38 = vunpack.i.l.bf16 %v6495_v10 }
 0x38a   : > { %v3229_v19 = vmax.f32 %v8172_v33, 0.0  ;;  %v6487_v12 = vunpack.i.h.bf16 %v6485_v14  ;;  %v6486_v0 = vunpack.i.l.bf16 %v6485_v14 }
 0x38b   : > { %v3100_v23 = vadd.f32 %v3099_v60, %v3011_v56  ;;  %v3584_v60 = vrot.slane %v8148_v31, 4 }
 0x38c   : > { %v3316_v53 = vrot.slane %v3229_v19, 1  ;;  %v3484_v24 = vsel %vm3472_vm7, %v7885_v1, %v6487_v12  ;;  %v3013_v48 = vpop.f32.mrf.mxu2  ;;  %v3473_v34 = vsel %vm3472_vm7, %v7838_v8, %v6486_v0  ;;  %v2925_v0 = vadd.f32 %v2924_v22, %v2836_v54 }
 0x38d   : > { %v3485_v1 = vsel %vm513_vm0, %v3484_v24, %v6492_v43  ;;  %v3474_v8 = vsel %vm513_vm0, %v3473_v34, %v6491_v63 }
 0x38e   : > { %v3317_v9 = vsel %vm2092_vm6, %v3314_v5, %v3316_v53  ;;  %v3486_v13 = vsel %vm3475_vm8, %v3485_v1, %v6497_v49  ;;  %v3476_v27 = vsel %vm3475_vm8, %v3474_v8, %v6496_v38  ;;  %v3014_v63 = vadd.f32 %v3013_v48, %v2925_v0 }
 0x38f   : > { %v3388_v28 = vmax.f32 %v3228_v51, %v3317_v9  ;;  %v3186_v37 = vpop.f32.mrf.mxu0  ;;  %v3102_v51 = vpop.f32.mrf.mxu3  ;;  %v3588_v49 = vrot.slane %v8148_v31, 6 }
 0x390   : > { %v8192_v44 = vadd.f32 %v3186_v37, %v3098_v6  ;;  %v3103_v8 = vadd.f32 %v3102_v51, %v3014_v63  ;;  %v2927_v51 = vadd.f32 %v2926_v15, %v8181_v41  ;;  %v5807_v15 = vld [vmem:[%s9138_s5 + $0x1c0] sm:$0xf] }
 0x391   : > { %v8194_v7 = vmax.f32 %v3386_v59, %v3388_v28  ;;  %v6500_v3 = vpop.permute.xlu1 %6499  ;;  %v6510_v5 = vpop.permute.xlu0 %6509 }
 0x392   : > { %v3230_v16 = vmax.f32 %v8192_v44, 0.0  ;;  %v6502_v42 = vunpack.i.h.bf16 %v6500_v3  ;;  %v6501_v2 = vunpack.i.l.bf16 %v6500_v3  ;;  %v6512_v29 = vunpack.i.h.bf16 %v6510_v5  ;;  %v5815_v44 = vld [vmem:[%s9138_s5 + $0x1d0] sm:$0xf] }
 0x393   : > { %v3601_v59 = vrot.slane %v8194_v7, 6  ;;  %v3597_v35 = vrot.slane %v8194_v7, 4  ;;  %v3593_v61 = vrot.slane %v8194_v7, 2  ;;  %v6511_v52 = vunpack.i.l.bf16 %v6510_v5 }
 0x394   : > { %v3318_v58 = vrot.slane %v3230_v16, 1  ;;  %v3487_v21 = vsel %vm2256_vm5, %v3486_v13, %v6502_v42  ;;  %v3477_v36 = vsel %vm2256_vm5, %v3476_v27, %v6501_v2  ;;  %v3015_v50 = vpop.f32.mrf.mxu2  ;;  %v5824_v2 = vor.u32 %v6344_v32, %v5823_v30  ;;  %v5719_v32 = vld [vmem:[%s9138_s5 + $0x110] sm:$0xf] }
 0x395   : > { %v3488_v57 = vsel %vm3478_vm9, %v3487_v21, %v6507_v26  ;;  %v6563_v33 = vpack.i.bf16 %v3601_v59, %v3572_v17  ;;  %v3479_v18 = vsel %vm3478_vm9, %v3477_v36, %v6506_v40  ;;  %v6558_v10 = vpack.i.bf16 %v3597_v35, %v3568_v46  ;;  %v5831_v17 = vld [vmem:[%s9138_s5 + $0x1f0] sm:$0xf]  ;;  %v6346_v46 = vld [vmem:[%s9138_s5 + $0x1f4] sm:$0xf0]  ;;  %v2929_v59 = vpop.f32.mrf.mxu1  ;;  %v6340_v36 = vld [vmem:[%s9138_s5 + $0x1c4] sm:$0xf0] }
 0x396   : > { %v3319_v14 = vsel %vm2092_vm6, %v3316_v53, %v3318_v58  ;;  %v6553_v12 = vpack.i.bf16 %v3593_v61, %v3564_v11  ;;  %v3580_v53 = vrot.slane %v8148_v31, 2  ;;  %v3481_v22 = vsel %vm3480_vm10, %v3479_v18, %v6511_v52 }
 0x397   : > { %v3389_v45 = vmax.f32 %v3229_v19, %v3319_v14  ;;  %v3188_v24 = vpop.f32.mrf.mxu0  ;;  %6564 = vrot.lane.b32.xlu2 %v6563_v33, %s9225_s22  ;;  %6559 = vrot.lane.b32.xlu1 %v6558_v10, %s9226_s25  ;;  %v3489_v20 = vsel %vm3480_vm10, %v3488_v57, %v6512_v29  ;;  %v5832_v48 = vor.u32 %v6346_v46, %v5831_v17  ;;  %v3104_v38 = vpop.f32.mrf.mxu3  ;;  %v8271_v57 = vld [vmem:[%s9137_s4] ss:$0 sm:$0xff] }
 0x398   : > { %v8217_v43 = vadd.f32 %v3188_v24, %v3100_v23  ;;  %6554 = vrot.lane.b32.xlu0 %v6553_v12, %s9211_s15  ;;  %v3016_v27 = vadd.f32 %v3015_v50, %v2927_v51  ;;  %v9227_v23 = vld [vmem:[#allocation8_spill] sm:$0xff]  ;;  %v5808_v10 = vor.u32 %v6340_v36, %v5807_v15  ;;  %v5727_v46 = vld [vmem:[%s9138_s5 + $0x120] sm:$0xf] }
 0x399   : > { %v3409_v19 = vmax.f32 %v8170_v47, %v3389_v45  ;;  %v6515_v54 = vpop.permute.xlu1 %6514  ;;  %4528 = vmatpush.bf16.msrb.mxu1 %v5832_v48  ;;  %v2841_v33 = vadd.f32 %v8271_v57, %v9227_v23  ;;  %v5735_v24 = vld [vmem:[%s9138_s5 + $0x130] sm:$0xf]  ;;  %v6332_v36 = vld [vmem:[%s9138_s5 + $0x184] sm:$0xf0] }
 0x39a   : > { %v3231_v9 = vmax.f32 %v8217_v43, 0.0  ;;  %v6517_v34 = vunpack.i.h.bf16 %v6515_v54  ;;  %v6516_v6 = vunpack.i.l.bf16 %v6515_v54  ;;  %v3105_v18 = vadd.f32 %v3104_v38, %v3016_v27  ;;  %v6322_v43 = vld [vmem:[%s9138_s5 + $0x134] sm:$0xf0] }
 0x39b   : > { %v6568_v47 = vpack.i.bf16 %v3409_v19, %v8148_v31  ;;  %v3613_v11 = vrot.slane %v3409_v19, 4  ;;  %v3609_v39 = vrot.slane %v3409_v19, 2  ;;  %v3617_v28 = vrot.slane %v3409_v19, 6  ;;  %v6338_v54 = vld [vmem:[%s9138_s5 + $0x1b4] sm:$0xf0] }
 0x39c   : > { %v3320_v1 = vrot.slane %v3231_v9, 1  ;;  %v3483_v37 = vsel %vm3482_vm11, %v3481_v22, %v6516_v6  ;;  %v3490_v26 = vsel %vm3482_vm11, %v3489_v20, %v6517_v34  ;;  %v2930_v29 = vadd.f32 %v2929_v59, %v2841_v33  ;;  %v5791_v34 = vld [vmem:[%s9138_s5 + $0x1a0] sm:$0xf]  ;;  %v9228_v6 = vld [vmem:[#allocation24_spill] sm:$0xff]  ;;  %v6318_v38 = vld [vmem:[%s9138_s5 + $0x114] sm:$0xf0] }
 0x39d   : > { %v8237_v40 = vpack.c.bf16 %v3483_v37, %v3483_v37  ;;  %v8239_v56 = vpack.c.bf16 %v3490_v26, %v3490_v26  ;;  %v6578_v3 = vpack.i.bf16 %v3613_v11, %v3584_v60  ;;  %v6573_v13 = vpack.i.bf16 %v3609_v39, %v3580_v53  ;;  %4529 = vmatpush.bf16.msrb.mxu1 %v5824_v2  ;;  %v2931_v50 = vpop.f32.mrf.mxu1  ;;  %v5799_v60 = vld [vmem:[%s9138_s5 + $0x1b0] sm:$0xf]  ;;  %v6334_v59 = vld [vmem:[%s9138_s5 + $0x194] sm:$0xf0] }
 0x39e   : > { %v3321_v42 = vsel %vm2092_vm6, %v3318_v58, %v3320_v1  ;;  %v6583_v31 = vpack.i.bf16 %v3617_v28, %v3588_v49  ;;  %v3018_v58 = vpop.f32.mrf.mxu2  ;;  %v5736_v19 = vor.u32 %v6322_v43, %v5735_v24  ;;  %v5800_v20 = vor.u32 %v6338_v54, %v5799_v60  ;;  %v6336_v28 = vld [vmem:[%s9138_s5 + $0x1a4] sm:$0xf0]  ;;  %v9229_v27 = vld [vmem:[#allocation9_spill] sm:$0xff] }
 0x39f   : > { %v3390_v35 = vmax.f32 %v3230_v16, %v3321_v42  ;;  %v3191_v61 = vpop.f32.mrf.mxu0  ;;  %6579 = vrot.lane.b32.xlu2 %v6578_v3, %s9213_s14  ;;  %4497 = vmatmul.bf16.vlgmr.msra.gmra.mxu1 %v8237_v40  ;;  %v6342_v16 = vld [vmem:[%s9138_s5 + $0x1d4] sm:$0xf0]  ;;  %v3107_v12 = vpop.f32.mrf.mxu3  ;;  %v3019_v53 = vadd.f32 %v3018_v58, %v2930_v29  ;;  %v2843_v48 = vadd.f32 %v8271_v57, %v9228_v6  ;;  %v5783_v42 = vld [vmem:[%s9138_s5 + $0x190] sm:$0xf]  ;;  %v5711_v58 = vld [vmem:[%s9138_s5 + $0x100] sm:$0xf] }
 0x3a0   : > { %v3192_v5 = vadd.f32 %v3191_v61, %v3103_v8  ;;  %6569 = vrot.lane.b32.xlu0 %v6568_v47, %s9215_s16  ;;  %6574 = vrot.lane.b32.xlu1 %v6573_v13, %s9214_s24  ;;  %v5816_v41 = vor.u32 %v6342_v16, %v5815_v44  ;;  %v5792_v26 = vor.u32 %v6336_v28, %v5791_v34  ;;  %v6316_v44 = vld [vmem:[%s9138_s5 + $0x104] sm:$0xf0]  ;;  %v5775_v16 = vld [vmem:[%s9138_s5 + $0x180] sm:$0xf]  ;;  %v9230_v60 = vld [vmem:[#allocation25_spill] sm:$0xff] }
 0x3a1   : > { %4510 = vmatmul.bf16.vlgmr.msrb.gmra.mxu2 %v8239_v56  ;;  %4519 = vmatpush.bf16.msrb.mxu3 %v5736_v19  ;;  %v3108_v11 = vadd.f32 %v3107_v12, %v3019_v53  ;;  %v2932_v49 = vadd.f32 %v2931_v50, %v2843_v48  ;;  %v5720_v2 = vor.u32 %v6318_v38, %v5719_v32  ;;  %v5959_v48 = vld [vmem:[%s9138_s5 + $0x2f0] sm:$0xf] }
 0x3a2   : > { %v3232_v21 = vmax.f32 %v3192_v5, 0.0  ;;  %4530 = vmatpush.bf16.msrb.mxu1 %v5816_v41  ;;  %v5784_v61 = vor.u32 %v6334_v59, %v5783_v42  ;;  %v5712_v15 = vor.u32 %v6316_v44, %v5711_v58  ;;  %v2848_v53 = vadd.f32 %v8271_v57, %v9230_v60  ;;  %v5943_v42 = vld [vmem:[%s9138_s5 + $0x2d0] sm:$0xf] }
 0x3a4   : > { %v3322_v62 = vrot.slane %v3232_v21, 1 }
 0x3a6   : > { %v3323_v14 = vsel %vm2092_vm6, %v3320_v1, %v3322_v62  ;;  %4531 = vmatpush.bf16.msrb.mxu1 %v5808_v10  ;;  %v3020_v22 = vpop.f32.mrf.mxu2 }
 0x3a7   : > { %v8276_v0 = vmax.f32 %v3231_v9, %v3323_v14  ;;  %v3193_v45 = vpop.f32.mrf.mxu0  ;;  %v6320_v9 = vld [vmem:[%s9138_s5 + $0x124] sm:$0xf0]  ;;  %v3109_v3 = vpop.f32.mrf.mxu3  ;;  %v3021_v13 = vadd.f32 %v3020_v22, %v2932_v49  ;;  %v5776_v14 = vor.u32 %v6332_v36, %v5775_v16  ;;  %v5951_v49 = vld [vmem:[%s9138_s5 + $0x2e0] sm:$0xf] }
 0x3a8   : > { %v3194_v52 = vadd.f32 %v3193_v45, %v3105_v18  ;;  %6584 = vrot.lane.b32.xlu0 %v6583_v31, %s9217_s29  ;;  %v5728_v39 = vor.u32 %v6320_v9, %v5727_v46 }
 0x3aa   : > { %v3233_v63 = vmax.f32 %v3194_v52, 0.0  ;;  %4532 = vmatpush.bf16.msrb.mxu1 %v5800_v20  ;;  %4520 = vmatpush.bf16.msrb.mxu3 %v5728_v39 }
 0x3ac   : > { %v3324_v17 = vrot.slane %v3233_v63, 1 }
 0x3ae   : > { %v3325_v47 = vsel %vm2092_vm6, %v3322_v62, %v3324_v17  ;;  %4533 = vmatpush.bf16.msrb.mxu1 %v5792_v26  ;;  %4521 = vmatpush.bf16.msrb.mxu3 %v5720_v2  ;;  %v3023_v5 = vpop.f32.mrf.mxu2  ;;  %v3110_v62 = vadd.f32 %v3109_v3, %v3021_v13  ;;  %v6374_v13 = vld [vmem:[%s9138_s5 + $0x2d4] sm:$0xf0] }
 0x3af   : > { %v3392_v1 = vmax.f32 %v3232_v21, %v3325_v47  ;;  %v3196_v37 = vpop.f32.mrf.mxu0  ;;  %v2846_v21 = vadd.f32 %v8271_v57, %v9229_v27  ;;  %v3112_v50 = vpop.f32.mrf.mxu3  ;;  %v6378_v57 = vld [vmem:[%s9138_s5 + $0x2f4] sm:$0xf0]  ;;  %v5944_v58 = vor.u32 %v6374_v13, %v5943_v42 }
 0x3b0   : > { %v3197_v8 = vadd.f32 %v3196_v37, %v3108_v11  ;;  %v5960_v11 = vor.u32 %v6378_v57, %v5959_v48 }
 0x3b1   : > { %v8306_v30 = vmax.f32 %v3390_v35, %v3392_v1  ;;  %v2934_v35 = vpop.f32.mrf.mxu1 }
 0x3b2   : > { %v3234_v31 = vmax.f32 %v3197_v8, 0.0  ;;  %4534 = vmatpush.bf16.msrb.mxu1 %v5784_v61  ;;  %v2935_v18 = vadd.f32 %v2934_v35, %v2846_v21  ;;  %4522 = vmatpush.bf16.msrb.mxu3 %v5712_v15  ;;  %v6520_v29 = vpop.permute.xlu2 %6519  ;;  %v6376_v8 = vld [vmem:[%s9138_s5 + $0x2e4] sm:$0xf0] }
 0x3b3   : > { %v6521_v1 = vunpack.i.l.bf16 %v6520_v29  ;;  %v6522_v3 = vunpack.i.h.bf16 %v6520_v29  ;;  %v5952_v38 = vor.u32 %v6376_v8, %v5951_v49 }
 0x3b4   : > { %v3326_v51 = vrot.slane %v3234_v31, 1  ;;  %v3024_v45 = vadd.f32 %v3023_v5, %v2935_v18  ;;  %v3644_v18 = vrot.slane %v8306_v30, 6 }
 0x3b5   : > { %v3556_v44 = vsel %vm3472_vm7, %v8011_v4, %v6522_v3 }
 0x3b6   : > { %v3327_v41 = vsel %vm2092_vm6, %v3324_v17, %v3326_v51  ;;  %4535 = vmatpush.bf16.msrb.mxu1 %v5776_v14  ;;  %v3113_v19 = vadd.f32 %v3112_v50, %v3024_v45  ;;  %v3025_v54 = vpop.f32.mrf.mxu2  ;;  %4554 = vmatpush.bf16.msra.mxu3 %v5960_v11  ;;  %v3640_v50 = vrot.slane %v8306_v30, 4  ;;  %v5927_v11 = vld [vmem:[%s9138_s5 + $0x2b0] sm:$0xf] }
 0x3b7   : > { %v3393_v23 = vmax.f32 %v3233_v63, %v3327_v41  ;;  %v3198_v33 = vpop.f32.mrf.mxu0  ;;  %v3114_v47 = vpop.f32.mrf.mxu3  ;;  %v5935_v41 = vld [vmem:[%s9138_s5 + $0x2c0] sm:$0xf] }
 0x3b8   : > { %v3199_v10 = vadd.f32 %v3198_v33, %v3110_v62  ;;  %v6372_v62 = vld [vmem:[%s9138_s5 + $0x2c4] sm:$0xf0] }
 0x3b9   : > { %v8336_v12 = vmax.f32 %v8276_v0, %v3393_v23  ;;  %v2936_v43 = vpop.f32.mrf.mxu1 }
 0x3ba   : > { %v3235_v52 = vmax.f32 %v3199_v10, 0.0  ;;  %v2937_v17 = vadd.f32 %v2936_v43, %v2848_v53  ;;  %v6535_v34 = vpop.permute.xlu2 %6534  ;;  %4555 = vmatpush.bf16.msra.mxu3 %v5952_v38  ;;  %v5936_v10 = vor.u32 %v6372_v62, %v5935_v41  ;;  %v6360_v41 = vld [vmem:[%s9138_s5 + $0x264] sm:$0xf0] }
 0x3bb   : > { %v6536_v33 = vunpack.i.l.bf16 %v6535_v34  ;;  %v6537_v45 = vunpack.i.h.bf16 %v6535_v34 }
 0x3bc   : > { %v3328_v24 = vrot.slane %v3235_v52, 1  ;;  %v3026_v0 = vadd.f32 %v3025_v54, %v2937_v17 }
 0x3be   : > { %v3329_v63 = vsel %vm2092_vm6, %v3326_v51, %v3328_v24  ;;  %v3115_v28 = vadd.f32 %v3114_v47, %v3026_v0  ;;  %v3549_v51 = vsel %vm3472_vm7, %v7954_v55, %v6521_v1  ;;  %4556 = vmatpush.bf16.msra.mxu3 %v5944_v58  ;;  %v6366_v58 = vld [vmem:[%s9138_s5 + $0x294] sm:$0xf0] }
 0x3bf   : > { %v3394_v22 = vmax.f32 %v3234_v31, %v3329_v63  ;;  %v3201_v20 = vpop.f32.mrf.mxu0 }
 0x3c0   : > { %v3202_v46 = vadd.f32 %v3201_v20, %v3113_v19  ;;  %v3652_v19 = vrot.slane %v8336_v12, 2 }
 0x3c2   : > { %v3236_v9 = vmax.f32 %v3202_v46, 0.0  ;;  %v6550_v15 = vpop.permute.xlu2 %6549  ;;  %4557 = vmatpush.bf16.msra.mxu3 %v5936_v10 }
 0x3c4   : > { %v3330_v6 = vrot.slane %v3236_v9, 1 }
 0x3c6   : > { %v3331_v39 = vsel %vm2092_vm6, %v3328_v24, %v3330_v6  ;;  %v6552_v24 = vunpack.i.h.bf16 %v6550_v15 }
 0x3c7   : > { %v3203_v37 = vpop.f32.mrf.mxu0  ;;  %v3395_v26 = vmax.f32 %v3235_v52, %v3331_v39  ;;  %v6370_v39 = vld [vmem:[%s9138_s5 + $0x2b4] sm:$0xf0] }
 0x3c8   : > { %v3204_v32 = vadd.f32 %v3203_v37, %v3115_v28  ;;  %v5928_v13 = vor.u32 %v6370_v39, %v5927_v11  ;;  %v5855_v11 = vld [vmem:[%s9138_s5 + $0x220] sm:$0xf]  ;;  %v6352_v39 = vld [vmem:[%s9138_s5 + $0x224] sm:$0xf0] }
 0x3c9   : > { %v6525_v31 = vpop.permute.xlu0 %6524  ;;  %v6530_v2 = vpop.permute.xlu1 %6529 }
 0x3ca   : > { %v3237_v59 = vmax.f32 %v3204_v32, 0.0  ;;  %v6527_v35 = vunpack.i.h.bf16 %v6525_v31  ;;  %v6526_v61 = vunpack.i.l.bf16 %v6525_v31  ;;  %v6531_v5 = vunpack.i.l.bf16 %v6530_v2  ;;  %v5919_v31 = vld [vmem:[%s9138_s5 + $0x2a0] sm:$0xf]  ;;  %4558 = vmatpush.bf16.msra.mxu3 %v5928_v13  ;;  %v5593_v13 = vld [vmem:[%s9138_s5 + $0x18] sm:$0xf0] }
 0x3cb   : > { %v6532_v21 = vunpack.i.h.bf16 %v6530_v2  ;;  %v6368_v2 = vld [vmem:[%s9138_s5 + $0x2a4] sm:$0xf0] }
 0x3cc   : > { %v3332_v16 = vrot.slane %v3237_v59, 1  ;;  %v3550_v27 = vsel %vm513_vm0, %v3549_v51, %v6526_v61  ;;  %v3557_v55 = vsel %vm513_vm0, %v3556_v44, %v6527_v35  ;;  %v5920_v35 = vor.u32 %v6368_v2, %v5919_v31  ;;  %v5895_v61 = vld [vmem:[%s9138_s5 + $0x270] sm:$0xf]  ;;  %v6362_v44 = vld [vmem:[%s9138_s5 + $0x274] sm:$0xf0] }
 0x3cd   : > { %v3551_v4 = vsel %vm3475_vm8, %v3550_v27, %v6531_v5  ;;  %v3558_v52 = vsel %vm3475_vm8, %v3557_v55, %v6532_v21  ;;  %v5911_v5 = vld [vmem:[%s9138_s5 + $0x290] sm:$0xf]  ;;  %v5887_v27 = vld [vmem:[%s9138_s5 + $0x260] sm:$0xf]  ;;  %v3656_v21 = vrot.slane %v8336_v12, 4 }
 0x3ce   : > { %v3333_v36 = vsel %vm2092_vm6, %v3330_v6, %v3332_v16  ;;  %v3397_v23 = vmax.f32 %v3237_v59, %v3332_v16  ;;  %v3552_v53 = vsel %vm2256_vm5, %v3551_v4, %v6536_v33  ;;  %v3559_v0 = vsel %vm2256_vm5, %v3558_v52, %v6537_v45  ;;  %4559 = vmatpush.bf16.msra.mxu3 %v5920_v35  ;;  %v5903_v55 = vld [vmem:[%s9138_s5 + $0x280] sm:$0xf]  ;;  %v6358_v4 = vld [vmem:[%s9138_s5 + $0x254] sm:$0xf0]  ;;  %v6297_v33 = vld [vmem:[%s9138_s5 + $0x74] sm:$0xf] }
 0x3cf   : > { %v3396_v14 = vmax.f32 %v3236_v9, %v3333_v36  ;;  %v6551_v6 = vunpack.i.l.bf16 %v6550_v15  ;;  %v3636_v59 = vrot.slane %v8306_v30, 2  ;;  %v5896_v16 = vor.u32 %v6362_v44, %v5895_v61  ;;  %v6364_v15 = vld [vmem:[%s9138_s5 + $0x284] sm:$0xf0]  ;;  %v5839_v2 = vld [vmem:[%s9138_s5 + $0x200] sm:$0xf] }
 0x3d0   : > { %v8375_v29 = vmax.f32 %v3395_v26, %v3397_v23  ;;  %v5912_v62 = vor.u32 %v6366_v58, %v5911_v5  ;;  %v5888_v36 = vor.u32 %v6360_v41, %v5887_v27  ;;  %v5879_v23 = vld [vmem:[%s9138_s5 + $0x250] sm:$0xf]  ;;  %v3660_v45 = vrot.slane %v8336_v12, 6  ;;  %v6283_v61 = vld [vmem:[%s9138_s5 + $0x4] sm:$0xf] }
 0x3d1   : > { %v8379_v43 = vmax.f32 %v3394_v22, %v3396_v14  ;;  %v6540_v60 = vpop.permute.xlu0 %6539  ;;  %v6545_v63 = vpop.permute.xlu1 %6544  ;;  %4541 = vmatpush.bf16.msra.mxu2 %v5896_v16  ;;  %v5641_v14 = vld [vmem:[%s9138_s5 + $0x78] sm:$0xf0]  ;;  %v5880_v10 = vor.u32 %v6358_v4, %v5879_v23  ;;  %v6023_v58 = vld [vmem:[%s9138_s5 + $0x370] sm:$0xf]  ;;  %v6394_v44 = vld [vmem:[%s9138_s5 + $0x374] sm:$0xf0] }
 0x3d2   : > { %v6542_v54 = vunpack.i.h.bf16 %v6540_v60  ;;  %v6541_v20 = vunpack.i.l.bf16 %v6540_v60  ;;  %v6547_v17 = vunpack.i.h.bf16 %v6545_v63  ;;  %v6546_v46 = vunpack.i.l.bf16 %v6545_v63  ;;  %4560 = vmatpush.bf16.msra.mxu3 %v5912_v62  ;;  %v6295_v60 = vld [vmem:[%s9138_s5 + $0x64] sm:$0xf]  ;;  %v5625_v63 = vld [vmem:[%s9138_s5 + $0x58] sm:$0xf0]  ;;  %v6015_v27 = vld [vmem:[%s9138_s5 + $0x360] sm:$0xf] }
 0x3d3   : > { %v6588_v9 = vpack.i.bf16 %v8375_v29, %v8336_v12  ;;  %v3673_v34 = vrot.slane %v8379_v43, 6  ;;  %v3669_v22 = vrot.slane %v8379_v43, 4  ;;  %v3681_v47 = vrot.slane %v8375_v29, 2  ;;  %v6087_v41 = vld [vmem:[%s9138_s5 + $0x3f0] sm:$0xf] }
 0x3d4   : > { %v3553_v48 = vsel %vm3478_vm9, %v3552_v53, %v6541_v20  ;;  %v3560_v57 = vsel %vm3478_vm9, %v3559_v0, %v6542_v54  ;;  %v3665_v42 = vrot.slane %v8379_v43, 2  ;;  %v5644_v52 = vor.u32 %v6297_v33, %v5641_v14  ;;  %v5633_v53 = vld [vmem:[%s9138_s5 + $0x68] sm:$0xf0]  ;;  %v5871_v54 = vld [vmem:[%s9138_s5 + $0x240] sm:$0xf] }
 0x3d5   : > { %v3554_v28 = vsel %vm3480_vm10, %v3553_v48, %v6546_v46  ;;  %v3561_v1 = vsel %vm3480_vm10, %v3560_v57, %v6547_v17  ;;  %6589 = vrot.lane.b32.xlu1 %v6588_v9, %s9215_s16  ;;  %v6608_v37 = vpack.i.bf16 %v3673_v34, %v3644_v18  ;;  %v6598_v26 = vpack.i.bf16 %v3669_v22, %v3640_v50  ;;  %v6356_v20 = vld [vmem:[%s9138_s5 + $0x244] sm:$0xf0]  ;;  %v6291_v17 = vld [vmem:[%s9138_s5 + $0x44] sm:$0xf]  ;;  %v5617_v0 = vld [vmem:[%s9138_s5 + $0x48] sm:$0xf0] }
 0x3d6   : > { %v3555_v49 = vsel %vm3482_vm11, %v3554_v28, %v6551_v6  ;;  %v3562_v8 = vsel %vm3482_vm11, %v3561_v1, %v6552_v24  ;;  %v6603_v3 = vpack.i.bf16 %v3681_v47, %v3652_v19  ;;  %v6593_v51 = vpack.i.bf16 %v3665_v42, %v3636_v59  ;;  %4542 = vmatpush.bf16.msra.mxu2 %v5888_v36  ;;  %v5863_v9 = vld [vmem:[%s9138_s5 + $0x230] sm:$0xf]  ;;  %v6354_v34 = vld [vmem:[%s9138_s5 + $0x234] sm:$0xf0]  ;;  %v6289_v48 = vld [vmem:[%s9138_s5 + $0x34] sm:$0xf] }
 0x3d7   : > { %v8402_v32 = vpack.c.bf16 %v3555_v49, %v3555_v49  ;;  %v8404_v38 = vpack.c.bf16 %v3562_v8, %v3562_v8  ;;  %6609 = vrot.lane.b32.xlu0 %v6608_v37, %s9225_s22  ;;  %6599 = vrot.lane.b32.xlu2 %v6598_v26, %s9226_s25  ;;  %v5904_v18 = vor.u32 %v6364_v15, %v5903_v55  ;;  %v3689_v50 = vrot.slane %v8375_v29, 6  ;;  %v5609_v57 = vld [vmem:[%s9138_s5 + $0x38] sm:$0xf0]  ;;  %v6287_v28 = vld [vmem:[%s9138_s5 + $0x24] sm:$0xf]  ;;  %s4932_s25 = scalar_lea.hbm %s9144_s11, %s6770_s21 }
 0x3d8   : > { %v3685_v24 = vrot.slane %v8375_v29, 4  ;;  %v5636_v12 = vor.u32 %v6295_v60, %v5633_v53  ;;  %v6293_v29 = vld [vmem:[%s9138_s5 + $0x54] sm:$0xf]  ;;  %v5872_v46 = vor.u32 %v6356_v20, %v5871_v54  ;;  %v5620_v22 = vor.u32 %v6291_v17, %v5617_v0  ;;  %v5601_v37 = vld [vmem:[%s9138_s5 + $0x28] sm:$0xf0]  ;;  %s4936_s1 = sshll.u32 %s4932_s25, 4  ;;  %s4937_s1 = int_to_ptr.hbm [resolvable:$true] %s4936_s1 }
 0x3d9   : > { %4523 = vmatmul.bf16.vlgmr.msrb.gmra.mxu3 %v8402_v32  ;;  %4536 = vmatmul.bf16.vlgmr.msrb.gmra.mxu1 %v8404_v38  ;;  %v5628_v19 = vor.u32 %v6293_v29, %v5625_v63  ;;  %v5864_v6 = vor.u32 %v6354_v34, %v5863_v9  ;;  %v5612_v47 = vor.u32 %v6289_v48, %v5609_v57  ;;  %v5847_v26 = vld [vmem:[%s9138_s5 + $0x210] sm:$0xf]  ;;  %v6350_v49 = vld [vmem:[%s9138_s5 + $0x214] sm:$0xf0]  ;;  %v6285_v42 = vld [vmem:[%s9138_s5 + $0x14] sm:$0xf] }
 0x3da   : > { %4561 = vmatpush.bf16.msra.mxu3 %v5904_v18  ;;  %4543 = vmatpush.bf16.msra.mxu2 %v5880_v10  ;;  %v5856_v1 = vor.u32 %v6352_v39, %v5855_v11  ;;  %v5604_v8 = vor.u32 %v6287_v28, %v5601_v37  ;;  %v5596_v31 = vor.u32 %v6285_v42, %v5593_v13  ;;  %v6348_v59 = vld [vmem:[%s9138_s5 + $0x204] sm:$0xf0]  ;;  %v6410_v62 = vld [vmem:[%s9138_s5 + $0x3f4] sm:$0xf0]  ;;  %v6007_v36 = vld [vmem:[%s9138_s5 + $0x350] sm:$0xf] }
 0x3db   : > { %v5840_v35 = vor.u32 %v6348_v59, %v5839_v2  ;;  %v6024_v16 = vor.u32 %v6394_v44, %v6023_v58  ;;  %v6088_v15 = vor.u32 %v6410_v62, %v6087_v41  ;;  %v6390_v23 = vld [vmem:[%s9138_s5 + $0x354] sm:$0xf0]  ;;  %v6079_v4 = vld [vmem:[%s9138_s5 + $0x3e0] sm:$0xf]  ;;  %v6408_v10 = vld [vmem:[%s9138_s5 + $0x3e4] sm:$0xf0] }
 0x3dc   : > { %v6008_v18 = vor.u32 %v6390_v23, %v6007_v36  ;;  %v5999_v60 = vld [vmem:[%s9138_s5 + $0x340] sm:$0xf]  ;;  %v6388_v53 = vld [vmem:[%s9138_s5 + $0x344] sm:$0xf0]  ;;  %v6406_v54 = vld [vmem:[%s9138_s5 + $0x3d4] sm:$0xf0] }
 0x3dd   : > { %6594 = vrot.lane.b32.xlu1 %v6593_v51, %s9211_s15  ;;  %v5585_v51 = vld [vmem:[%s9138_s5 + $0x8] sm:$0xf0]  ;;  %4567 = vmatpush.bf16.msra.mxu1 %v6024_v16  ;;  %v5991_v0 = vld [vmem:[%s9138_s5 + $0x330] sm:$0xf]  ;;  %v6386_v9 = vld [vmem:[%s9138_s5 + $0x334] sm:$0xf0] }
 0x3de   : > { %4593 = vmatpush.bf16.msrb.mxu3 %v5644_v52  ;;  %4544 = vmatpush.bf16.msra.mxu2 %v5872_v46  ;;  %v5588_v5 = vor.u32 %v6283_v61, %v5585_v51  ;;  %v6063_v34 = vld [vmem:[%s9138_s5 + $0x3c0] sm:$0xf]  ;;  %v5992_v48 = vor.u32 %v6386_v9, %v5991_v0  ;;  %v6404_v57 = vld [vmem:[%s9138_s5 + $0x3c4] sm:$0xf0]  ;;  %v6055_v13 = vld [vmem:[%s9138_s5 + $0x3b0] sm:$0xf] }
 0x3df   : > { %3657 = vrot.lane.b32.xlu0 %v3656_v21, %s9213_s14  ;;  %6604 = vrot.lane.b32.xlu2 %v6603_v3, %s9214_s24  ;;  %v5848_v3 = vor.u32 %v6350_v49, %v5847_v26  ;;  %v6392_v21 = vld [vmem:[%s9138_s5 + $0x364] sm:$0xf0]  ;;  %v5975_v44 = vld [vmem:[%s9138_s5 + $0x310] sm:$0xf]  ;;  %s377_s24 = sand.u32 1, %s6671_s18   ;;  %s6631_s2 = sshra.s32 %s4937_s1, 4  ;;  %s6632_s2 = int_to_ptr.hbm [resolvable:$true] %s6631_s2 }
 0x3e0   : > { %v6016_v55 = vor.u32 %v6392_v21, %v6015_v27  ;;  %v6384_v42 = vld [vmem:[%s9138_s5 + $0x324] sm:$0xf0]  ;;  %v6382_v16 = vld [vmem:[%s9138_s5 + $0x314] sm:$0xf0]  ;;  %v6047_v27 = vld [vmem:[%s9138_s5 + $0x3a0] sm:$0xf]  ;;  %p6638_p0 = scmp.lt.s32.totalorder %s6632_s2, %s9144_s11 }
 0x3e1   : > { %v5976_v36 = vor.u32 %v6382_v16, %v5975_v44  ;;  %v6400_v23 = vld [vmem:[%s9138_s5 + $0x3a4] sm:$0xf0]  ;;  %s378_s15 = scalar_lea.vmem [#allocation2], %s377_s24  ;;  %s4924_s13 = scalar_lea.sflag [#allocation3], %s377_s24 }
 0x3e2   : > { %4594 = vmatpush.bf16.msrb.mxu3 %v5636_v12  ;;  %4545 = vmatpush.bf16.msra.mxu2 %v5864_v6  ;;  %v6071_v12 = vld [vmem:[%s9138_s5 + $0x3d0] sm:$0xf]  ;;  %s4934_s0 = sshll.u32 %s378_s15, 4  ;;  %s4935_s0 = int_to_ptr.vmem [resolvable:$true] %s4934_s0 }
 0x3e3   : > { %4568 = vmatpush.bf16.msra.mxu1 %v6016_v55  ;;  %v6072_v46 = vor.u32 %v6406_v54, %v6071_v12  ;;  %v6345_v55 = vld [vmem:[%s9138_s5 + $0x1f4] sm:$0xf]  ;;  %v6380_v12 = vld [vmem:[%s9138_s5 + $0x304] sm:$0xf0]  ;;  %v6343_v54 = vld [vmem:[%s9138_s5 + $0x1e4] sm:$0xf] }
 0x3e5   : > { %3661 = vrot.lane.b32.xlu1 %v3660_v45, %s9217_s29 }
 0x3e6   : > { %4595 = vmatpush.bf16.msrb.mxu3 %v5628_v19  ;;  %4546 = vmatpush.bf16.msra.mxu2 %v5856_v1  ;;  %v6000_v19 = vor.u32 %v6388_v53, %v5999_v60  ;;  %v6064_v1 = vor.u32 %v6404_v57, %v6063_v34  ;;  %v5967_v53 = vld [vmem:[%s9138_s5 + $0x300] sm:$0xf]  ;;  %v6313_v34 = vld [vmem:[%s9138_s5 + $0xf4] sm:$0xf] }
 0x3e7   : > { %3690 = vrot.lane.b32.xlu0 %v3689_v50, %s9217_s29  ;;  %3686 = vrot.lane.b32.xlu2 %v3685_v24, %s9213_s14  ;;  %v6080_v50 = vor.u32 %v6408_v10, %v6079_v4  ;;  %v6341_v57 = vld [vmem:[%s9138_s5 + $0x1d4] sm:$0xf]  ;;  %s6633_s29 = scalar_lea.hbm %s6632_s2, 1 }
 0x3e8   : > { %4569 = vmatpush.bf16.msra.mxu1 %v6008_v18  ;;  %p6634_p11 = scmp.ne.s32.totalorder %s6632_s2, %s6633_s29  ;;  %p6639_p1 = scmp.lt.s32.totalorder %s6637_s30, %s6633_s29 }
 0x3ea   : > { %4596 = vmatpush.bf16.msrb.mxu3 %v5620_v22  ;;  %4547 = vmatpush.bf16.msra.mxu2 %v5848_v3  ;;  %v5983_v3 = vld [vmem:[%s9138_s5 + $0x320] sm:$0xf]  ;;  %p6635_p12 = pnand %p6634_p11, %p6787_p5  ;;  %p6640_p2 = por %p6639_p1, %p6638_p0 }
 0x3eb   : > { %v5984_v59 = vor.u32 %v6384_v42, %v5983_v3 }
 0x3ec   : > { %4570 = vmatpush.bf16.msra.mxu1 %v6000_v19  ;;  %p6636_p13 = pneg %p6635_p12 }
 0x3ee   : > { %4597 = vmatpush.bf16.msrb.mxu3 %v5612_v47  ;;  %4548 = vmatpush.bf16.msra.mxu2 %v5840_v35  ;;  %v6402_v35 = vld [vmem:[%s9138_s5 + $0x3b4] sm:$0xf0]  ;;  %p6641_p3 = pnand %p6640_p2, %p6636_p13 }
 0x3ef   : > { %v6056_v51 = vor.u32 %v6402_v35, %v6055_v13  ;;  %v6309_v35 = vld [vmem:[%s9138_s5 + $0xd4] sm:$0xf] }
 0x3f0   : > { %4571 = vmatpush.bf16.msra.mxu1 %v5992_v48 }
 0x3f1   : > { %v6565_v24 = vpop.permute.xlu2 %6564 }
 0x3f2   : > { %4598 = vmatpush.bf16.msrb.mxu3 %v5604_v8  ;;  %4580 = vmatpush.bf16.msrb.mxu2 %v6088_v15  ;;  %v6567_v47 = vunpack.i.h.bf16 %v6565_v24  ;;  %v6566_v11 = vunpack.i.l.bf16 %v6565_v24  ;;  %v5833_v15 = vld [vmem:[%s9138_s5 + $0x1f8] sm:$0xf0] }
 0x3f3   : > { %v5836_v60 = vor.u32 %v6345_v55, %v5833_v15  ;;  %v6325_v55 = vld [vmem:[%s9138_s5 + $0x154] sm:$0xf] }
 0x3f4   : > { %4572 = vmatpush.bf16.msra.mxu1 %v5984_v59  ;;  %v5809_v59 = vld [vmem:[%s9138_s5 + $0x1c8] sm:$0xf0] }
 0x3f6   : > { %4599 = vmatpush.bf16.msrb.mxu3 %v5596_v31  ;;  %4581 = vmatpush.bf16.msrb.mxu2 %v6080_v50 }
 0x3f8   : > { %4573 = vmatpush.bf16.msra.mxu1 %v5976_v36  ;;  %v5753_v36 = vld [vmem:[%s9138_s5 + $0x158] sm:$0xf0] }
 0x3f9   : > { %v6580_v61 = vpop.permute.xlu2 %6579 }
 0x3fa   : > { %4600 = vmatpush.bf16.msrb.mxu3 %v5588_v5  ;;  %4582 = vmatpush.bf16.msrb.mxu2 %v6072_v46  ;;  %v6582_v21 = vunpack.i.h.bf16 %v6580_v61  ;;  %v6581_v41 = vunpack.i.l.bf16 %v6580_v61  ;;  %v6398_v46 = vld [vmem:[%s9138_s5 + $0x394] sm:$0xf0]  ;;  %v5689_v61 = vld [vmem:[%s9138_s5 + $0xd8] sm:$0xf0] }
 0x3fe   : > { %4583 = vmatpush.bf16.msrb.mxu2 %v6064_v1  ;;  %v6329_v1 = vld [vmem:[%s9138_s5 + $0x174] sm:$0xf] }
 0x402   : > { %4584 = vmatpush.bf16.msrb.mxu2 %v6056_v51  ;;  %v6327_v51 = vld [vmem:[%s9138_s5 + $0x164] sm:$0xf] }
 0x409   : > { %v6560_v14 = vpop.permute.xlu1 %6559 }
 0x40a   : > { %v6555_v33 = vpop.permute.xlu0 %6554  ;;  %v6562_v29 = vunpack.i.h.bf16 %v6560_v14  ;;  %v6561_v63 = vunpack.i.l.bf16 %v6560_v14  ;;  %v6048_v14 = vor.u32 %v6400_v23, %v6047_v27  ;;  %v6337_v27 = vld [vmem:[%s9138_s5 + $0x1b4] sm:$0xf] }
 0x40b   : > { %v6557_v45 = vunpack.i.h.bf16 %v6555_v33  ;;  %v6556_v52 = vunpack.i.l.bf16 %v6555_v33 }
 0x40c   : > { %4585 = vmatpush.bf16.msrb.mxu2 %v6048_v14  ;;  %v6335_v14 = vld [vmem:[%s9138_s5 + $0x1a4] sm:$0xf] }
 0x40d   : > { %v3628_v20 = vsel %vm3472_vm7, %v8194_v7, %v6557_v45  ;;  %v3621_v17 = vsel %vm3472_vm7, %v8110_v25, %v6556_v52  ;;  %v8637_v45 = vld [vmem:[%s9139_s6] sm:$0x3] }
 0x40e   : > { %v3629_v22 = vsel %vm513_vm0, %v3628_v20, %v6562_v29  ;;  %v3622_v7 = vsel %vm513_vm0, %v3621_v17, %v6561_v63  ;;  %v6039_v29 = vld [vmem:[%s9138_s5 + $0x390] sm:$0xf]  ;;  %v5825_v20 = vld [vmem:[%s9138_s5 + $0x1e8] sm:$0xf0]  ;;  %v5968_v17 = vor.u32 %v6380_v12, %v5967_v53  ;;  %v4485_v0 = vperm.slane %v8637_v45, 0 }
 0x40f   : > { %v3623_v37 = vsel %vm3475_vm8, %v3622_v7, %v6566_v11  ;;  %v3630_v26 = vsel %vm3475_vm8, %v3629_v22, %v6567_v47  ;;  %v6040_v9 = vor.u32 %v6398_v46, %v6039_v29  ;;  %v5705_v22 = vld [vmem:[%s9138_s5 + $0xf8] sm:$0xf0]  ;;  %v5828_v48 = vor.u32 %v6343_v54, %v5825_v20  ;;  %v6333_v29 = vld [vmem:[%s9138_s5 + $0x194] sm:$0xf]  ;;  %v6303_v20 = vld [vmem:[%s9138_s5 + $0xa4] sm:$0xf] }
 0x410   : > { %v5708_v7 = vor.u32 %v6313_v34, %v5705_v22  ;;  %v5817_v47 = vld [vmem:[%s9138_s5 + $0x1d8] sm:$0xf0]  ;;  %4574 = vmatpush.bf16.msra.mxu1 %v5968_v17  ;;  %v6321_v17 = vld [vmem:[%s9138_s5 + $0x134] sm:$0xf]  ;;  %v6331_v34 = vld [vmem:[%s9138_s5 + $0x184] sm:$0xf] }
 0x411   : > { %4586 = vmatpush.bf16.msrb.mxu2 %v6040_v9  ;;  %v5785_v54 = vld [vmem:[%s9138_s5 + $0x198] sm:$0xf0] }
 0x412   : > { %v6570_v6 = vpop.permute.xlu0 %6569  ;;  %v6575_v25 = vpop.permute.xlu1 %6574  ;;  %v5788_v9 = vor.u32 %v6333_v29, %v5785_v54 }
 0x413   : > { %v6572_v39 = vunpack.i.h.bf16 %v6570_v6  ;;  %v6571_v28 = vunpack.i.l.bf16 %v6570_v6  ;;  %v6577_v49 = vunpack.i.h.bf16 %v6575_v25  ;;  %v6576_v8 = vunpack.i.l.bf16 %v6575_v25  ;;  %v6031_v6 = vld [vmem:[%s9138_s5 + $0x380] sm:$0xf]  ;;  %v6396_v25 = vld [vmem:[%s9138_s5 + $0x384] sm:$0xf0] }
 0x414   : > { %4606 = vmatpush.bf16.msrb.mxu1 %v5708_v7  ;;  %v6032_v11 = vor.u32 %v6396_v25, %v6031_v6  ;;  %v5777_v7 = vld [vmem:[%s9138_s5 + $0x188] sm:$0xf0]  ;;  %v6393_v6 = vld [vmem:[%s9138_s5 + $0x374] sm:$0xf]  ;;  %v6025_v25 = vld [vmem:[%s9138_s5 + $0x378] sm:$0xf0] }
 0x415   : > { %v3624_v31 = vsel %vm2256_vm5, %v3623_v37, %v6571_v28  ;;  %v3631_v2 = vsel %vm2256_vm5, %v3630_v26, %v6572_v39  ;;  %v6311_v39 = vld [vmem:[%s9138_s5 + $0xe4] sm:$0xf]  ;;  %v5697_v28 = vld [vmem:[%s9138_s5 + $0xe8] sm:$0xf0] }
 0x416   : > { %v3625_v5 = vsel %vm3478_vm9, %v3624_v31, %v6576_v8  ;;  %v3632_v58 = vsel %vm3478_vm9, %v3631_v2, %v6577_v49  ;;  %v5700_v26 = vor.u32 %v6311_v39, %v5697_v28  ;;  %v5769_v49 = vld [vmem:[%s9138_s5 + $0x178] sm:$0xf0]  ;;  %v5820_v31 = vor.u32 %v6341_v57, %v5817_v47  ;;  %v6339_v2 = vld [vmem:[%s9138_s5 + $0x1c4] sm:$0xf]  ;;  %4587 = vmatpush.bf16.msrb.mxu2 %v6032_v11  ;;  %v5729_v39 = vld [vmem:[%s9138_s5 + $0x128] sm:$0xf0] }
 0x417   : > { %v3626_v18 = vsel %vm3480_vm10, %v3625_v5, %v6581_v41  ;;  %v3633_v10 = vsel %vm3480_vm10, %v3632_v58, %v6582_v21  ;;  %v5772_v42 = vor.u32 %v6329_v1, %v5769_v49  ;;  %v5692_v5 = vor.u32 %v6309_v35, %v5689_v61  ;;  %v5761_v58 = vld [vmem:[%s9138_s5 + $0x168] sm:$0xf0]  ;;  %v5801_v21 = vld [vmem:[%s9138_s5 + $0x1b8] sm:$0xf0]  ;;  %v6307_v41 = vld [vmem:[%s9138_s5 + $0xc4] sm:$0xf] }
 0x418   : > { %4607 = vmatpush.bf16.msrb.mxu1 %v5700_v26  ;;  %v5764_v44 = vor.u32 %v6327_v51, %v5761_v58  ;;  %v5812_v16 = vor.u32 %v6339_v2, %v5809_v59  ;;  %v5657_v57 = vld [vmem:[%s9138_s5 + $0x98] sm:$0xf0]  ;;  %v6319_v47 = vld [vmem:[%s9138_s5 + $0x124] sm:$0xf]  ;;  %v5780_v28 = vor.u32 %v6331_v34, %v5777_v7  ;;  %v6017_v49 = vld [vmem:[%s9138_s5 + $0x368] sm:$0xf0] }
 0x419   : > { %v5732_v1 = vor.u32 %v6319_v47, %v5729_v39  ;;  %v6391_v26 = vld [vmem:[%s9138_s5 + $0x364] sm:$0xf]  ;;  %v5721_v2 = vld [vmem:[%s9138_s5 + $0x118] sm:$0xf0]  ;;  %v5713_v61 = vld [vmem:[%s9138_s5 + $0x108] sm:$0xf0] }
 0x41a   : > { %v6585_v62 = vpop.permute.xlu0 %6584  ;;  %v6315_v35 = vld [vmem:[%s9138_s5 + $0x104] sm:$0xf]  ;;  %v6020_v51 = vor.u32 %v6391_v26, %v6017_v49  ;;  %v6009_v58 = vld [vmem:[%s9138_s5 + $0x358] sm:$0xf0] }
 0x41b   : > { %v6587_v4 = vunpack.i.h.bf16 %v6585_v62  ;;  %v6586_v33 = vunpack.i.l.bf16 %v6585_v62  ;;  %v5681_v62 = vld [vmem:[%s9138_s5 + $0xc8] sm:$0xf0]  ;;  %v6379_v7 = vld [vmem:[%s9138_s5 + $0x304] sm:$0xf]  ;;  %v5897_v39 = vld [vmem:[%s9138_s5 + $0x278] sm:$0xf0] }
 0x41c   : > { %v4498_v52 = vpop.f32.mrf.mxu1  ;;  %4608 = vmatpush.bf16.msrb.mxu1 %v5692_v5  ;;  %v5684_v15 = vor.u32 %v6307_v41, %v5681_v62  ;;  %v6389_v5 = vld [vmem:[%s9138_s5 + $0x354] sm:$0xf] }
 0x41d   : > { %v3627_v50 = vsel %vm3482_vm11, %v3626_v18, %v6586_v33  ;;  %v3634_v24 = vsel %vm3482_vm11, %v3633_v10, %v6587_v4  ;;  %v4499_v37 = vadd.f32 %v4498_v52, %v4485_v0  ;;  %v5756_v4 = vor.u32 %v6325_v55, %v5753_v36  ;;  %v5793_v18 = vld [vmem:[%s9138_s5 + $0x1a8] sm:$0xf0]  ;;  %v6305_v10 = vld [vmem:[%s9138_s5 + $0xb4] sm:$0xf]  ;;  %v5673_v52 = vld [vmem:[%s9138_s5 + $0xb8] sm:$0xf0] }
 0x41e   : > { %v8650_v63 = vpack.c.bf16 %v3627_v50, %v3627_v50  ;;  %v8652_v19 = vpack.c.bf16 %v3634_v24, %v3634_v24  ;;  %v5804_v33 = vor.u32 %v6337_v27, %v5801_v21  ;;  %v6323_v50 = vld [vmem:[%s9138_s5 + $0x144] sm:$0xf]  ;;  %v5676_v24 = vor.u32 %v6305_v10, %v5673_v52  ;;  %v5737_v0 = vld [vmem:[%s9138_s5 + $0x138] sm:$0xf0]  ;;  %v6001_v21 = vld [vmem:[%s9138_s5 + $0x348] sm:$0xf0] }
 0x41f   : > { %v5796_v12 = vor.u32 %v6335_v14, %v5793_v18  ;;  %v5740_v22 = vor.u32 %v6321_v17, %v5737_v0  ;;  %v6387_v27 = vld [vmem:[%s9138_s5 + $0x344] sm:$0xf]  ;;  %v6381_v10 = vld [vmem:[%s9138_s5 + $0x314] sm:$0xf]  ;;  %v5977_v52 = vld [vmem:[%s9138_s5 + $0x318] sm:$0xf0] }
 0x420   : > { %4549 = vmatmul.bf16.vlgmr.msra.gmra.mxu2 %v8650_v63  ;;  %4562 = vmatmul.bf16.vlgmr.msra.gmra.mxu3 %v8652_v19  ;;  %v6004_v62 = vor.u32 %v6387_v27, %v6001_v21  ;;  %v5980_v54 = vor.u32 %v6381_v10, %v5977_v52  ;;  %v6375_v21 = vld [vmem:[%s9138_s5 + $0x2e4] sm:$0xf]  ;;  %v5873_v52 = vld [vmem:[%s9138_s5 + $0x248] sm:$0xf0] }
 0x421   : > { %4632 = vmatpush.bf16.msra.mxu3 %v5836_v60  ;;  %4619 = vmatpush.bf16.msra.mxu2 %v5772_v42  ;;  %v5745_v60 = vld [vmem:[%s9138_s5 + $0x148] sm:$0xf0]  ;;  %v6317_v42 = vld [vmem:[%s9138_s5 + $0x114] sm:$0xf]  ;;  %v6355_v10 = vld [vmem:[%s9138_s5 + $0x244] sm:$0xf] }
 0x422   : > { %4609 = vmatpush.bf16.msrb.mxu1 %v5684_v15  ;;  %v5748_v53 = vor.u32 %v6323_v50, %v5745_v60  ;;  %v5724_v59 = vor.u32 %v6317_v42, %v5721_v2  ;;  %v6385_v15 = vld [vmem:[%s9138_s5 + $0x334] sm:$0xf]  ;;  %v5961_v42 = vld [vmem:[%s9138_s5 + $0x2f8] sm:$0xf0] }
 0x424   : > { %v4511_v8 = vpop.f32.mrf.mxu2  ;;  %v4500_v3 = vpop.f32.mrf.mxu1 }
 0x425   : > { %v8696_v13 = vadd.f32 %v4511_v8, %v4499_v37  ;;  %4633 = vmatpush.bf16.msra.mxu3 %v5828_v48  ;;  %4620 = vmatpush.bf16.msra.mxu2 %v5764_v44  ;;  %v6301_v48 = vld [vmem:[%s9138_s5 + $0x94] sm:$0xf]  ;;  %v6028_v37 = vor.u32 %v6393_v6, %v6025_v25  ;;  %v6299_v8 = vld [vmem:[%s9138_s5 + $0x84] sm:$0xf]  ;;  %v5649_v3 = vld [vmem:[%s9138_s5 + $0x88] sm:$0xf0]  ;;  %v5716_v44 = vor.u32 %v6315_v35, %v5713_v61 }
 0x426   : > { %4610 = vmatpush.bf16.msrb.mxu1 %v5676_v24  ;;  %v5660_v11 = vor.u32 %v6301_v48, %v5657_v57  ;;  %v5969_v6 = vld [vmem:[%s9138_s5 + $0x308] sm:$0xf0] }
 0x429   : > { %4634 = vmatpush.bf16.msra.mxu3 %v5820_v31  ;;  %4621 = vmatpush.bf16.msra.mxu2 %v5756_v4  ;;  %v5652_v31 = vor.u32 %v6299_v8, %v5649_v3  ;;  %v6383_v4 = vld [vmem:[%s9138_s5 + $0x324] sm:$0xf]  ;;  %v6377_v3 = vld [vmem:[%s9138_s5 + $0x2f4] sm:$0xf] }
 0x42c   : > { %v4513_v23 = vpop.f32.mrf.mxu2 }
 0x42d   : > { %4635 = vmatpush.bf16.msra.mxu3 %v5812_v16  ;;  %4622 = vmatpush.bf16.msra.mxu2 %v5748_v53  ;;  %v6012_v16 = vor.u32 %v6389_v5, %v6009_v58  ;;  %v6359_v5 = vld [vmem:[%s9138_s5 + $0x264] sm:$0xf]  ;;  %v5889_v58 = vld [vmem:[%s9138_s5 + $0x268] sm:$0xf0] }
 0x430   : > { %4601 = vmatmul.bf16.vlgmr.msrb.gmra.mxu3 %v8237_v40  ;;  %v5665_v40 = vld [vmem:[%s9138_s5 + $0xa8] sm:$0xf0] }
 0x431   : > { %4636 = vmatpush.bf16.msra.mxu3 %v5804_v33  ;;  %v5668_v46 = vor.u32 %v6303_v20, %v5665_v40  ;;  %4623 = vmatpush.bf16.msra.mxu2 %v5740_v22  ;;  %v6600_v41 = vpop.permute.xlu2 %6599  ;;  %v5985_v33 = vld [vmem:[%s9138_s5 + $0x328] sm:$0xf0] }
 0x432   : > { %v5988_v18 = vor.u32 %v6383_v4, %v5985_v33  ;;  %v6602_v53 = vunpack.i.h.bf16 %v6600_v41  ;;  %v6373_v33 = vld [vmem:[%s9138_s5 + $0x2d4] sm:$0xf] }
 0x433   : > { %4611 = vmatpush.bf16.msrb.mxu1 %v5668_v46 }
 0x435   : > { %4637 = vmatpush.bf16.msra.mxu3 %v5796_v12  ;;  %4624 = vmatpush.bf16.msra.mxu2 %v5732_v1  ;;  %v6601_v12 = vunpack.i.l.bf16 %v6600_v41  ;;  %v5953_v41 = vld [vmem:[%s9138_s5 + $0x2e8] sm:$0xf0] }
 0x436   : > { %v5956_v4 = vor.u32 %v6375_v21, %v5953_v41  ;;  %v6397_v41 = vld [vmem:[%s9138_s5 + $0x394] sm:$0xf] }
 0x437   : > { %4612 = vmatpush.bf16.msrb.mxu1 %v5660_v11  ;;  %v6361_v11 = vld [vmem:[%s9138_s5 + $0x274] sm:$0xf] }
 0x439   : > { %4638 = vmatpush.bf16.msra.mxu3 %v5788_v9  ;;  %4625 = vmatpush.bf16.msra.mxu2 %v5724_v59  ;;  %v6605_v14 = vpop.permute.xlu2 %6604  ;;  %v5900_v59 = vor.u32 %v6361_v11, %v5897_v39  ;;  %v6409_v39 = vld [vmem:[%s9138_s5 + $0x3f4] sm:$0xf] }
 0x43a   : > { %v6607_v25 = vunpack.i.h.bf16 %v6605_v14 }
 0x43b   : > { %4613 = vmatpush.bf16.msrb.mxu1 %v5652_v31 }
 0x43d   : > { %4639 = vmatpush.bf16.msra.mxu3 %v5780_v28  ;;  %4626 = vmatpush.bf16.msra.mxu2 %v5716_v44 }
 0x440   : > { %4640 = vmatmul.bf16.vlgmr.msra.gmra.mxu3 %v8404_v38  ;;  %v5993_v38 = vld [vmem:[%s9138_s5 + $0x338] sm:$0xf0] }
 0x441   : > { %4671 = vmatpush.bf16.msrb.mxu3 %v6028_v37  ;;  %v5996_v23 = vor.u32 %v6385_v15, %v5993_v38  ;;  %v5972_v37 = vor.u32 %v6379_v7, %v5969_v6  ;;  %v3687_v31 = vpop.permute.xlu2 %3686  ;;  %v6357_v38 = vld [vmem:[%s9138_s5 + $0x254] sm:$0xf]  ;;  %v5921_v7 = vld [vmem:[%s9138_s5 + $0x2a8] sm:$0xf0] }
 0x445   : > { %4672 = vmatpush.bf16.msrb.mxu3 %v6020_v51 }
 0x447   : > { %v6590_v55 = vpop.permute.xlu1 %6589 }
 0x448   : > { %v6592_v0 = vunpack.i.h.bf16 %v6590_v55  ;;  %v6591_v9 = vunpack.i.l.bf16 %v6590_v55  ;;  %v5892_v55 = vor.u32 %v6359_v5, %v5889_v58  ;;  %v6401_v58 = vld [vmem:[%s9138_s5 + $0x3b4] sm:$0xf] }
 0x449   : > { %4673 = vmatpush.bf16.msrb.mxu3 %v6012_v16  ;;  %v6610_v36 = vpop.permute.xlu0 %6609  ;;  %v5964_v16 = vor.u32 %v6377_v3, %v5961_v42  ;;  %v6407_v3 = vld [vmem:[%s9138_s5 + $0x3e4] sm:$0xf]  ;;  %v6081_v42 = vld [vmem:[%s9138_s5 + $0x3e8] sm:$0xf0] }
 0x44a   : > { %v6612_v20 = vunpack.i.h.bf16 %v6610_v36  ;;  %v6611_v40 = vunpack.i.l.bf16 %v6610_v36  ;;  %v5881_v36 = vld [vmem:[%s9138_s5 + $0x258] sm:$0xf0] }
 0x44d   : > { %4674 = vmatpush.bf16.msrb.mxu3 %v6004_v62 }
 0x44f   : > { %v6595_v50 = vpop.permute.xlu1 %6594 }
 0x450   : > { %v6597_v24 = vunpack.i.h.bf16 %v6595_v50  ;;  %v6596_v60 = vunpack.i.l.bf16 %v6595_v50 }
 0x451   : > { %4675 = vmatpush.bf16.msrb.mxu3 %v5996_v23  ;;  %v3658_v29 = vpop.permute.xlu0 %3657 }
 0x452   : > { %v3700_v17 = vsel %vm3472_vm7, %v8379_v43, %v6597_v24  ;;  %v3693_v46 = vsel %vm3472_vm7, %v8306_v30, %v6596_v60  ;;  %v6606_v43 = vunpack.i.l.bf16 %v6605_v14  ;;  %v6371_v24 = vld [vmem:[%s9138_s5 + $0x2c4] sm:$0xf]  ;;  %v5937_v60 = vld [vmem:[%s9138_s5 + $0x2c8] sm:$0xf0] }
 0x453   : > { %v3701_v34 = vsel %vm513_vm0, %v3700_v17, %v6602_v53  ;;  %v3694_v22 = vsel %vm513_vm0, %v3693_v46, %v6601_v12  ;;  %v5876_v12 = vor.u32 %v6355_v10, %v5873_v52  ;;  %v5929_v17 = vld [vmem:[%s9138_s5 + $0x2b8] sm:$0xf0]  ;;  %v6417_v10 = vld [vmem:[%s9140_s7 + $0x30] sm:$0xff]  ;;  %v6416_v52 = vld [vmem:[%s9140_s7 + $0x28] sm:$0xff] }
 0x454   : > { %v3695_v48 = vsel %vm3475_vm8, %v3694_v22, %v6611_v40  ;;  %v3702_v30 = vsel %vm3475_vm8, %v3701_v34, %v6612_v20  ;;  %v5940_v20 = vor.u32 %v6371_v24, %v5937_v60  ;;  %v6369_v40 = vld [vmem:[%s9138_s5 + $0x2b4] sm:$0xf]  ;;  %v6367_v22 = vld [vmem:[%s9138_s5 + $0x2a4] sm:$0xf]  ;;  %v6414_v24 = vld [vmem:[%s9140_s7 + $0x18] sm:$0xff] }
 0x455   : > { %4676 = vmatpush.bf16.msrb.mxu3 %v5988_v18  ;;  %v3696_v57 = vsel %vm2256_vm5, %v3695_v48, %v6591_v9  ;;  %v3703_v47 = vsel %vm2256_vm5, %v3702_v30, %v6592_v0  ;;  %v5884_v18 = vor.u32 %v6357_v38, %v5881_v36  ;;  %v6351_v0 = vld [vmem:[%s9138_s5 + $0x224] sm:$0xf]  ;;  %v5857_v9 = vld [vmem:[%s9138_s5 + $0x228] sm:$0xf0]  ;;  %v5932_v34 = vor.u32 %v6369_v40, %v5929_v17  ;;  %v6365_v48 = vld [vmem:[%s9138_s5 + $0x294] sm:$0xf] }
 0x456   : > { %v3697_v28 = vsel %vm3478_vm9, %v3696_v57, %v6606_v43  ;;  %v4537_v1 = vpop.f32.mrf.mxu1  ;;  %v3704_v26 = vsel %vm3478_vm9, %v3703_v47, %v6607_v25  ;;  %v5860_v6 = vor.u32 %v6351_v0, %v5857_v9  ;;  %v6349_v25 = vld [vmem:[%s9138_s5 + $0x214] sm:$0xf]  ;;  %v5924_v43 = vor.u32 %v6367_v22, %v5921_v7  ;;  %v5913_v30 = vld [vmem:[%s9138_s5 + $0x298] sm:$0xf0]  ;;  %v6347_v57 = vld [vmem:[%s9138_s5 + $0x204] sm:$0xf] }
 0x457   : > { %v3698_v49 = vsel %vm3480_vm10, %v3697_v28, %v3658_v29  ;;  %v3662_v8 = vpop.permute.xlu1 %3661  ;;  %v3705_v51 = vsel %vm3480_vm10, %v3704_v26, %v3687_v31  ;;  %v6353_v29 = vld [vmem:[%s9138_s5 + $0x234] sm:$0xf]  ;;  %v5841_v47 = vld [vmem:[%s9138_s5 + $0x208] sm:$0xf0]  ;;  %v5916_v11 = vor.u32 %v6365_v48, %v5913_v30  ;;  %v6089_v28 = vld [vmem:[%s9138_s5 + $0x3f8] sm:$0xf0]  ;;  %v6084_v31 = vor.u32 %v6407_v3, %v6081_v42 }
 0x458   : > { %v3699_v2 = vsel %vm3482_vm11, %v3698_v49, %v3662_v8  ;;  %v5844_v26 = vor.u32 %v6347_v57, %v5841_v47  ;;  %v6092_v49 = vor.u32 %v6409_v39, %v6089_v28  ;;  %v6033_v38 = vld [vmem:[%s9138_s5 + $0x388] sm:$0xf0]  ;;  %v6413_v60 = vld [vmem:[%s9140_s7 + $0x10] sm:$0xff]  ;;  %v6426_v17 = vld [vmem:[%s9140_s7 + $0x78] sm:$0xff]  ;;  %v4486_v47 = vperm.slane %v8637_v45, 1 }
 0x459   : > { %4677 = vmatpush.bf16.msrb.mxu3 %v5980_v54  ;;  %v3713_v35 = vpack.c.bf16 %v3699_v2, %v3699_v2  ;;  %v3691_v61 = vpop.permute.xlu0 %3690  ;;  %v5865_v54 = vld [vmem:[%s9138_s5 + $0x238] sm:$0xf0]  ;;  %v6405_v2 = vld [vmem:[%s9138_s5 + $0x3d4] sm:$0xf]  ;;  %v6419_v45 = vld [vmem:[%s9140_s7 + $0x40] sm:$0xff] }
 0x45a   : > { %v3706_v44 = vsel %vm3482_vm11, %v3705_v51, %v3691_v61  ;;  %v5868_v46 = vor.u32 %v6353_v29, %v5865_v54  ;;  %v6403_v61 = vld [vmem:[%s9138_s5 + $0x3c4] sm:$0xf]  ;;  %v6065_v51 = vld [vmem:[%s9138_s5 + $0x3c8] sm:$0xf0]  ;;  %v6425_v0 = vld [vmem:[%s9140_s7 + $0x70] sm:$0xff] }
 0x45b   : > { %v8890_v27 = vpack.c.bf16 %v3706_v44, %v3706_v44  ;;  %4575 = vmatmul.bf16.vlgmr.msra.gmra.mxu1 %v3713_v35  ;;  %v6068_v5 = vor.u32 %v6403_v61, %v6065_v51  ;;  %v6399_v44 = vld [vmem:[%s9138_s5 + $0x3a4] sm:$0xf]  ;;  %v6422_v57 = vld [vmem:[%s9140_s7 + $0x58] sm:$0xff] }
 0x45c   : > { %4645 = vmatpush.bf16.msra.mxu1 %v5900_v59  ;;  %v4524_v62 = vpop.f32.mrf.mxu3  ;;  %v6073_v59 = vld [vmem:[%s9138_s5 + $0x3d8] sm:$0xf0]  ;;  %v6411_v54 = vld [vmem:[%s9140_s7] sm:$0xff] }
 0x45d   : > { %4678 = vmatpush.bf16.msrb.mxu3 %v5972_v37  ;;  %v4525_v15 = vadd.f32 %v4524_v62, %v8696_v13  ;;  %4588 = vmatmul.bf16.vlgmr.msrb.gmra.mxu2 %v8890_v27  ;;  %v5945_v13 = vld [vmem:[%s9138_s5 + $0x2d8] sm:$0xf0]  ;;  %v5905_v37 = vld [vmem:[%s9138_s5 + $0x288] sm:$0xf0] }
 0x45e   : > { %v4539_v23 = vpop.f32.mrf.mxu1  ;;  %4658 = vmatpush.bf16.msrb.mxu2 %v5964_v16  ;;  %v5948_v50 = vor.u32 %v6373_v33, %v5945_v13  ;;  %v6049_v16 = vld [vmem:[%s9138_s5 + $0x3a8] sm:$0xf0]  ;;  %v6041_v62 = vld [vmem:[%s9138_s5 + $0x398] sm:$0xf0] }
 0x45f   : > { %v8912_v14 = vadd.f32 %v4537_v1, %v4525_v15  ;;  %v6363_v1 = vld [vmem:[%s9138_s5 + $0x284] sm:$0xf]  ;;  %v6052_v21 = vor.u32 %v6399_v44, %v6049_v16  ;;  %v6418_v33 = vld [vmem:[%s9140_s7 + $0x38] sm:$0xff]  ;;  %v4865_v44 = vld [vmem:[%s9142_s9 + $0x28] sm:$0x3] }
 0x460   : > { %4679 = vmatmul.bf16.vlgmr.msrb.gmra.mxu3 %v3713_v35  ;;  %4646 = vmatpush.bf16.msra.mxu1 %v5892_v55  ;;  %v5908_v8 = vor.u32 %v6363_v1, %v5905_v37  ;;  %v6076_v35 = vor.u32 %v6405_v2, %v6073_v59  ;;  %v6044_v55 = vor.u32 %v6397_v41, %v6041_v62  ;;  %v6395_v15 = vld [vmem:[%s9138_s5 + $0x384] sm:$0xf]  ;;  %v6420_v37 = vld [vmem:[%s9140_s7 + $0x48] sm:$0xff]  ;;  %v4888_v16 = vunpack.c.l.b16 %v4865_v44 }
 0x461   : > { %v6036_v36 = vor.u32 %v6395_v15, %v6033_v38  ;;  %4841 = vmatpush.bf16.msra.mxu3 %v6426_v17  ;;  %v6431_v62 = vld [vmem:[%s9142_s9 + $0x20] sm:$0xff]  ;;  %v6429_v15 = vld [vmem:[%s9142_s9 + $0x10] sm:$0xff]  ;;  %v6428_v38 = vld [vmem:[%s9142_s9 + $0x8] sm:$0xff] }
 0x462   : > { %4659 = vmatpush.bf16.msrb.mxu2 %v5956_v4 }
 0x464   : > { %4647 = vmatpush.bf16.msra.mxu1 %v5884_v18  ;;  %v4526_v53 = vpop.f32.mrf.mxu3 }
 0x465   : > { %4842 = vmatpush.bf16.msra.mxu3 %v6425_v0 }
 0x466   : > { %4660 = vmatpush.bf16.msrb.mxu2 %v5948_v50 }
 0x468   : > { %4648 = vmatpush.bf16.msra.mxu1 %v5876_v12  ;;  %v6412_v12 = vld [vmem:[%s9140_s7 + $0x8] sm:$0xff] }
 0x46a   : > { %4661 = vmatpush.bf16.msrb.mxu2 %v5940_v20 }
 0x46b   : > { %4614 = vmatmul.bf16.vlgmr.msrb.gmra.mxu1 %v8239_v56  ;;  %v5849_v56 = vld [vmem:[%s9138_s5 + $0x218] sm:$0xf0] }
 0x46c   : > { %4649 = vmatpush.bf16.msra.mxu1 %v5868_v46 }
 0x46d   : > { %4627 = vmatmul.bf16.vlgmr.msra.gmra.mxu2 %v8402_v32  ;;  %v5852_v32 = vor.u32 %v6349_v25, %v5849_v56  ;;  %v6424_v56 = vld [vmem:[%s9140_s7 + $0x68] sm:$0xff] }
 0x46e   : > { %4662 = vmatpush.bf16.msrb.mxu2 %v5932_v34  ;;  %4843 = vmatpush.bf16.msra.mxu3 %v6424_v56 }
 0x470   : > { %4650 = vmatpush.bf16.msra.mxu1 %v5860_v6 }
 0x472   : > { %4663 = vmatpush.bf16.msrb.mxu2 %v5924_v43 }
 0x474   : > { %4651 = vmatpush.bf16.msra.mxu1 %v5852_v32 }
 0x476   : > { %4664 = vmatpush.bf16.msrb.mxu2 %v5916_v11  ;;  %v6421_v11 = vld [vmem:[%s9140_s7 + $0x50] sm:$0xff] }
 0x478   : > { %4652 = vmatpush.bf16.msra.mxu1 %v5844_v26 }
 0x47a   : > { %4665 = vmatpush.bf16.msrb.mxu2 %v5908_v8 }
 0x47b   : > { %4653 = vmatmul.bf16.vlgmr.msra.gmra.mxu1 %v8650_v63  ;;  %v6057_v63 = vld [vmem:[%s9138_s5 + $0x3b8] sm:$0xf0] }
 0x47c   : > { %4684 = vmatpush.bf16.msrb.mxu1 %v6092_v49 }
 0x47d   : > { %4666 = vmatmul.bf16.vlgmr.msrb.gmra.mxu2 %v8652_v19  ;;  %v6060_v19 = vor.u32 %v6401_v58, %v6057_v63 }
 0x47e   : > { %4828 = vmatpush.bf16.msra.mxu2 %v6418_v33  ;;  %v4731_v33 = vld [vmem:[%s9141_s8] sm:$0x1] }
 0x480   : > { %4685 = vmatpush.bf16.msrb.mxu1 %v6084_v31 }
 0x482   : > { %4829 = vmatpush.bf16.msra.mxu2 %v6417_v10 }
 0x484   : > { %4686 = vmatpush.bf16.msrb.mxu1 %v6076_v35 }
 0x486   : > { %4830 = vmatpush.bf16.msra.mxu2 %v6416_v52 }
 0x488   : > { %4687 = vmatpush.bf16.msrb.mxu1 %v6068_v5 }
 0x48c   : > { %4688 = vmatpush.bf16.msrb.mxu1 %v6060_v19 }
 0x490   : > { %4689 = vmatpush.bf16.msrb.mxu1 %v6052_v21  ;;  %v4894_v21 = vpack.c.b16 %v4888_v16, %v4888_v16 }
 0x492   : > { %v4906_v41 = vsel %vm4904_vm12, %v4894_v21, 0 }
 0x494   : > { %4690 = vmatpush.bf16.msrb.mxu1 %v6044_v55  ;;  %v6430_v55 = vld [vmem:[%s9142_s9 + $0x18] sm:$0xff] }
 0x498   : > { %4691 = vmatpush.bf16.msrb.mxu1 %v6036_v36 }
 0x49b   : > { %4692 = vmatmul.bf16.vlgmr.msrb.gmra.mxu1 %v8890_v27  ;;  %v6415_v27 = vld [vmem:[%s9140_s7 + $0x20] sm:$0xff] }
 0x49c   : > { %4831 = vmatpush.bf16.msra.mxu2 %v6415_v27  ;;  %4910 = vmatpush.bf16.msra.mxu1 %v4906_v41 }
 0x4a0   : > { %4832 = vmatpush.bf16.msra.mxu2 %v6414_v24  ;;  %4911 = vmatpush.bf16.msra.mxu1 %v6431_v62 }
 0x4a3   : > { %v4550_v23 = vpop.f32.mrf.mxu2  ;;  %v4563_v4 = vpop.f32.mrf.mxu3 }
 0x4a4   : > { %4833 = vmatpush.bf16.msra.mxu2 %v6413_v60  ;;  %v4551_v46 = vadd.f32 %v4550_v23, %v8912_v14  ;;  %v6423_v14 = vld [vmem:[%s9140_s7 + $0x60] sm:$0xff]  ;;  %4912 = vmatpush.bf16.msra.mxu1 %v6430_v55 }
 0x4a5   : > { %4844 = vmatpush.bf16.msra.mxu3 %v6423_v14 }
 0x4a6   : > { %v4564_v9 = vadd.f32 %v4563_v4, %v4551_v46  ;;  %v6427_v4 = vld [vmem:[%s9142_s9] sm:$0xff] }
 0x4a8   : > { %4834 = vmatpush.bf16.msra.mxu2 %v6412_v12  ;;  %4913 = vmatpush.bf16.msra.mxu1 %v6429_v15 }
 0x4a9   : > { %4845 = vmatpush.bf16.msra.mxu3 %v6422_v57 }
 0x4ab   : > { %v4552_v13 = vpop.f32.mrf.mxu2  ;;  %v4565_v18 = vpop.f32.mrf.mxu3 }
 0x4ac   : > { %4835 = vmatpush.bf16.msra.mxu2 %v6411_v54  ;;  %4914 = vmatpush.bf16.msra.mxu1 %v6428_v38 }
 0x4ad   : > { %4846 = vmatpush.bf16.msra.mxu3 %v6421_v11 }
 0x4b0   : > { %4915 = vmatpush.bf16.msra.mxu1 %v6427_v4 }
 0x4b1   : > { %4847 = vmatpush.bf16.msra.mxu3 %v6420_v37 }
 0x4b3   : > { %v4602_v50 = vpop.f32.mrf.mxu3 }
 0x4b4   : > { %v4603_v39 = vadd.f32 %v4602_v50, %v4486_v47  ;;  %v4866_v50 = vld [vmem:[%s9143_s10] sm:$0x1] }
 0x4b5   : > { %4848 = vmatpush.bf16.msra.mxu3 %v6419_v45 }
 0x4bb   : > { %v4604_v53 = vpop.f32.mrf.mxu3 }
 0x4c3   : > { %v4641_v29 = vpop.f32.mrf.mxu3 }
 0x4cb   : > { %v4643_v20 = vpop.f32.mrf.mxu3 }
 0x4d8   : > { %v4576_v40 = vpop.f32.mrf.mxu1 }
 0x4d9   : > { %v4577_v34 = vadd.f32 %v4576_v40, %v4564_v9 }
 0x4e0   : > { %v4578_v7 = vpop.f32.mrf.mxu1  ;;  %v4589_v6 = vpop.f32.mrf.mxu2 }
 0x4e1   : > { %v4590_v25 = vadd.f32 %v4589_v6, %v4577_v34 }
 0x4e3   : > { %v4680_v22 = vpop.f32.mrf.mxu3  ;;  %v4697_v43 = vpack.c.bf16 %v4590_v25, %v4590_v25 }
 0x4e5   : > { %4836 = vmatmul.bf16.vlgmr.msra.gmra.mxu2 %v4697_v43 }
 0x4e8   : > { %v4615_v30 = vpop.f32.mrf.mxu1  ;;  %v4591_v32 = vpop.f32.mrf.mxu2 }
 0x4e9   : > { %v4616_v28 = vadd.f32 %v4615_v30, %v4603_v39 }
 0x4eb   : > { %v4682_v48 = vpop.f32.mrf.mxu3 }
 0x4f0   : > { %v4617_v1 = vpop.f32.mrf.mxu1  ;;  %v4628_v26 = vpop.f32.mrf.mxu2 }
 0x4f1   : > { %v4629_v49 = vadd.f32 %v4628_v26, %v4616_v28 }
 0x4f3   : > { %v4642_v8 = vadd.f32 %v4641_v29, %v4629_v49 }
 0x4f8   : > { %v4654_v3 = vpop.f32.mrf.mxu1  ;;  %v4630_v42 = vpop.f32.mrf.mxu2 }
 0x4f9   : > { %v4655_v35 = vadd.f32 %v4654_v3, %v4642_v8 }
 0x500   : > { %v4656_v31 = vpop.f32.mrf.mxu1  ;;  %v4667_v2 = vpop.f32.mrf.mxu2 }
 0x501   : > { %v4668_v61 = vadd.f32 %v4667_v2, %v4655_v35 }
 0x503   : > { %v4681_v51 = vadd.f32 %v4680_v22, %v4668_v61 }
 0x508   : > { %v4669_v59 = vpop.f32.mrf.mxu2 }
 0x518   : > { %v4693_v5 = vpop.f32.mrf.mxu1 }
 0x519   : > { %v4694_v58 = vadd.f32 %v4693_v5, %v4681_v51 }
 0x51b   : > { %v4698_v63 = vpack.c.bf16 %v4694_v58, %v4694_v58 }
 0x51d   : > { %4849 = vmatmul.bf16.vlgmr.msra.gmra.mxu3 %v4698_v63 }
 0x520   : > { %v4695_v19 = vpop.f32.mrf.mxu1 }
 0x568   : > { %v4837_v36 = vpop.f32.mrf.mxu2 }
 0x569   : > { %v4838_v13 = vadd.f32 %v4837_v36, %v4731_v33 }
 0x570   : > { %v4839_v23 = vpop.f32.mrf.mxu2 }
 0x5a0   : > { %v4850_v18 = vpop.f32.mrf.mxu3 }
 0x5a1   : > { %v4851_v10 = vadd.f32 %v4850_v18, %v4838_v13 }
 0x5a3   : > { %v4854_v52 = vpack.c.bf16 %v4851_v10, %v4851_v10 }
 0x5a5   : > { %6177 = vmatmul.msk.bf16.vlgmr.msra.gmra.mxu1 %vm4900_vm13, %v4854_v52 }
 0x5a8   : > { %v4852_v27 = vpop.f32.mrf.mxu3 }
 0x622   : > { %v4917_v24 = vpop.f32.mrf.mxu1 }
 0x623   : > { %v4918_v60 = vadd.f32 %v4917_v24, %v4866_v50 }
 0x625   : > { %4922 = vst.msk [vmem:[%s378_s15] sm:$0x1] %vm4921_vm14, %v4918_v60 }
 0x626   : > { %6644 = shalt.err (!%p6641_p3)
}
 0x627   : > { %6436 = dma.vmem_to_hbm [thread:$0]  (%p6787_p5), %s4935_s0, 16, %s4937_s1, %s4924_s13  }
 0x62a   : > { %v4919_v53 = vpop.f32.mrf.mxu1 }
 0x62b PF: > { %p6442_p4 = scmp.ge.s32.totalorder %s6679_s20, 2  ;;  %s4948_s24 = sand.u32 1, %s6667_s17  }
 0x62c   : > { %s4949_s3 = scalar_lea.sflag [#allocation3], %s4948_s24 }
 0x62d   : > { %p6439_p7 = pnand %p6442_p4, %p6791_p6 }
 0x62f   : > { %p6440_p8 = pneg %p6439_p7 }
 0x631   : > { %6662 = dma.done.wait (%p6440_p8), %s4949_s3, 16  }
 0x632   : > { %6664 = vsyncadd (%p6440_p8), %s4949_s3, 4294967280  ;;  %s9231_s22 = sld [smem:[#allocation5_spill]]  ;;  %p21_p9 = scmp.ge.s32.totalorder %s6774_s23, 4  }
 0x633   : > { %s9232_s19 = sld [smem:[#allocation6_spill]]  ;;  %s9233_s17 = smov %s6671_s18 }
 0x634   : > { %s9235_s20 = smov %s6774_s23  ;;  %23 = sbr.rel (!%p21_p9) target bundleno = 8 (0x8), region = 102 }
 0x638   : > { %s9234_s18 = smov %s9231_s22 }
 0x639   :  { %4954 = vsyncpa [#allocation3], 1 }
 0x63a   :  { %4956 = vsyncpa [#allocation3 + $0x1], 1 }

</bundles_post_ra>
